<compile_context>
chip_gen: v7x
topology: tpu7x:2x2x1
jax: 0.10.0
libtpu: 0.0.40
codegen_flags: <defaults>
</compile_context>

<pallas_src>
import functools
import math

import jax
import jax.numpy as jnp
from jax import lax
from jax.experimental import pallas as pl
from jax.experimental.pallas import tpu as pltpu


def _weighted_pool_kernel(x_ref, mask_ref, w_ref, out_ref, *, bb_chunk):
    # x_ref:    (BB, S, D)  block of x
    # mask_ref: (BB, S)     block of mask (S on the lane axis)
    # w_ref:    (1, D)      lane-dense weight row (shared across grid)
    # out_ref:  (BB, D)     output rows for this batch block
    BB, S, D = x_ref.shape
    n_sub = BB // bb_chunk

    # Hoisted once per grid step (JAX does not CSE broadcasts inside loops).
    wb = w_ref[...].astype(jnp.float32)[None, :, :]              # (1, 1, D)

    def body(c, carry):
        b0 = pl.multiple_of(c * bb_chunk, bb_chunk)
        # Per-sub-chunk loads/casts only: the (bbc, S, D) temporaries stay
        # small instead of becoming x-tile-sized VMEM slabs.
        xc = x_ref[pl.ds(b0, bb_chunk), :, :].astype(jnp.float32)   # (bbc,S,D)
        mc = mask_ref[pl.ds(b0, bb_chunk), :].astype(jnp.float32)   # (bbc,S)

        # alpha = sum_d x * w  (lane reduction over D; VPU + XLU)
        alpha = jnp.sum(xc * wb, axis=-1)                           # (bbc, S)

        # masked softmax over the sequence axis (last/lane axis)
        alpha = alpha + (1.0 - mc) * (-1e30)
        alpha = alpha - jnp.max(alpha, axis=-1, keepdims=True)
        e = jnp.exp(alpha)
        denom = jnp.sum(e, axis=-1, keepdims=True)                  # >= 1
        inv = pl.reciprocal(denom, approx=True)                     # EUP slot
        inv = inv * (2.0 - denom * inv)                             # Newton step
        alphas = e * inv                                            # (bbc, S)

        # pooled = sum_s alphas * x  (sublane reduction over S)
        pooled = jnp.sum(alphas[:, :, None] * xc, axis=1)           # (bbc, D)
        out_ref[pl.ds(b0, bb_chunk), :] = pooled.astype(out_ref.dtype)
        return carry

    if n_sub == 1:
        body(0, 0)
    else:
        lax.fori_loop(0, n_sub, body, 0, unroll=(n_sub <= 8))


def _vmem_capacity_bytes():
    """Per-core VMEM capacity; conservative 64 MiB (v7x) fallback."""
    try:
        info = pltpu.get_tpu_info()
        cap = getattr(info, "vmem_capacity_bytes", None)
        if cap:
            return int(cap)
    except Exception:
        pass
    return 64 * 1024 * 1024


def _choose_block_b(B, S, D, itemsize, vmem_capacity):
    """Pick a sublane-dense batch block sized from the VMEM budget."""
    # x is double-buffered by the pipeline -> budget ~vmem/4 per x tile,
    # capped at 16 MiB (per-step overhead already <~3% there on every gen).
    x_tile_target = max(1 << 20, min(16 << 20, vmem_capacity // 4))
    bytes_per_row = max(1, S * D * itemsize)
    bb = max(8, (x_tile_target // bytes_per_row) // 8 * 8)
    bb = min(bb, B)
    # Grid shaping: if everything fits in < 4 steps but B is large enough,
    # split into >= 4 steps (>= 2 per TensorCore on v7x megacore, steady-state
    # input/output DMA overlap everywhere). Cheap on single-TC v5e/v6e.
    if B >= 32 and pl.cdiv(B, bb) < 4:
        bb = min(bb, max(8, (B // 4) // 8 * 8))
    return bb


def _choose_sub_chunk(block_b, S, D, temp_budget_bytes=1 << 20):
    """In-kernel batch sub-chunk so per-chunk f32 temps stay ~<= 1 MiB."""
    if block_b % 8 != 0:
        return block_b                    # tiny / ragged block: single chunk
    bbc = 8
    while (bbc * 2 <= block_b and block_b % (bbc * 2) == 0
           and bbc * 2 * S * D * 4 <= temp_budget_bytes):
        bbc *= 2
    return bbc


def weighted_pool(x, mask, weight, *, block_b=None):
    B, S, D = x.shape
    assert mask.shape == (B, S)
    assert weight.shape == (D, 1)

    vmem_cap = _vmem_capacity_bytes()
    if block_b is None:
        block_b = _choose_block_b(B, S, D, x.dtype.itemsize, vmem_cap)
    block_b = min(block_b, B)
    if block_b < B and block_b % 8 != 0:
        block_b = min(B, max(8, (block_b // 8) * 8))   # keep mask/out blocks sublane-dense

    bb_chunk = _choose_sub_chunk(block_b, S, D)
    grid = (pl.cdiv(B, block_b),)          # ragged batch: partial last block,
                                           # no host-side padding of x.

    w_row = weight.reshape(1, D).astype(jnp.float32)   # lane-dense weight row
    kernel = functools.partial(_weighted_pool_kernel, bb_chunk=bb_chunk)

    return pl.pallas_call(
        kernel,
        out_shape=jax.ShapeDtypeStruct((B, D), x.dtype),
        grid_spec=pltpu.PrefetchScalarGridSpec(
            num_scalar_prefetch=0,
            grid=grid,
            in_specs=[
                pl.BlockSpec((block_b, S, D), lambda b: (b, 0, 0)),   # x
                pl.BlockSpec((block_b, S), lambda b: (b, 0)),         # mask
                pl.BlockSpec((1, D), lambda b: (0, 0)),               # weight row
            ],
            out_specs=pl.BlockSpec((block_b, D), lambda b: (b, 0)),
        ),
        compiler_params=pltpu.CompilerParams(
            dimension_semantics=("parallel",),
            vmem_limit_bytes=int(vmem_cap * 3 // 4),
        ),
    )(x, mask, w_row)


def reference_weighted_pool(x, mask, weight):
    # Pure-JAX reference mirroring the PyTorch forward.
    alpha = jnp.einsum("bsd,de->bse", x, weight)              # (B, S, 1)
    alpha = alpha + (1.0 - mask[:, :, None]) * (-1e30)
    alphas = jax.nn.softmax(alpha, axis=1)                    # (B, S, 1)
    pooled = jnp.einsum("bsd,bse->bde", x, alphas)[:, :, 0]   # (B, D)
    return pooled


if __name__ == "__main__":
    # Small but tiling-friendly shapes: D is one lane-width, S sits on the
    # lane axis of the (BB, S) slabs, batch splits into sublane-dense blocks.
    B, S, D = 16, 64, 128

    key = jax.random.PRNGKey(0)
    kx, km, kw = jax.random.split(key, 3)

    x = jax.random.normal(kx, (B, S, D), dtype=jnp.float32)

    # Binary mask (0/1) as float32; at least one valid position per row.
    mask = (jax.random.uniform(km, (B, S)) > 0.3).astype(jnp.float32)
    mask = mask.at[:, 0].set(1.0)

    # xavier_uniform for (dim, 1): bound = sqrt(6 / (dim + 1))
    bound = math.sqrt(6.0 / (D + 1))
    weight = jax.random.uniform(kw, (D, 1), dtype=jnp.float32,
                                minval=-bound, maxval=bound)

    ref = reference_weighted_pool(x, mask, weight)

    # 1) Explicit 2-step grid, divisible batch (block_b=8 -> grid=(2,)).
    out = jax.block_until_ready(weighted_pool(x, mask, weight, block_b=8))
    assert out.shape == (B, D)
    assert jnp.allclose(out, ref, atol=2e-4, rtol=2e-4), (
        f"max abs diff {jnp.max(jnp.abs(out - ref))}")

    # 2) Ragged batch: cdiv grid with a partial last block, no host-side pad.
    Br = 13
    out_r = jax.block_until_ready(
        weighted_pool(x[:Br], mask[:Br], weight, block_b=8))
    assert out_r.shape == (Br, D)
    assert jnp.allclose(out_r, ref[:Br], atol=2e-4, rtol=2e-4), (
        f"max abs diff {jnp.max(jnp.abs(out_r - ref[:Br]))}")

    # 3) Auto (generation-aware) tile-size path.
    out_a = jax.block_until_ready(weighted_pool(x, mask, weight))
    assert jnp.allclose(out_a, ref, atol=2e-4, rtol=2e-4)

    print("KERNEL_OK")
</pallas_src>

<mosaic_0001>
module attributes {stable_mosaic.version = 11 : i64} {
  func.func @_weighted_pool_kernel(%arg0: i32, %arg1: memref<8x64x128xf32, #tpu.memory_space<vmem>>, %arg2: memref<8x64xf32, #tpu.memory_space<vmem>>, %arg3: memref<1x128xf32, #tpu.memory_space<vmem>>, %arg4: memref<8x128xf32, #tpu.memory_space<vmem>>) attributes {dimension_semantics = [#tpu.dimension_semantics<parallel>], iteration_bounds = array<i64: 2>, scalar_prefetch = 0 : i64, scratch_operands = 0 : i64, tpu.core_type = #tpu.core_type<tc>, window_params = [{transform_indices = @transform_0, window_bounds = array<i64: 8, 64, 128>}, {transform_indices = @transform_1, window_bounds = array<i64: 8, 64>}, {pipeline_mode = #tpu.pipeline_mode<synchronous>, transform_indices = @transform_2, window_bounds = array<i64: 1, 128>}, {transform_indices = @transform_3, window_bounds = array<i64: 8, 128>}]} {
    %c0 = arith.constant 0 : index
    %c0_0 = arith.constant 0 : index
    %0 = vector.load %arg3[%c0, %c0_0] : memref<1x128xf32, #tpu.memory_space<vmem>>, vector<1x128xf32>
    %1 = vector.shape_cast %0 : vector<1x128xf32> to vector<1x1x128xf32>
    %c0_i32 = arith.constant 0 : i32
    %2 = tpu.assume_multiple %c0_i32, 8 : i32
    %3 = arith.index_cast %2 : i32 to index
    %c0_1 = arith.constant 0 : index
    %c0_2 = arith.constant 0 : index
    %4 = vector.load %arg1[%3, %c0_1, %c0_2] : memref<8x64x128xf32, #tpu.memory_space<vmem>>, vector<8x64x128xf32>
    %5 = arith.index_cast %2 : i32 to index
    %c0_3 = arith.constant 0 : index
    %6 = vector.load %arg2[%5, %c0_3] : memref<8x64xf32, #tpu.memory_space<vmem>>, vector<8x64xf32>
    %7 = vector.broadcast %1 : vector<1x1x128xf32> to vector<8x64x128xf32>
    %8 = arith.mulf %4, %7 : vector<8x64x128xf32>
    %cst = arith.constant dense<0.000000e+00> : vector<8x64xf32>
    %9 = vector.multi_reduction <add>, %8, %cst [2] : vector<8x64x128xf32> to vector<8x64xf32>
    %cst_4 = arith.constant 1.000000e+00 : f32
    %10 = vector.broadcast %cst_4 : f32 to vector<8x64xf32>
    %11 = arith.subf %10, %6 : vector<8x64xf32>
    %cst_5 = arith.constant -1.000000e+30 : f32
    %12 = vector.broadcast %cst_5 : f32 to vector<8x64xf32>
    %13 = arith.mulf %11, %12 : vector<8x64xf32>
    %14 = arith.addf %9, %13 : vector<8x64xf32>
    %cst_6 = arith.constant dense<0xFF800000> : vector<8xf32>
    %15 = vector.multi_reduction <maximumf>, %14, %cst_6 [1] : vector<8x64xf32> to vector<8xf32>
    %16 = vector.shape_cast %15 : vector<8xf32> to vector<8x1xf32>
    %17 = vector.broadcast %16 : vector<8x1xf32> to vector<8x64xf32>
    %18 = arith.subf %14, %17 : vector<8x64xf32>
    %19 = math.exp %18 : vector<8x64xf32>
    %cst_7 = arith.constant dense<0.000000e+00> : vector<8xf32>
    %20 = vector.multi_reduction <add>, %19, %cst_7 [1] : vector<8x64xf32> to vector<8xf32>
    %21 = vector.shape_cast %20 : vector<8xf32> to vector<8x1xf32>
    %22 = tpu.reciprocal %21 {approx = true} : vector<8x1xf32> -> vector<8x1xf32>
    %23 = arith.mulf %21, %22 : vector<8x1xf32>
    %cst_8 = arith.constant 2.000000e+00 : f32
    %24 = vector.broadcast %cst_8 : f32 to vector<8x1xf32>
    %25 = arith.subf %24, %23 : vector<8x1xf32>
    %26 = arith.mulf %22, %25 : vector<8x1xf32>
    %27 = vector.broadcast %26 : vector<8x1xf32> to vector<8x64xf32>
    %28 = arith.mulf %19, %27 : vector<8x64xf32>
    %29 = vector.shape_cast %28 : vector<8x64xf32> to vector<8x64x1xf32>
    %30 = vector.broadcast %29 : vector<8x64x1xf32> to vector<8x64x128xf32>
    %31 = arith.mulf %30, %4 : vector<8x64x128xf32>
    %cst_9 = arith.constant dense<0.000000e+00> : vector<8x128xf32>
    %32 = vector.multi_reduction <add>, %31, %cst_9 [1] : vector<8x64x128xf32> to vector<8x128xf32>
    %33 = arith.index_cast %2 : i32 to index
    %c0_10 = arith.constant 0 : index
    %34 = vector.load %arg4[%33, %c0_10] : memref<8x128xf32, #tpu.memory_space<vmem>>, vector<8x128xf32>
    tpu.vector_store %arg4[%33, %c0_10], %32 {strides = array<i32>} : memref<8x128xf32, #tpu.memory_space<vmem>>, vector<8x128xf32>,
    return
  }
  func.func @transform_0(%arg0: i32) -> (i32, i32, i32) {
    %c0_i32 = arith.constant 0 : i32
    %c0_i32_0 = arith.constant 0 : i32
    %c0_i32_1 = arith.constant 0 : i32
    return %arg0, %c0_i32, %c0_i32_0 : i32, i32, i32
  }
  func.func @transform_1(%arg0: i32) -> (i32, i32) {
    %c0_i32 = arith.constant 0 : i32
    %c0_i32_0 = arith.constant 0 : i32
    return %arg0, %c0_i32 : i32, i32
  }
  func.func @transform_2(%arg0: i32) -> (i32, i32) {
    %c0_i32 = arith.constant 0 : i32
    %c0_i32_0 = arith.constant 0 : i32
    %c0_i32_1 = arith.constant 0 : i32
    return %c0_i32, %c0_i32_0 : i32, i32
  }
  func.func @transform_3(%arg0: i32) -> (i32, i32) {
    %c0_i32 = arith.constant 0 : i32
    %c0_i32_0 = arith.constant 0 : i32
    return %arg0, %c0_i32 : i32, i32
  }
}

</mosaic_0001>

<bundles_post_ra>
// kernel: tpu_custom_call.1
= control target key start
LH: loop header
LB: loop body
LE: loop exit
PB: predicated region body
PF: predicated region fallthrough
CT: control target
= control target key end

     0   :  { %8 = vsyncpa [#allocation3], 0  ;;  %s5381_s0 = inlined_call_operand.hbm [shape: f32[16,64,128], index: 0, kind: input, shape index: {}]   ;;  %s5382_s1 = inlined_call_operand.hbm [shape: f32[16,64], index: 1, kind: input, shape index: {}]   ;;  %s5383_s2 = inlined_call_operand.vmem [shape: f32[1,128], index: 2, kind: input, shape index: {}]   ;;  %s5384_s3 = inlined_call_operand.hbm [shape: f32[16,128], index: 3, kind: output, shape index: {}]  }
   0x1   :  { %10 = vsyncpa [#allocation3 + $0x1], 0 }
   0x2   :  { %11 = vsyncpa [#allocation6], 0 }
   0x3   :  { %13 = vsyncpa [#allocation6 + $0x1], 0 }
   0x4   :  { %14 = vsyncpa [#allocation4], 0 }
   0x5   :  { %16 = vsyncpa [#allocation4 + $0x1], 0  ;;  %s3469_s12 = smov 0   ;;  %s3471_s13 = smov 0  }
   0x6   :  { %s3473_s14 = smov 0   ;;  %s3475_s15 = smov 0  }
   0x7 LB: > { %s3490_s16 = sadd.s32 4294967295, %s3441_s15   ;;  %s3041_s17 = sadd.s32 4294967294, %s3441_s15   ;;  %s3441_s15 = sphi %s3475_s15, %s5808_s15   ;;  %s3437_s14 = sphi %s3473_s14, %s5807_s14   ;;  %s3433_s13 = sphi %s3471_s13, %s5806_s13   ;;  %s3429_s12 = sphi %s3469_s12, %s5805_s12  }
   0x8   : > { %s3494_s18 = sadd.s32 1, %s3441_s15   ;;  %s29_s19 = sadd.s32 1, %s3437_s14 }
   0x9   : > { %s26_s20 = ssub.s32 %s3441_s15, %s3494_s18  ;;  %p36_p0 = scmp.ne.s32.totalorder %s3437_s14, %s3433_s13 }
   0xa   : > { %p27_p1 = scmp.eq.s32.totalorder %s26_s20, 0  ;;  %p37_p2 = scmp.eq.s32.totalorder %s3441_s15, 0 }
   0xb   : > { %p42_p3 = scmp.ne.s32.totalorder %s3433_s13, %s3429_s12  ;;  %p43_p4 = scmp.eq.s32.totalorder %s3490_s16, 0 }
   0xc   : > { %s3506_s21 = scalar_select %p27_p1, %s3437_s14, %s29_s19  }
   0xd   : > { %p3508_p5 = por %p37_p2, %p36_p0  ;;  %p3512_p6 = por %p43_p4, %p42_p3 }
   0xe   : > { %p113_p7 = scmp.eq.s32.totalorder %s3490_s16, 1  ;;  %p119_p8 = scmp.eq.s32.totalorder %s3041_s17, 1 }
   0xf   : > { %s5522_s23 = scalar_select %p3512_p6, 1, 0 }
  0x10   : > { %p3078_p10 = scmp.lt.s32.totalorder %s3441_s15, 2  ;;  %p3519_p11 = por %p113_p7, %p36_p0 }
  0x11   : > { %p3523_p12 = por %p119_p8, %p42_p3  ;;  %s3528_s26 = sand.u32 1, %s3437_s14  }
  0x12   : > { %s5523_s24 = scalar_select %p3519_p11, 1, 0 }
  0x13   : > { %s5524_s25 = scalar_select %p3523_p12, 1, 0 }
  0x14   : > { %s3060_s27 = sshll.u32 %s3441_s15, 13  ;;  %s3044_s28 = sshll.u32 %s3528_s26, 9 }
  0x15   : > { %s3535_s4 = scalar_lea.hbm %s5381_s0, %s3060_s27  ;;  %s146_s5 = scalar_lea.vmem [#allocation2], %s3044_s28 }
  0x16   : > { %s154_s6 = sshll.u32 %s146_s5, 4  ;;  %p3539_p13 = pnand %p3078_p10, %p3508_p5  ;;  %s3543_s6 = int_to_ptr.vmem [resolvable:$true] %s154_s6 }
  0x17   : > { %s143_s8 = scalar_lea.sflag [#allocation3], %s3528_s26  ;;  %s3311_s9 = scalar_lea.hbm %s3535_s4, 8192 }
  0x18   : > { %p3312_p0 = scmp.ne.s32.totalorder %s3535_s4, %s3311_s9  ;;  %p3313_p1 = pneg %p3539_p13 }
  0x19   : > { %s3316_s17 = scalar_lea.hbm %s5381_s0, 16384  ;;  %p3317_p4 = scmp.lt.u32.totalorder %s3535_s4, %s5381_s0 }
  0x1a   : > { %p3314_p2 = pnand %p3313_p1, %p3312_p0  ;;  %p3318_p5 = scmp.lt.u32.totalorder %s3316_s17, %s3311_s9 }
  0x1b   : > { %p3320_p8 = scmp.lt.u32.totalorder %s3311_s9, %s3535_s4 }
  0x1c   : > { %p3315_p3 = pneg %p3314_p2  ;;  %p3319_p7 = por %p3318_p5, %p3317_p4 }
  0x1e   : > { %p3321_p10 = por %p3320_p8, %p3319_p7 }
  0x20   : > { %p3322_p9 = pnand %p3321_p10, %p3315_p3 }
  0x22   : > { %3325 = shalt.err (!%p3322_p9)
}
  0x23   : > { %s3326_s22 = scalar_lea.vmem %s3543_s6, 8192  ;;  %s3443_s27 = smov [#allocation2]  }
  0x24   : > { %p3327_p0 = scmp.ne.s32.totalorder %s3543_s6, %s3326_s22  ;;  %s3331_s28 = sshll.u32 %s3443_s27, 4  ;;  %s3332_s28 = int_to_ptr.vmem [resolvable:$false] %s3331_s28 }
  0x25   : > { %s3333_s29 = scalar_lea.vmem %s3332_s28, 16384  ;;  %p3334_p11 = scmp.lt.s32.totalorder %s3543_s6, %s3332_s28 }
  0x26   : > { %p3329_p2 = pnand %p3327_p0, %p3313_p1  ;;  %p3335_p4 = scmp.lt.s32.totalorder %s3333_s29, %s3326_s22 }
  0x28   : > { %p3330_p12 = pneg %p3329_p2  ;;  %p3336_p5 = por %p3335_p4, %p3334_p11 }
  0x2a   : > { %p3337_p7 = pnand %p3336_p5, %p3330_p12 }
  0x2c   : > { %3340 = shalt.err (!%p3337_p7)
}
  0x2d   : > { %s3444_s30 = smov 128   ;;  %s3445_s5 = smov 8  }
  0x2e   : > { %3070 = dma.hbm_to_vmem [thread:$0]  (!%p3539_p13), %s3535_s4, 8192, %s3543_s6, %s143_s8, %s3444_s30, %s3444_s30, %s3445_s5  }
  0x2f   : > { %p3050_p9 = scmp.ge.s32.totalorder %s3441_s15, 1  ;;  %p180_p3 = scmp.lt.s32.totalorder %s3441_s15, 3 }
  0x30   : > { %s3048_s9 = sshll.u32 %s3528_s26, 3  ;;  %s3049_s11 = sshll.u32 %s3441_s15, 7 }
  0x31   : > { %p3576_p11 = pnand %p3050_p9, %p180_p3  ;;  %s168_s17 = scalar_lea.vmem [#allocation5], %s3048_s9 }
  0x32   : > { %s175_s19 = sshll.u32 %s168_s17, 4  ;;  %s3584_s27 = scalar_lea.hbm %s5382_s1, %s3049_s11  ;;  %s176_s19 = int_to_ptr.vmem [resolvable:$true] %s175_s19 }
  0x33   : > { %s5526_s10 = scalar_select %p3576_p11, 1, 0 }
  0x34   : > { %s165_s4 = scalar_lea.sflag [#allocation6], %s3528_s26  ;;  %s3341_s6 = scalar_lea.hbm %s3584_s27, 128 }
  0x35   : > { %p3342_p12 = scmp.ne.s32.totalorder %s3584_s27, %s3341_s6  ;;  %s3346_s29 = scalar_lea.hbm %s5382_s1, 256 }
  0x36   : > { %p3347_p0 = scmp.lt.u32.totalorder %s3584_s27, %s5382_s1  ;;  %p3348_p2 = scmp.lt.u32.totalorder %s3346_s29, %s3341_s6 }
  0x37   : > { %p3344_p8 = pnand %p3342_p12, %p3313_p1  ;;  %p3350_p5 = scmp.lt.u32.totalorder %s3341_s6, %s3584_s27 }
  0x38   : > { %p3349_p4 = por %p3348_p2, %p3347_p0 }
  0x39   : > { %p3345_p10 = pneg %p3344_p8 }
  0x3a   : > { %p3351_p7 = por %p3350_p5, %p3349_p4 }
  0x3c   : > { %p3352_p9 = pnand %p3351_p7, %p3345_p10 }
  0x3e   : > { %3355 = shalt.err (!%p3352_p9)
}
  0x3f   : > { %s3356_s26 = scalar_lea.vmem %s176_s19, 128  ;;  %s3446_s9 = smov [#allocation5]  }
  0x40   : > { %p3357_p3 = scmp.ne.s32.totalorder %s176_s19, %s3356_s26  ;;  %s3361_s11 = sshll.u32 %s3446_s9, 4  ;;  %s3362_s11 = int_to_ptr.vmem [resolvable:$false] %s3361_s11 }
  0x41   : > { %s3363_s17 = scalar_lea.vmem %s3362_s11, 256  ;;  %p3364_p6 = scmp.lt.s32.totalorder %s176_s19, %s3362_s11 }
  0x42   : > { %p3359_p12 = pnand %p3357_p3, %p3313_p1  ;;  %p3365_p11 = scmp.lt.s32.totalorder %s3363_s17, %s3356_s26 }
  0x44   : > { %p3360_p8 = pneg %p3359_p12  ;;  %p3366_p0 = por %p3365_p11, %p3364_p6 }
  0x46   : > { %p3367_p2 = pnand %p3366_p0, %p3360_p8 }
  0x48   : > { %3370 = shalt.err (!%p3367_p2)
}
  0x49   : > { %3073 = dma.hbm_to_vmem [thread:$0]  (!%p3539_p13), %s3584_s27, 128, %s176_s19, %s165_s4  }
  0x4a   : > { %p5527_p10 = scmp.ne.s32.totalorder %s5526_s10, 0 }
  0x4c   : > { %184 = sbr.rel (%p5527_p10) target bundleno = 1539 (0x603), region = 32 }
  0x53   : > { %s3609_s20 = sand.u32 1, %s3433_s13   ;;  %p5528_p6 = scmp.ne.s32.totalorder %s5522_s23, 0 }
  0x54   : > { %s3051_s22 = sshll.u32 %s3609_s20, 9  ;;  %s187_s6 = scalar_lea.sflag [#allocation3], %s3609_s20 }
  0x55   : > { %s3613_s8 = scalar_lea.vmem [#allocation2], %s3051_s22 }
  0x56   : > { %3416 = dma.done.wait (%p5528_p6), %s187_s6, 8192  }
  0x57   : > { %3418 = vsyncadd (%p5528_p6), %s187_s6, 4294959104  ;;  %s3052_s7 = sshll.u32 %s3609_s20, 3  ;;  %s196_s10 = scalar_lea.sflag [#allocation6], %s3609_s20 }
  0x58   : > { %s3623_s19 = scalar_lea.vmem [#allocation5], %s3052_s7 }
  0x59   : > { %3420 = dma.done.wait (%p5528_p6), %s196_s10, 128  }
  0x5a   : > { %3422 = vsyncadd (%p5528_p6), %s196_s10, 4294967168  ;;  %v3632_v0 = vld [vmem:[%s5383_s2] ss:$0 sm:$0xff]  ;;  %v233_v1 = vld [vmem:[%s3613_s8 + $0x10] sm:$0xff]  ;;  %vm1172_vm0 = vcmask 130112   ;;  %vm1179_vm1 = vcmask 195712  }
  0x5b   : > { %v231_v2 = vld [vmem:[%s3613_s8] sm:$0xff]  ;;  %v304_v3 = vmul.f32 %v3632_v0, %v233_v1  ;;  %v234_v5 = vld [vmem:[%s3613_s8 + $0x18] sm:$0xff]  ;;  %v232_v6 = vld [vmem:[%s3613_s8 + $0x8] sm:$0xff]  ;;  %vm1186_vm2 = vcmask 261312   ;;  %vm1193_vm3 = vcmask 326912   ;;  %vm1200_vm4 = vcmask 392512  }
  0x5c   : > { %v302_v4 = vmul.f32 %v3632_v0, %v231_v2  ;;  %v305_v7 = vmul.f32 %v3632_v0, %v234_v5  ;;  %v303_v8 = vmul.f32 %v3632_v0, %v232_v6  ;;  %v236_v9 = vld [vmem:[%s3613_s8 + $0x28] sm:$0xff]  ;;  %v235_v10 = vld [vmem:[%s3613_s8 + $0x20] sm:$0xff]  ;;  %v238_v13 = vld [vmem:[%s3613_s8 + $0x38] sm:$0xff]  ;;  %vm1207_vm5 = vcmask 458112   ;;  %s3056_s23 = sshll.u32 %s3490_s16, 7  ;;  %s226_s28 = scalar_lea.vmem [#allocation7], %s3052_s7 }
  0x5d   : > { %370 = vadd.xlane.f32.xlu1 %v304_v3  ;;  %v307_v11 = vmul.f32 %v3632_v0, %v236_v9  ;;  %v306_v12 = vmul.f32 %v3632_v0, %v235_v10  ;;  %v237_v14 = vld [vmem:[%s3613_s8 + $0x30] sm:$0xff]  ;;  %v309_v15 = vmul.f32 %v3632_v0, %v238_v13  ;;  %v240_v17 = vld [vmem:[%s3613_s8 + $0x48] sm:$0xff]  ;;  %v239_v18 = vld [vmem:[%s3613_s8 + $0x40] sm:$0xff]  ;;  %vm1214_vm6 = vcmask 523712   ;;  %s2948_s29 = sshll.u32 %s226_s28, 4  ;;  %s5336_s26 = scalar_lea.hbm %s5384_s3, %s3056_s23  ;;  %s5338_s29 = int_to_ptr.vmem [resolvable:$true] %s2948_s29 }
  0x5e   : > { %366 = vadd.xlane.f32.xlu0 %v302_v4  ;;  %v308_v16 = vmul.f32 %v3632_v0, %v237_v14  ;;  %v311_v19 = vmul.f32 %v3632_v0, %v240_v17  ;;  %v310_v20 = vmul.f32 %v3632_v0, %v239_v18  ;;  %v242_v21 = vld [vmem:[%s3613_s8 + $0x58] sm:$0xff]  ;;  %v241_v22 = vld [vmem:[%s3613_s8 + $0x50] sm:$0xff]  ;;  %v244_v25 = vld [vmem:[%s3613_s8 + $0x68] sm:$0xff]  ;;  %vm1489_vm7 = vcmask 1041409   ;;  %s2935_s16 = scalar_lea.sflag [#allocation4], %s3609_s20  ;;  %s3371_s9 = scalar_lea.vmem %s5338_s29, 128 }
  0x5f   : > { %v313_v23 = vmul.f32 %v3632_v0, %v242_v21  ;;  %v312_v24 = vmul.f32 %v3632_v0, %v241_v22  ;;  %v243_v26 = vld [vmem:[%s3613_s8 + $0x60] sm:$0xff]  ;;  %v315_v27 = vmul.f32 %v3632_v0, %v244_v25  ;;  %v246_v29 = vld [vmem:[%s3613_s8 + $0x78] sm:$0xff]  ;;  %v245_v30 = vld [vmem:[%s3613_s8 + $0x70] sm:$0xff]  ;;  %vm1491_vm8 = vcmask 1042434   ;;  %p3372_p13 = scmp.ne.s32.totalorder %s5338_s29, %s3371_s9  ;;  %p5802_p1 = scmp.ne.s32.totalorder %s5523_s24, 0 }
  0x60   : > { %v314_v28 = vmul.f32 %v3632_v0, %v243_v26  ;;  %v317_v31 = vmul.f32 %v3632_v0, %v246_v29  ;;  %v316_v32 = vmul.f32 %v3632_v0, %v245_v30  ;;  %v248_v33 = vld [vmem:[%s3613_s8 + $0x88] sm:$0xff]  ;;  %v247_v34 = vld [vmem:[%s3613_s8 + $0x80] sm:$0xff]  ;;  %v250_v37 = vld [vmem:[%s3613_s8 + $0x98] sm:$0xff]  ;;  %vm1493_vm9 = vcmask 1043459   ;;  %s3448_s11 = smov [#allocation7]  }
  0x61   : > { %372 = vadd.xlane.f32.xlu1 %v305_v7  ;;  %v319_v35 = vmul.f32 %v3632_v0, %v248_v33  ;;  %v318_v36 = vmul.f32 %v3632_v0, %v247_v34  ;;  %v249_v38 = vld [vmem:[%s3613_s8 + $0x90] sm:$0xff]  ;;  %v321_v39 = vmul.f32 %v3632_v0, %v250_v37  ;;  %v252_v41 = vld [vmem:[%s3613_s8 + $0xa8] sm:$0xff]  ;;  %v251_v42 = vld [vmem:[%s3613_s8 + $0xa0] sm:$0xff]  ;;  %vm1495_vm10 = vcmask 1044484   ;;  %p3373_p11 = pnand %p3372_p13, %p5802_p1  ;;  %s3375_s17 = sshll.u32 %s3448_s11, 4  ;;  %s3376_s17 = int_to_ptr.vmem [resolvable:$false] %s3375_s17 }
  0x62   : > { %368 = vadd.xlane.f32.xlu0 %v303_v8  ;;  %v320_v40 = vmul.f32 %v3632_v0, %v249_v38  ;;  %v323_v43 = vmul.f32 %v3632_v0, %v252_v41  ;;  %v322_v44 = vmul.f32 %v3632_v0, %v251_v42  ;;  %v254_v45 = vld [vmem:[%s3613_s8 + $0xb8] sm:$0xff]  ;;  %v253_v46 = vld [vmem:[%s3613_s8 + $0xb0] sm:$0xff]  ;;  %v256_v49 = vld [vmem:[%s3613_s8 + $0xc8] sm:$0xff]  ;;  %vm1497_vm11 = vcmask 1045509   ;;  %s3377_s22 = scalar_lea.vmem %s3376_s17, 256  ;;  %p3378_p5 = scmp.lt.s32.totalorder %s5338_s29, %s3376_s17 }
  0x63   : > { %v325_v47 = vmul.f32 %v3632_v0, %v254_v45  ;;  %v324_v48 = vmul.f32 %v3632_v0, %v253_v46  ;;  %v255_v50 = vld [vmem:[%s3613_s8 + $0xc0] sm:$0xff]  ;;  %v327_v51 = vmul.f32 %v3632_v0, %v256_v49  ;;  %v258_v53 = vld [vmem:[%s3613_s8 + $0xd8] sm:$0xff]  ;;  %v257_v54 = vld [vmem:[%s3613_s8 + $0xd0] sm:$0xff]  ;;  %vm1499_vm12 = vcmask 1046534   ;;  %p3374_p4 = pneg %p3373_p11  ;;  %p3379_p7 = scmp.lt.s32.totalorder %s3377_s22, %s3371_s9 }
  0x64   : > { %v326_v52 = vmul.f32 %v3632_v0, %v255_v50  ;;  %v329_v55 = vmul.f32 %v3632_v0, %v258_v53  ;;  %v328_v56 = vmul.f32 %v3632_v0, %v257_v54  ;;  %v260_v57 = vld [vmem:[%s3613_s8 + $0xe8] sm:$0xff]  ;;  %v259_v58 = vld [vmem:[%s3613_s8 + $0xe0] sm:$0xff]  ;;  %v262_v61 = vld [vmem:[%s3613_s8 + $0xf8] sm:$0xff]  ;;  %vm1501_vm13 = vcmask 1047559  }
  0x65   : > { %376 = vadd.xlane.f32.xlu1 %v307_v11  ;;  %v331_v59 = vmul.f32 %v3632_v0, %v260_v57  ;;  %v330_v60 = vmul.f32 %v3632_v0, %v259_v58  ;;  %v261_v62 = vld [vmem:[%s3613_s8 + $0xf0] sm:$0xff]  ;;  %v333_v63 = vmul.f32 %v3632_v0, %v262_v61  ;;  %v264_v2 = vld [vmem:[%s3613_s8 + $0x108] sm:$0xff]  ;;  %v263_v3 = vld [vmem:[%s3613_s8 + $0x100] sm:$0xff]  ;;  %vm1504_vm14 = vcmask 523264   ;;  %p3380_p9 = por %p3379_p7, %p3378_p5 }
  0x66   : > { %374 = vadd.xlane.f32.xlu0 %v306_v12  ;;  %v332_v1 = vmul.f32 %v3632_v0, %v261_v62  ;;  %v335_v4 = vmul.f32 %v3632_v0, %v264_v2  ;;  %v334_v5 = vmul.f32 %v3632_v0, %v263_v3  ;;  %v266_v6 = vld [vmem:[%s3613_s8 + $0x118] sm:$0xff]  ;;  %v265_v7 = vld [vmem:[%s3613_s8 + $0x110] sm:$0xff]  ;;  %v268_v10 = vld [vmem:[%s3613_s8 + $0x128] sm:$0xff]  ;;  %v5387_v3 = vlaneseq }
  0x67   : > { %v337_v8 = vmul.f32 %v3632_v0, %v266_v6  ;;  %v336_v9 = vmul.f32 %v3632_v0, %v265_v7  ;;  %v267_v11 = vld [vmem:[%s3613_s8 + $0x120] sm:$0xff]  ;;  %v339_v12 = vmul.f32 %v3632_v0, %v268_v10  ;;  %v270_v14 = vld [vmem:[%s3613_s8 + $0x138] sm:$0xff]  ;;  %v272_v18 = vld [vmem:[%s3613_s8 + $0x148] sm:$0xff]  ;;  %p3381_p3 = pnand %p3380_p9, %p3374_p4 }
  0x68   : > { %v338_v13 = vmul.f32 %v3632_v0, %v267_v11  ;;  %v274_v22 = vld [vmem:[%s3613_s8 + $0x158] sm:$0xff]  ;;  %v276_v26 = vld [vmem:[%s3613_s8 + $0x168] sm:$0xff]  ;;  %v3764_v6 = vshrl.u32 %v5387_v3, 7  ;;  %v3447_v11 = vmov 0  }
  0x69   : > { %380 = vadd.xlane.f32.xlu1 %v309_v15  ;;  %v269_v15 = vld [vmem:[%s3613_s8 + $0x130] sm:$0xff]  ;;  %v278_v30 = vld [vmem:[%s3613_s8 + $0x178] sm:$0xff]  ;;  %v280_v34 = vld [vmem:[%s3613_s8 + $0x188] sm:$0xff]  ;;  %3115 = vset.pattern.permute.xlu0 %v3447_v11 }
  0x6a   : > { %378 = vadd.xlane.f32.xlu0 %v308_v16  ;;  %v341_v16 = vmul.f32 %v3632_v0, %v270_v14  ;;  %v340_v17 = vmul.f32 %v3632_v0, %v269_v15  ;;  %v282_v38 = vld [vmem:[%s3613_s8 + $0x198] sm:$0xff]  ;;  %v284_v42 = vld [vmem:[%s3613_s8 + $0x1a8] sm:$0xff]  ;;  %5529 = vst [vmem:[#allocation11_spill] sm:$0xff] %v3764_v6  ;;  %3116 = vset.pattern.permute.xlu1 %v3447_v11 }
  0x6b   : > { %v286_v46 = vld [vmem:[%s3613_s8 + $0x1b8] sm:$0xff]  ;;  %v288_v50 = vld [vmem:[%s3613_s8 + $0x1c8] sm:$0xff] }
  0x6c   : > { %v290_v54 = vld [vmem:[%s3613_s8 + $0x1d8] sm:$0xff]  ;;  %v292_v58 = vld [vmem:[%s3613_s8 + $0x1e8] sm:$0xff] }
  0x6d   : > { %384 = vadd.xlane.f32.xlu1 %v311_v19  ;;  %v271_v19 = vld [vmem:[%s3613_s8 + $0x140] sm:$0xff]  ;;  %v294_v62 = vld [vmem:[%s3613_s8 + $0x1f8] sm:$0xff] }
  0x6e   : > { %382 = vadd.xlane.f32.xlu0 %v310_v20  ;;  %v343_v20 = vmul.f32 %v3632_v0, %v272_v18  ;;  %v342_v21 = vmul.f32 %v3632_v0, %v271_v19 }
  0x71   : > { %388 = vadd.xlane.f32.xlu1 %v313_v23  ;;  %v273_v23 = vld [vmem:[%s3613_s8 + $0x150] sm:$0xff] }
  0x72   : > { %386 = vadd.xlane.f32.xlu0 %v312_v24  ;;  %v345_v24 = vmul.f32 %v3632_v0, %v274_v22  ;;  %v344_v25 = vmul.f32 %v3632_v0, %v273_v23 }
  0x75   : > { %392 = vadd.xlane.f32.xlu1 %v315_v27  ;;  %v275_v27 = vld [vmem:[%s3613_s8 + $0x160] sm:$0xff] }
  0x76   : > { %390 = vadd.xlane.f32.xlu0 %v314_v28  ;;  %v347_v28 = vmul.f32 %v3632_v0, %v276_v26  ;;  %v346_v29 = vmul.f32 %v3632_v0, %v275_v27  ;;  %v3807_v26 = vsub.s32 2, %v3764_v6 }
  0x78   : > { %5532 = vst [vmem:[#allocation14_spill] sm:$0xff] %v3807_v26 }
  0x79   : > { %396 = vadd.xlane.f32.xlu1 %v317_v31  ;;  %v277_v31 = vld [vmem:[%s3613_s8 + $0x170] sm:$0xff] }
  0x7a   : > { %394 = vadd.xlane.f32.xlu0 %v316_v32  ;;  %v349_v32 = vmul.f32 %v3632_v0, %v278_v30  ;;  %v348_v33 = vmul.f32 %v3632_v0, %v277_v31 }
  0x7d   : > { %400 = vadd.xlane.f32.xlu1 %v319_v35  ;;  %v279_v35 = vld [vmem:[%s3613_s8 + $0x180] sm:$0xff] }
  0x7e   : > { %398 = vadd.xlane.f32.xlu0 %v318_v36  ;;  %v351_v36 = vmul.f32 %v3632_v0, %v280_v34  ;;  %v350_v37 = vmul.f32 %v3632_v0, %v279_v35 }
  0x81   : > { %404 = vadd.xlane.f32.xlu1 %v321_v39  ;;  %v281_v39 = vld [vmem:[%s3613_s8 + $0x190] sm:$0xff] }
  0x82   : > { %402 = vadd.xlane.f32.xlu0 %v320_v40  ;;  %v353_v40 = vmul.f32 %v3632_v0, %v282_v38  ;;  %v352_v41 = vmul.f32 %v3632_v0, %v281_v39 }
  0x85   : > { %408 = vadd.xlane.f32.xlu1 %v323_v43  ;;  %v283_v43 = vld [vmem:[%s3613_s8 + $0x1a0] sm:$0xff] }
  0x86   : > { %406 = vadd.xlane.f32.xlu0 %v322_v44  ;;  %v355_v44 = vmul.f32 %v3632_v0, %v284_v42  ;;  %v354_v45 = vmul.f32 %v3632_v0, %v283_v43 }
  0x89   : > { %412 = vadd.xlane.f32.xlu1 %v325_v47  ;;  %v285_v47 = vld [vmem:[%s3613_s8 + $0x1b0] sm:$0xff] }
  0x8a   : > { %410 = vadd.xlane.f32.xlu0 %v324_v48  ;;  %v357_v48 = vmul.f32 %v3632_v0, %v286_v46  ;;  %v356_v49 = vmul.f32 %v3632_v0, %v285_v47  ;;  %v3849_v46 = vsub.s32 4, %v3764_v6 }
  0x8c   : > { %5534 = vst [vmem:[#allocation16_spill] sm:$0xff] %v3849_v46 }
  0x8d   : > { %416 = vadd.xlane.f32.xlu1 %v327_v51  ;;  %v287_v51 = vld [vmem:[%s3613_s8 + $0x1c0] sm:$0xff] }
  0x8e   : > { %414 = vadd.xlane.f32.xlu0 %v326_v52  ;;  %v359_v52 = vmul.f32 %v3632_v0, %v288_v50  ;;  %v358_v53 = vmul.f32 %v3632_v0, %v287_v51 }
  0x91   : > { %420 = vadd.xlane.f32.xlu1 %v329_v55  ;;  %v289_v55 = vld [vmem:[%s3613_s8 + $0x1d0] sm:$0xff] }
  0x92   : > { %418 = vadd.xlane.f32.xlu0 %v328_v56  ;;  %v361_v56 = vmul.f32 %v3632_v0, %v290_v54  ;;  %v360_v57 = vmul.f32 %v3632_v0, %v289_v55 }
  0x95   : > { %424 = vadd.xlane.f32.xlu1 %v331_v59  ;;  %v291_v59 = vld [vmem:[%s3613_s8 + $0x1e0] sm:$0xff] }
  0x96   : > { %422 = vadd.xlane.f32.xlu0 %v330_v60  ;;  %v363_v60 = vmul.f32 %v3632_v0, %v292_v58  ;;  %v362_v61 = vmul.f32 %v3632_v0, %v291_v59 }
  0x99   : > { %428 = vadd.xlane.f32.xlu1 %v333_v63  ;;  %v293_v63 = vld [vmem:[%s3613_s8 + $0x1f0] sm:$0xff] }
  0x9a   : > { %426 = vadd.xlane.f32.xlu0 %v332_v1  ;;  %v365_v1 = vmul.f32 %v3632_v0, %v294_v62  ;;  %v364_v2 = vmul.f32 %v3632_v0, %v293_v63 }
  0x9d   : > { %432 = vadd.xlane.f32.xlu1 %v335_v4  ;;  %v295_v4 = vld [vmem:[%s3623_s19] sm:$0xff] }
  0x9e   : > { %430 = vadd.xlane.f32.xlu0 %v334_v5  ;;  %v494_v5 = vsub.f32 1.0, %v295_v4  ;;  %v3891_v4 = vsub.s32 6, %v3764_v6 }
  0xa0   : > { %v3766_v7 = vmul.f32 -1e+30, %v494_v5  ;;  %5536 = vst [vmem:[#allocation18_spill] sm:$0xff] %v3891_v4 }
  0xa1   : > { %436 = vadd.xlane.f32.xlu1 %v337_v8  ;;  %v3769_v8 = vsub.s32 0, %v3764_v6 }
  0xa2   : > { %434 = vadd.xlane.f32.xlu0 %v336_v9  ;;  %v710_v11 = vrot.slane %v3766_v7, %v3891_v4  ;;  %v3912_v4 = vsub.s32 7, %v3764_v6 }
  0xa3   : > { %5530 = vst [vmem:[#allocation12_spill] sm:$0xff] %v3769_v8  ;;  %v500_v9 = vrot.slane %v3766_v7, %v3769_v8 }
  0xa4   : > { %5537 = vst [vmem:[#allocation19_spill] sm:$0xff] %v3912_v4 }
  0xa5   : > { %440 = vadd.xlane.f32.xlu1 %v339_v12 }
  0xa6   : > { %438 = vadd.xlane.f32.xlu0 %v338_v13 }
  0xa9   : > { %444 = vadd.xlane.f32.xlu1 %v341_v16  ;;  %v3786_v16 = vsub.s32 1, %v3764_v6 }
  0xaa   : > { %442 = vadd.xlane.f32.xlu0 %v340_v17 }
  0xab   : > { %5531 = vst [vmem:[#allocation13_spill] sm:$0xff] %v3786_v16  ;;  %v535_v19 = vrot.slane %v3766_v7, %v3786_v16 }
  0xad   : > { %448 = vadd.xlane.f32.xlu1 %v343_v20 }
  0xae   : > { %446 = vadd.xlane.f32.xlu0 %v342_v21 }
  0xb1   : > { %452 = vadd.xlane.f32.xlu1 %v345_v24 }
  0xb2   : > { %450 = vadd.xlane.f32.xlu0 %v344_v25 }
  0xb5   : > { %456 = vadd.xlane.f32.xlu1 %v347_v28 }
  0xb6   : > { %454 = vadd.xlane.f32.xlu0 %v346_v29  ;;  %v570_v29 = vrot.slane %v3766_v7, %v3807_v26 }
  0xb9   : > { %460 = vadd.xlane.f32.xlu1 %v349_v32 }
  0xba   : > { %458 = vadd.xlane.f32.xlu0 %v348_v33 }
  0xbd   : > { %464 = vadd.xlane.f32.xlu1 %v351_v36  ;;  %v3828_v36 = vsub.s32 3, %v3764_v6 }
  0xbe   : > { %462 = vadd.xlane.f32.xlu0 %v350_v37 }
  0xbf   : > { %5533 = vst [vmem:[#allocation15_spill] sm:$0xff] %v3828_v36  ;;  %v605_v39 = vrot.slane %v3766_v7, %v3828_v36  ;;  %v745_v36 = vrot.slane %v3766_v7, %v3912_v4 }
  0xc1   : > { %468 = vadd.xlane.f32.xlu1 %v353_v40 }
  0xc2   : > { %466 = vadd.xlane.f32.xlu0 %v352_v41 }
  0xc5   : > { %472 = vadd.xlane.f32.xlu1 %v355_v44 }
  0xc6   : > { %470 = vadd.xlane.f32.xlu0 %v354_v45 }
  0xc9   : > { %476 = vadd.xlane.f32.xlu1 %v357_v48 }
  0xca   : > { %474 = vadd.xlane.f32.xlu0 %v356_v49  ;;  %v640_v49 = vrot.slane %v3766_v7, %v3849_v46 }
  0xcd   : > { %480 = vadd.xlane.f32.xlu1 %v359_v52 }
  0xce   : > { %478 = vadd.xlane.f32.xlu0 %v358_v53 }
  0xd1   : > { %484 = vadd.xlane.f32.xlu1 %v361_v56  ;;  %v3870_v56 = vsub.s32 5, %v3764_v6 }
  0xd2   : > { %482 = vadd.xlane.f32.xlu0 %v360_v57 }
  0xd3   : > { %5535 = vst [vmem:[#allocation17_spill] sm:$0xff] %v3870_v56  ;;  %v675_v59 = vrot.slane %v3766_v7, %v3870_v56 }
  0xd5   : > { %488 = vadd.xlane.f32.xlu1 %v363_v60 }
  0xd6   : > { %486 = vadd.xlane.f32.xlu0 %v362_v61 }
  0xd9   : > { %492 = vadd.xlane.f32.xlu1 %v365_v1 }
  0xda   : > { %490 = vadd.xlane.f32.xlu0 %v364_v2 }
  0xea   : > { %506 = vbcast.lane.b32.xlu1 %v500_v9, 264  ;;  %v3773_v10 = vpop.xlane.xlu1 %370 }
  0xeb   : > { %v3775_v0 = vpop.xlane.xlu0 %366 }
  0xee   : > { %510 = vbcast.lane.b32.xlu1 %v500_v9, 272  ;;  %v3777_v12 = vpop.xlane.xlu1 %372 }
  0xef   : > { %v3779_v13 = vpop.xlane.xlu0 %368 }
  0xf0   : > { %502 = vbcast.lane.b32.xlu0 %v500_v9, 256 }
  0xf2   : > { %514 = vbcast.lane.b32.xlu1 %v500_v9, 280  ;;  %v3781_v14 = vpop.xlane.xlu1 %376 }
  0xf3   : > { %v3783_v15 = vpop.xlane.xlu0 %374 }
  0xf4   : > { %518 = vbcast.lane.b32.xlu0 %v500_v9, 288 }
  0xf6   : > { %522 = vbcast.lane.b32.xlu1 %v500_v9, 296  ;;  %v3788_v17 = vpop.xlane.xlu1 %380 }
  0xf7   : > { %v3790_v18 = vpop.xlane.xlu0 %378 }
  0xf8   : > { %526 = vbcast.lane.b32.xlu0 %v500_v9, 304 }
  0xfa   : > { %530 = vbcast.lane.b32.xlu1 %v500_v9, 312  ;;  %v3794_v20 = vpop.xlane.xlu1 %384 }
  0xfb   : > { %v3796_v21 = vpop.xlane.xlu0 %382 }
  0xfc   : > { %537 = vbcast.lane.b32.xlu0 %v535_v19, 256 }
  0xfe   : > { %541 = vbcast.lane.b32.xlu1 %v535_v19, 264  ;;  %v3798_v22 = vpop.xlane.xlu1 %388 }
  0xff   : > { %v3800_v23 = vpop.xlane.xlu0 %386 }
 0x100   : > { %545 = vbcast.lane.b32.xlu0 %v535_v19, 272 }
 0x102   : > { %549 = vbcast.lane.b32.xlu1 %v535_v19, 280  ;;  %v3802_v24 = vpop.xlane.xlu1 %392 }
 0x103   : > { %v3804_v25 = vpop.xlane.xlu0 %390 }
 0x104   : > { %553 = vbcast.lane.b32.xlu0 %v535_v19, 288 }
 0x106   : > { %557 = vbcast.lane.b32.xlu1 %v535_v19, 296  ;;  %v3809_v27 = vpop.xlane.xlu1 %396 }
 0x107   : > { %v3811_v28 = vpop.xlane.xlu0 %394 }
 0x108   : > { %561 = vbcast.lane.b32.xlu0 %v535_v19, 304 }
 0x10a   : > { %565 = vbcast.lane.b32.xlu1 %v535_v19, 312  ;;  %v3815_v30 = vpop.xlane.xlu1 %400 }
 0x10b   : > { %v3817_v31 = vpop.xlane.xlu0 %398 }
 0x10c   : > { %572 = vbcast.lane.b32.xlu0 %v570_v29, 256 }
 0x10e   : > { %576 = vbcast.lane.b32.xlu1 %v570_v29, 264  ;;  %v3819_v32 = vpop.xlane.xlu1 %404 }
 0x10f   : > { %v3821_v33 = vpop.xlane.xlu0 %402 }
 0x110   : > { %580 = vbcast.lane.b32.xlu0 %v570_v29, 272 }
 0x112   : > { %584 = vbcast.lane.b32.xlu1 %v570_v29, 280  ;;  %v3823_v34 = vpop.xlane.xlu1 %408 }
 0x113   : > { %v3825_v35 = vpop.xlane.xlu0 %406 }
 0x114   : > { %588 = vbcast.lane.b32.xlu0 %v570_v29, 288 }
 0x116   : > { %592 = vbcast.lane.b32.xlu1 %v570_v29, 296  ;;  %v3830_v37 = vpop.xlane.xlu1 %412 }
 0x117   : > { %v3832_v38 = vpop.xlane.xlu0 %410 }
 0x118   : > { %596 = vbcast.lane.b32.xlu0 %v570_v29, 304 }
 0x11a   : > { %600 = vbcast.lane.b32.xlu1 %v570_v29, 312  ;;  %v3836_v40 = vpop.xlane.xlu1 %416 }
 0x11b   : > { %v3838_v41 = vpop.xlane.xlu0 %414 }
 0x11c   : > { %607 = vbcast.lane.b32.xlu0 %v605_v39, 256 }
 0x11e   : > { %611 = vbcast.lane.b32.xlu1 %v605_v39, 264  ;;  %v3840_v42 = vpop.xlane.xlu1 %420 }
 0x11f   : > { %v3842_v43 = vpop.xlane.xlu0 %418 }
 0x120   : > { %615 = vbcast.lane.b32.xlu0 %v605_v39, 272 }
 0x122   : > { %619 = vbcast.lane.b32.xlu1 %v605_v39, 280  ;;  %v3844_v44 = vpop.xlane.xlu1 %424 }
 0x123   : > { %v3846_v45 = vpop.xlane.xlu0 %422 }
 0x124   : > { %623 = vbcast.lane.b32.xlu0 %v605_v39, 288 }
 0x126   : > { %627 = vbcast.lane.b32.xlu1 %v605_v39, 296  ;;  %v3851_v47 = vpop.xlane.xlu1 %428 }
 0x127   : > { %v3853_v48 = vpop.xlane.xlu0 %426 }
 0x128   : > { %631 = vbcast.lane.b32.xlu0 %v605_v39, 304 }
 0x12a   : > { %635 = vbcast.lane.b32.xlu1 %v605_v39, 312  ;;  %v3857_v50 = vpop.xlane.xlu1 %432 }
 0x12b   : > { %v3859_v51 = vpop.xlane.xlu0 %430 }
 0x12c   : > { %642 = vbcast.lane.b32.xlu0 %v640_v49, 256 }
 0x12e   : > { %646 = vbcast.lane.b32.xlu1 %v640_v49, 264  ;;  %v3861_v52 = vpop.xlane.xlu1 %436 }
 0x12f   : > { %v3863_v53 = vpop.xlane.xlu0 %434 }
 0x130   : > { %650 = vbcast.lane.b32.xlu0 %v640_v49, 272 }
 0x132   : > { %654 = vbcast.lane.b32.xlu1 %v640_v49, 280  ;;  %v3865_v54 = vpop.xlane.xlu1 %440 }
 0x133   : > { %v3867_v55 = vpop.xlane.xlu0 %438 }
 0x134   : > { %658 = vbcast.lane.b32.xlu0 %v640_v49, 288 }
 0x136   : > { %662 = vbcast.lane.b32.xlu1 %v640_v49, 296  ;;  %v3872_v57 = vpop.xlane.xlu1 %444 }
 0x137   : > { %v3874_v58 = vpop.xlane.xlu0 %442 }
 0x138   : > { %666 = vbcast.lane.b32.xlu0 %v640_v49, 304 }
 0x13a   : > { %670 = vbcast.lane.b32.xlu1 %v640_v49, 312  ;;  %v3878_v60 = vpop.xlane.xlu1 %448 }
 0x13b   : > { %v3880_v61 = vpop.xlane.xlu0 %446 }
 0x13c   : > { %677 = vbcast.lane.b32.xlu0 %v675_v59, 256 }
 0x13e   : > { %681 = vbcast.lane.b32.xlu1 %v675_v59, 264  ;;  %v3882_v62 = vpop.xlane.xlu1 %452 }
 0x13f   : > { %v3884_v63 = vpop.xlane.xlu0 %450 }
 0x140   : > { %685 = vbcast.lane.b32.xlu0 %v675_v59, 272 }
 0x142   : > { %689 = vbcast.lane.b32.xlu1 %v675_v59, 280  ;;  %v3886_v1 = vpop.xlane.xlu1 %456 }
 0x143   : > { %v3888_v2 = vpop.xlane.xlu0 %454 }
 0x144   : > { %693 = vbcast.lane.b32.xlu0 %v675_v59, 288 }
 0x146   : > { %697 = vbcast.lane.b32.xlu1 %v675_v59, 296  ;;  %v3893_v5 = vpop.xlane.xlu1 %460 }
 0x147   : > { %v3895_v9 = vpop.xlane.xlu0 %458 }
 0x148   : > { %701 = vbcast.lane.b32.xlu0 %v675_v59, 304 }
 0x14a   : > { %705 = vbcast.lane.b32.xlu1 %v675_v59, 312  ;;  %v3899_v19 = vpop.xlane.xlu1 %464 }
 0x14b   : > { %v3901_v29 = vpop.xlane.xlu0 %462 }
 0x14c   : > { %712 = vbcast.lane.b32.xlu0 %v710_v11, 256 }
 0x14e   : > { %716 = vbcast.lane.b32.xlu1 %v710_v11, 264  ;;  %v3903_v39 = vpop.xlane.xlu1 %468 }
 0x14f   : > { %v3905_v49 = vpop.xlane.xlu0 %466 }
 0x150   : > { %720 = vbcast.lane.b32.xlu0 %v710_v11, 272 }
 0x152   : > { %724 = vbcast.lane.b32.xlu1 %v710_v11, 280  ;;  %v3907_v3 = vpop.xlane.xlu1 %472 }
 0x153   : > { %v3909_v56 = vpop.xlane.xlu0 %470 }
 0x154   : > { %728 = vbcast.lane.b32.xlu0 %v710_v11, 288 }
 0x156   : > { %732 = vbcast.lane.b32.xlu1 %v710_v11, 296  ;;  %v3914_v59 = vpop.xlane.xlu1 %476 }
 0x157   : > { %5538 = vst [vmem:[#allocation20_spill] sm:$0xff] %v3914_v59  ;;  %v3916_v46 = vpop.xlane.xlu0 %474 }
 0x158   : > { %5539 = vst [vmem:[#allocation21_spill] sm:$0xff] %v3916_v46  ;;  %736 = vbcast.lane.b32.xlu0 %v710_v11, 304 }
 0x15a   : > { %740 = vbcast.lane.b32.xlu1 %v710_v11, 312  ;;  %v3920_v26 = vpop.xlane.xlu1 %480 }
 0x15b   : > { %5540 = vst [vmem:[#allocation22_spill] sm:$0xff] %v3920_v26  ;;  %v3922_v16 = vpop.xlane.xlu0 %478 }
 0x15c   : > { %5541 = vst [vmem:[#allocation23_spill] sm:$0xff] %v3922_v16  ;;  %747 = vbcast.lane.b32.xlu0 %v745_v36, 256 }
 0x15e   : > { %751 = vbcast.lane.b32.xlu1 %v745_v36, 264  ;;  %v3924_v8 = vpop.xlane.xlu1 %484 }
 0x15f   : > { %5542 = vst [vmem:[#allocation24_spill] sm:$0xff] %v3924_v8  ;;  %v3926_v6 = vpop.xlane.xlu0 %482 }
 0x160   : > { %5543 = vst [vmem:[#allocation25_spill] sm:$0xff] %v3926_v6  ;;  %755 = vbcast.lane.b32.xlu0 %v745_v36, 272 }
 0x162   : > { %759 = vbcast.lane.b32.xlu1 %v745_v36, 280  ;;  %v3928_v59 = vpop.xlane.xlu1 %488 }
 0x163   : > { %5544 = vst [vmem:[#allocation26_spill] sm:$0xff] %v3928_v59  ;;  %v3930_v46 = vpop.xlane.xlu0 %486 }
 0x164   : > { %5545 = vst [vmem:[#allocation27_spill] sm:$0xff] %v3930_v46  ;;  %763 = vbcast.lane.b32.xlu0 %v745_v36, 288 }
 0x166   : > { %767 = vbcast.lane.b32.xlu1 %v745_v36, 296  ;;  %v3932_v7 = vpop.xlane.xlu1 %492 }
 0x167   : > { %5546 = vst [vmem:[#allocation28_spill] sm:$0xff] %v3932_v7  ;;  %v3934_v11 = vpop.xlane.xlu0 %490 }
 0x168   : > { %5547 = vst [vmem:[#allocation29_spill] sm:$0xff] %v3934_v11  ;;  %771 = vbcast.lane.b32.xlu0 %v745_v36, 304 }
 0x16a   : > { %775 = vbcast.lane.b32.xlu1 %v745_v36, 312  ;;  %v507_v4 = vpop.permute.xlu1 %506 }
 0x16b   : > { %v503_v26 = vpop.permute.xlu0 %502  ;;  %v3937_v8 = vadd.f32 %v507_v4, %v3779_v13 }
 0x16c   : > { %v3940_v6 = vadd.f32 %v503_v26, %v3775_v0 }
 0x16d   : > { %5548 = vst [vmem:[#allocation30_spill] sm:$0xff] %v3937_v8 }
 0x16e   : > { %5549 = vst [vmem:[#allocation31_spill] sm:$0xff] %v3940_v6  ;;  %970 = vperm.xlu0 %3115, %v3940_v6   ;;  %v511_v59 = vpop.permute.xlu1 %510  ;;  %973 = vperm.xlu1 %3116, %v3937_v8  }
 0x16f   : > { %v519_v46 = vpop.permute.xlu0 %518  ;;  %v3945_v7 = vadd.f32 %v511_v59, %v3773_v10 }
 0x170   : > { %v3952_v13 = vadd.f32 %v519_v46, %v3783_v15 }
 0x171   : > { %5550 = vst [vmem:[#allocation32_spill] sm:$0xff] %v3945_v7 }
 0x172   : > { %v515_v11 = vpop.permute.xlu1 %514  ;;  %976 = vperm.xlu1 %3116, %v3945_v7   ;;  %5552 = vst [vmem:[#allocation34_spill] sm:$0xff] %v3952_v13 }
 0x173   : > { %v527_v36 = vpop.permute.xlu0 %526  ;;  %v3949_v16 = vadd.f32 %v515_v11, %v3777_v12 }
 0x174   : > { %v3960_v10 = vadd.f32 %v527_v36, %v3790_v18 }
 0x175   : > { %5551 = vst [vmem:[#allocation33_spill] sm:$0xff] %v3949_v16  ;;  %979 = vperm.xlu0 %3115, %v3949_v16  }
 0x176   : > { %v523_v0 = vpop.permute.xlu1 %522  ;;  %982 = vperm.xlu1 %3116, %v3952_v13   ;;  %5554 = vst [vmem:[#allocation36_spill] sm:$0xff] %v3960_v10 }
 0x177   : > { %v538_v26 = vpop.permute.xlu0 %537  ;;  %v3957_v4 = vadd.f32 %v523_v0, %v3781_v14 }
 0x178   : > { %v3968_v46 = vadd.f32 %v538_v26, %v3796_v21 }
 0x179   : > { %5553 = vst [vmem:[#allocation35_spill] sm:$0xff] %v3957_v4  ;;  %985 = vperm.xlu0 %3115, %v3957_v4  }
 0x17a   : > { %v531_v59 = vpop.permute.xlu1 %530  ;;  %988 = vperm.xlu1 %3116, %v3960_v10   ;;  %5556 = vst [vmem:[#allocation38_spill] sm:$0xff] %v3968_v46 }
 0x17b   : > { %v546_v12 = vpop.permute.xlu0 %545  ;;  %v3965_v15 = vadd.f32 %v531_v59, %v3788_v17 }
 0x17c   : > { %v3976_v36 = vadd.f32 %v546_v12, %v3800_v23 }
 0x17d   : > { %5555 = vst [vmem:[#allocation37_spill] sm:$0xff] %v3965_v15  ;;  %991 = vperm.xlu0 %3115, %v3965_v15  }
 0x17e   : > { %v542_v11 = vpop.permute.xlu1 %541  ;;  %994 = vperm.xlu1 %3116, %v3968_v46   ;;  %5558 = vst [vmem:[#allocation40_spill] sm:$0xff] %v3976_v36  ;;  %v5623_v46 = vld [vmem:[#allocation11_spill] sm:$0xff] }
 0x17f   : > { %v554_v14 = vpop.permute.xlu0 %553  ;;  %v3973_v18 = vadd.f32 %v542_v11, %v3794_v20 }
 0x180   : > { %v3984_v26 = vadd.f32 %v554_v14, %v3804_v25 }
 0x181   : > { %5557 = vst [vmem:[#allocation39_spill] sm:$0xff] %v3973_v18  ;;  %997 = vperm.xlu0 %3115, %v3973_v18  }
 0x182   : > { %v550_v0 = vpop.permute.xlu1 %549  ;;  %1000 = vperm.xlu1 %3116, %v3976_v36   ;;  %5560 = vst [vmem:[#allocation42_spill] sm:$0xff] %v3984_v26 }
 0x183   : > { %v562_v17 = vpop.permute.xlu0 %561  ;;  %v3981_v21 = vadd.f32 %v550_v0, %v3798_v22 }
 0x184   : > { %v3992_v12 = vadd.f32 %v562_v17, %v3811_v28 }
 0x185   : > { %5559 = vst [vmem:[#allocation41_spill] sm:$0xff] %v3981_v21  ;;  %1003 = vperm.xlu0 %3115, %v3981_v21  }
 0x186   : > { %v558_v59 = vpop.permute.xlu1 %557  ;;  %1006 = vperm.xlu1 %3116, %v3984_v26   ;;  %5562 = vst [vmem:[#allocation44_spill] sm:$0xff] %v3992_v12 }
 0x187   : > { %v573_v20 = vpop.permute.xlu0 %572  ;;  %v3989_v23 = vadd.f32 %v558_v59, %v3802_v24 }
 0x188   : > { %v4000_v14 = vadd.f32 %v573_v20, %v3817_v31 }
 0x189   : > { %5561 = vst [vmem:[#allocation43_spill] sm:$0xff] %v3989_v23  ;;  %1009 = vperm.xlu0 %3115, %v3989_v23   ;;  %v5622_v23 = vlaneseq }
 0x18a   : > { %v566_v11 = vpop.permute.xlu1 %565  ;;  %1012 = vperm.xlu1 %3116, %v3992_v12   ;;  %5564 = vst [vmem:[#allocation46_spill] sm:$0xff] %v4000_v14 }
 0x18b   : > { %v581_v22 = vpop.permute.xlu0 %580  ;;  %v3997_v25 = vadd.f32 %v566_v11, %v3809_v27 }
 0x18c   : > { %v4008_v17 = vadd.f32 %v581_v22, %v3821_v33 }
 0x18d   : > { %5563 = vst [vmem:[#allocation45_spill] sm:$0xff] %v3997_v25  ;;  %1015 = vperm.xlu0 %3115, %v3997_v25  }
 0x18e   : > { %v577_v0 = vpop.permute.xlu1 %576  ;;  %1018 = vperm.xlu1 %3116, %v4000_v14   ;;  %5566 = vst [vmem:[#allocation48_spill] sm:$0xff] %v4008_v17 }
 0x18f   : > { %v589_v24 = vpop.permute.xlu0 %588  ;;  %v4005_v28 = vadd.f32 %v577_v0, %v3815_v30 }
 0x190   : > { %v4016_v20 = vadd.f32 %v589_v24, %v3825_v35 }
 0x191   : > { %5565 = vst [vmem:[#allocation47_spill] sm:$0xff] %v4005_v28  ;;  %1021 = vperm.xlu0 %3115, %v4005_v28  }
 0x192   : > { %v585_v59 = vpop.permute.xlu1 %584  ;;  %1024 = vperm.xlu1 %3116, %v4008_v17   ;;  %5568 = vst [vmem:[#allocation50_spill] sm:$0xff] %v4016_v20 }
 0x193   : > { %v597_v27 = vpop.permute.xlu0 %596  ;;  %v4013_v31 = vadd.f32 %v585_v59, %v3819_v32 }
 0x194   : > { %v4024_v22 = vadd.f32 %v597_v27, %v3832_v38 }
 0x195   : > { %5567 = vst [vmem:[#allocation49_spill] sm:$0xff] %v4013_v31  ;;  %1027 = vperm.xlu0 %3115, %v4013_v31  }
 0x196   : > { %v593_v11 = vpop.permute.xlu1 %592  ;;  %1030 = vperm.xlu1 %3116, %v4016_v20   ;;  %5570 = vst [vmem:[#allocation52_spill] sm:$0xff] %v4024_v22 }
 0x197   : > { %v608_v30 = vpop.permute.xlu0 %607  ;;  %v4021_v33 = vadd.f32 %v593_v11, %v3823_v34 }
 0x198   : > { %v4032_v24 = vadd.f32 %v608_v30, %v3838_v41 }
 0x199   : > { %5569 = vst [vmem:[#allocation51_spill] sm:$0xff] %v4021_v33  ;;  %1033 = vperm.xlu0 %3115, %v4021_v33  }
 0x19a   : > { %v601_v0 = vpop.permute.xlu1 %600  ;;  %1036 = vperm.xlu1 %3116, %v4024_v22   ;;  %5572 = vst [vmem:[#allocation54_spill] sm:$0xff] %v4032_v24 }
 0x19b   : > { %v616_v32 = vpop.permute.xlu0 %615  ;;  %v4029_v35 = vadd.f32 %v601_v0, %v3830_v37 }
 0x19c   : > { %v4040_v27 = vadd.f32 %v616_v32, %v3842_v43 }
 0x19d   : > { %5571 = vst [vmem:[#allocation53_spill] sm:$0xff] %v4029_v35  ;;  %1039 = vperm.xlu0 %3115, %v4029_v35  }
 0x19e   : > { %v612_v59 = vpop.permute.xlu1 %611  ;;  %1042 = vperm.xlu1 %3116, %v4032_v24   ;;  %5574 = vst [vmem:[#allocation56_spill] sm:$0xff] %v4040_v27 }
 0x19f   : > { %v624_v34 = vpop.permute.xlu0 %623  ;;  %v4037_v38 = vadd.f32 %v612_v59, %v3836_v40 }
 0x1a0   : > { %v4048_v30 = vadd.f32 %v624_v34, %v3846_v45 }
 0x1a1   : > { %5573 = vst [vmem:[#allocation55_spill] sm:$0xff] %v4037_v38  ;;  %1045 = vperm.xlu0 %3115, %v4037_v38  }
 0x1a2   : > { %v620_v11 = vpop.permute.xlu1 %619  ;;  %1048 = vperm.xlu1 %3116, %v4040_v27   ;;  %5576 = vst [vmem:[#allocation58_spill] sm:$0xff] %v4048_v30 }
 0x1a3   : > { %v632_v37 = vpop.permute.xlu0 %631  ;;  %v4045_v41 = vadd.f32 %v620_v11, %v3840_v42 }
 0x1a4   : > { %v4056_v32 = vadd.f32 %v632_v37, %v3853_v48 }
 0x1a5   : > { %5575 = vst [vmem:[#allocation57_spill] sm:$0xff] %v4045_v41  ;;  %1051 = vperm.xlu0 %3115, %v4045_v41  }
 0x1a6   : > { %v628_v0 = vpop.permute.xlu1 %627  ;;  %1054 = vperm.xlu1 %3116, %v4048_v30   ;;  %5578 = vst [vmem:[#allocation60_spill] sm:$0xff] %v4056_v32 }
 0x1a7   : > { %v643_v40 = vpop.permute.xlu0 %642  ;;  %v4053_v43 = vadd.f32 %v628_v0, %v3844_v44 }
 0x1a8   : > { %v4064_v34 = vadd.f32 %v643_v40, %v3859_v51 }
 0x1a9   : > { %5577 = vst [vmem:[#allocation59_spill] sm:$0xff] %v4053_v43  ;;  %1057 = vperm.xlu0 %3115, %v4053_v43  }
 0x1aa   : > { %v636_v59 = vpop.permute.xlu1 %635  ;;  %1060 = vperm.xlu1 %3116, %v4056_v32   ;;  %5580 = vst [vmem:[#allocation62_spill] sm:$0xff] %v4064_v34 }
 0x1ab   : > { %v651_v42 = vpop.permute.xlu0 %650  ;;  %v4061_v45 = vadd.f32 %v636_v59, %v3851_v47 }
 0x1ac   : > { %v4072_v37 = vadd.f32 %v651_v42, %v3863_v53 }
 0x1ad   : > { %5579 = vst [vmem:[#allocation61_spill] sm:$0xff] %v4061_v45  ;;  %1063 = vperm.xlu0 %3115, %v4061_v45  }
 0x1ae   : > { %v647_v11 = vpop.permute.xlu1 %646  ;;  %1066 = vperm.xlu1 %3116, %v4064_v34   ;;  %5582 = vst [vmem:[#allocation64_spill] sm:$0xff] %v4072_v37 }
 0x1af   : > { %v659_v44 = vpop.permute.xlu0 %658  ;;  %v4069_v48 = vadd.f32 %v647_v11, %v3857_v50 }
 0x1b0   : > { %v4080_v40 = vadd.f32 %v659_v44, %v3867_v55 }
 0x1b1   : > { %5581 = vst [vmem:[#allocation63_spill] sm:$0xff] %v4069_v48  ;;  %1069 = vperm.xlu0 %3115, %v4069_v48  }
 0x1b2   : > { %v655_v0 = vpop.permute.xlu1 %654  ;;  %1072 = vperm.xlu1 %3116, %v4072_v37   ;;  %5584 = vst [vmem:[#allocation66_spill] sm:$0xff] %v4080_v40 }
 0x1b3   : > { %v667_v47 = vpop.permute.xlu0 %666  ;;  %v4077_v51 = vadd.f32 %v655_v0, %v3861_v52 }
 0x1b4   : > { %v4088_v42 = vadd.f32 %v667_v47, %v3874_v58 }
 0x1b5   : > { %5583 = vst [vmem:[#allocation65_spill] sm:$0xff] %v4077_v51  ;;  %1075 = vperm.xlu0 %3115, %v4077_v51  }
 0x1b6   : > { %v663_v59 = vpop.permute.xlu1 %662  ;;  %1078 = vperm.xlu1 %3116, %v4080_v40   ;;  %5586 = vst [vmem:[#allocation68_spill] sm:$0xff] %v4088_v42 }
 0x1b7   : > { %v678_v50 = vpop.permute.xlu0 %677  ;;  %v4085_v53 = vadd.f32 %v663_v59, %v3865_v54 }
 0x1b8   : > { %v4096_v44 = vadd.f32 %v678_v50, %v3880_v61 }
 0x1b9   : > { %5585 = vst [vmem:[#allocation67_spill] sm:$0xff] %v4085_v53  ;;  %1081 = vperm.xlu0 %3115, %v4085_v53   ;;  %v1162_v53 = vand.u32 127, %v5622_v23 }
 0x1ba   : > { %v671_v11 = vpop.permute.xlu1 %670  ;;  %1084 = vperm.xlu1 %3116, %v4088_v42   ;;  %5588 = vst [vmem:[#allocation70_spill] sm:$0xff] %v4096_v44 }
 0x1bb   : > { %v686_v52 = vpop.permute.xlu0 %685  ;;  %v4093_v55 = vadd.f32 %v671_v11, %v3872_v57  ;;  %v1167_v21 = vadd.s32 4294967288, %v1162_v53  ;;  %v1174_v48 = vadd.s32 4294967280, %v1162_v53  ;;  %v1181_v15 = vadd.s32 4294967272, %v1162_v53 }
 0x1bc   : > { %v4104_v47 = vadd.f32 %v686_v52, %v3884_v63  ;;  %v4286_v23 = vsub.s32 %v1162_v53, %v5623_v46  ;;  %v1188_v38 = vadd.s32 4294967264, %v1162_v53  ;;  %v1195_v16 = vadd.s32 4294967256, %v1162_v53 }
 0x1bd   : > { %5587 = vst [vmem:[#allocation69_spill] sm:$0xff] %v4093_v55  ;;  %1087 = vperm.xlu0 %3115, %v4093_v55   ;;  %v4278_v43 = vsub.s32 %v1167_v21, %v5623_v46  ;;  %v4281_v41 = vsub.s32 %v1174_v48, %v5623_v46  ;;  %v4293_v13 = vsub.s32 %v1181_v15, %v5623_v46  ;;  %v1209_v6 = vadd.s32 4294967240, %v1162_v53 }
 0x1be   : > { %v682_v0 = vpop.permute.xlu1 %681  ;;  %1090 = vperm.xlu1 %3116, %v4096_v44   ;;  %5590 = vst [vmem:[#allocation72_spill] sm:$0xff] %v4104_v47  ;;  %v4302_v31 = vsub.s32 %v1188_v38, %v5623_v46 }
 0x1bf   : > { %v694_v54 = vpop.permute.xlu0 %693  ;;  %v4101_v58 = vadd.f32 %v682_v0, %v3878_v60 }
 0x1c0   : > { %v4112_v50 = vadd.f32 %v694_v54, %v3888_v2 }
 0x1c1   : > { %5589 = vst [vmem:[#allocation71_spill] sm:$0xff] %v4101_v58  ;;  %1093 = vperm.xlu0 %3115, %v4101_v58  }
 0x1c2   : > { %v690_v59 = vpop.permute.xlu1 %689  ;;  %1096 = vperm.xlu1 %3116, %v4104_v47   ;;  %5592 = vst [vmem:[#allocation74_spill] sm:$0xff] %v4112_v50 }
 0x1c3   : > { %v702_v57 = vpop.permute.xlu0 %701  ;;  %v4109_v61 = vadd.f32 %v690_v59, %v3882_v62 }
 0x1c4   : > { %v4120_v52 = vadd.f32 %v702_v57, %v3895_v9 }
 0x1c5   : > { %5591 = vst [vmem:[#allocation73_spill] sm:$0xff] %v4109_v61  ;;  %1099 = vperm.xlu0 %3115, %v4109_v61  }
 0x1c6   : > { %v698_v11 = vpop.permute.xlu1 %697  ;;  %1102 = vperm.xlu1 %3116, %v4112_v50   ;;  %5594 = vst [vmem:[#allocation76_spill] sm:$0xff] %v4120_v52 }
 0x1c7   : > { %v713_v60 = vpop.permute.xlu0 %712  ;;  %v4117_v63 = vadd.f32 %v698_v11, %v3886_v1 }
 0x1c8   : > { %v4128_v54 = vadd.f32 %v713_v60, %v3901_v29 }
 0x1c9   : > { %5593 = vst [vmem:[#allocation75_spill] sm:$0xff] %v4117_v63  ;;  %1105 = vperm.xlu0 %3115, %v4117_v63  }
 0x1ca   : > { %v706_v0 = vpop.permute.xlu1 %705  ;;  %1108 = vperm.xlu1 %3116, %v4120_v52   ;;  %5596 = vst [vmem:[#allocation78_spill] sm:$0xff] %v4128_v54 }
 0x1cb   : > { %v721_v62 = vpop.permute.xlu0 %720  ;;  %v4125_v2 = vadd.f32 %v706_v0, %v3893_v5 }
 0x1cc   : > { %v4136_v57 = vadd.f32 %v721_v62, %v3905_v49  ;;  %v5602_v62 = vld [vmem:[#allocation21_spill] sm:$0xff] }
 0x1cd   : > { %5595 = vst [vmem:[#allocation77_spill] sm:$0xff] %v4125_v2  ;;  %1111 = vperm.xlu0 %3115, %v4125_v2  }
 0x1ce   : > { %v717_v59 = vpop.permute.xlu1 %716  ;;  %1114 = vperm.xlu1 %3116, %v4128_v54   ;;  %5598 = vst [vmem:[#allocation80_spill] sm:$0xff] %v4136_v57 }
 0x1cf   : > { %v729_v1 = vpop.permute.xlu0 %728  ;;  %v4133_v9 = vadd.f32 %v717_v59, %v3899_v19 }
 0x1d0   : > { %v4144_v60 = vadd.f32 %v729_v1, %v3909_v56  ;;  %v5604_v56 = vld [vmem:[#allocation20_spill] sm:$0xff] }
 0x1d1   : > { %5597 = vst [vmem:[#allocation79_spill] sm:$0xff] %v4133_v9  ;;  %1117 = vperm.xlu0 %3115, %v4133_v9  }
 0x1d2   : > { %v725_v11 = vpop.permute.xlu1 %724  ;;  %1120 = vperm.xlu1 %3116, %v4136_v57   ;;  %5600 = vst [vmem:[#allocation82_spill] sm:$0xff] %v4144_v60 }
 0x1d3   : > { %v737_v5 = vpop.permute.xlu0 %736  ;;  %v4141_v29 = vadd.f32 %v725_v11, %v3903_v39  ;;  %v5606_v11 = vld [vmem:[#allocation23_spill] sm:$0xff] }
 0x1d4   : > { %v4152_v59 = vadd.f32 %v737_v5, %v5602_v62  ;;  %v5610_v62 = vld [vmem:[#allocation25_spill] sm:$0xff] }
 0x1d5   : > { %5599 = vst [vmem:[#allocation81_spill] sm:$0xff] %v4141_v29  ;;  %1123 = vperm.xlu0 %3115, %v4141_v29  }
 0x1d6   : > { %v733_v0 = vpop.permute.xlu1 %732  ;;  %1126 = vperm.xlu1 %3116, %v4144_v60   ;;  %5603 = vst [vmem:[#allocation21_spill] sm:$0xff] %v4152_v59 }
 0x1d7   : > { %v748_v19 = vpop.permute.xlu0 %747  ;;  %v4149_v49 = vadd.f32 %v733_v0, %v3907_v3  ;;  %v5608_v3 = vld [vmem:[#allocation22_spill] sm:$0xff] }
 0x1d8   : > { %v4160_v54 = vadd.f32 %v748_v19, %v5606_v11 }
 0x1d9   : > { %5601 = vst [vmem:[#allocation83_spill] sm:$0xff] %v4149_v49  ;;  %1129 = vperm.xlu0 %3115, %v4149_v49  }
 0x1da   : > { %v741_v57 = vpop.permute.xlu1 %740  ;;  %1132 = vperm.xlu1 %3116, %v4152_v59   ;;  %5607 = vst [vmem:[#allocation23_spill] sm:$0xff] %v4160_v54 }
 0x1db   : > { %v756_v39 = vpop.permute.xlu0 %755  ;;  %v4157_v1 = vadd.f32 %v741_v57, %v5604_v56  ;;  %v5612_v57 = vld [vmem:[#allocation24_spill] sm:$0xff]  ;;  %v5614_v56 = vld [vmem:[#allocation27_spill] sm:$0xff] }
 0x1dc   : > { %v4168_v52 = vadd.f32 %v756_v39, %v5610_v62  ;;  %v5618_v62 = vld [vmem:[#allocation29_spill] sm:$0xff] }
 0x1dd   : > { %5605 = vst [vmem:[#allocation20_spill] sm:$0xff] %v4157_v1  ;;  %1135 = vperm.xlu0 %3115, %v4157_v1  }
 0x1de   : > { %v752_v60 = vpop.permute.xlu1 %751  ;;  %1138 = vperm.xlu1 %3116, %v4160_v54   ;;  %5611 = vst [vmem:[#allocation25_spill] sm:$0xff] %v4168_v52 }
 0x1df   : > { %v4165_v5 = vadd.f32 %v752_v60, %v5608_v3  ;;  %v764_v0 = vpop.permute.xlu0 %763  ;;  %v5616_v3 = vld [vmem:[#allocation26_spill] sm:$0xff] }
 0x1e0   : > { %v4176_v11 = vadd.f32 %v764_v0, %v5614_v56 }
 0x1e1   : > { %5609 = vst [vmem:[#allocation22_spill] sm:$0xff] %v4165_v5  ;;  %1141 = vperm.xlu0 %3115, %v4165_v5  }
 0x1e2   : > { %v760_v59 = vpop.permute.xlu1 %759  ;;  %1144 = vperm.xlu1 %3116, %v4168_v52   ;;  %5615 = vst [vmem:[#allocation27_spill] sm:$0xff] %v4176_v11 }
 0x1e3   : > { %v4173_v19 = vadd.f32 %v760_v59, %v5612_v57  ;;  %v772_v50 = vpop.permute.xlu0 %771  ;;  %v5620_v59 = vld [vmem:[#allocation28_spill] sm:$0xff] }
 0x1e4   : > { %v4184_v54 = vadd.f32 %v772_v50, %v5618_v62 }
 0x1e5   : > { %5613 = vst [vmem:[#allocation24_spill] sm:$0xff] %v4173_v19  ;;  %1147 = vperm.xlu0 %3115, %v4173_v19  }
 0x1e6   : > { %v768_v60 = vpop.permute.xlu1 %767  ;;  %1150 = vperm.xlu1 %3116, %v4176_v11   ;;  %5619 = vst [vmem:[#allocation29_spill] sm:$0xff] %v4184_v54 }
 0x1e7   : > { %v4181_v39 = vadd.f32 %v768_v60, %v5616_v3 }
 0x1e9   : > { %5617 = vst [vmem:[#allocation26_spill] sm:$0xff] %v4181_v39  ;;  %1153 = vperm.xlu0 %3115, %v4181_v39  }
 0x1ea   : > { %v776_v52 = vpop.permute.xlu1 %775  ;;  %1156 = vperm.xlu1 %3116, %v4184_v54  }
 0x1eb   : > { %v4189_v0 = vadd.f32 %v776_v52, %v5620_v59 }
 0x1ed   : > { %5621 = vst [vmem:[#allocation28_spill] sm:$0xff] %v4189_v0  ;;  %1159 = vperm.xlu0 %3115, %v4189_v0   ;;  %v4194_v56 = vpop.permute.xlu0 %970 }
 0x1ee   : > { %v4192_v57 = vpop.permute.xlu1 %973  ;;  %v1166_v33 = vrot.slane %v4194_v56, %v4286_v23  ;;  %v4315_v56 = vsub.s32 %v1195_v16, %v5623_v46 }
 0x1ef   : > { %v1171_v35 = vrot.slane %v4192_v57, %v4278_v43 }
 0x1f1   : > { %v1173_v57 = vsel %vm1172_vm0, %v1171_v35, %v1166_v33 }
 0x1f2   : > { %v4196_v11 = vpop.permute.xlu1 %976 }
 0x1f3   : > { %v1178_v21 = vrot.slane %v4196_v11, %v4281_v41 }
 0x1f4   : > { %v4198_v60 = vpop.permute.xlu0 %979 }
 0x1f5   : > { %v1185_v15 = vrot.slane %v4198_v60, %v4293_v13  ;;  %v1180_v28 = vsel %vm1179_vm1, %v1178_v21, %v1173_v57  ;;  %v1202_v21 = vadd.s32 4294967248, %v1162_v53 }
 0x1f6   : > { %v4200_v50 = vpop.permute.xlu1 %982 }
 0x1f7   : > { %v1192_v38 = vrot.slane %v4200_v50, %v4302_v31  ;;  %v1187_v60 = vsel %vm1186_vm2, %v1185_v15, %v1180_v28  ;;  %v4339_v15 = vsub.s32 %v1202_v21, %v5623_v46 }
 0x1f8   : > { %v4202_v3 = vpop.permute.xlu0 %985 }
 0x1f9   : > { %v1199_v50 = vrot.slane %v4202_v3, %v4315_v56  ;;  %v1194_v18 = vsel %vm1193_vm3, %v1192_v38, %v1187_v60 }
 0x1fa   : > { %v4204_v62 = vpop.permute.xlu1 %988 }
 0x1fb   : > { %v1201_v38 = vsel %vm1200_vm4, %v1199_v50, %v1194_v18 }
 0x1fc   : > { %v4206_v54 = vpop.permute.xlu0 %991 }
 0x1fe   : > { %v4208_v52 = vpop.permute.xlu1 %994 }
 0x1ff   : > { %v1219_v33 = vrot.slane %v4208_v52, %v4286_v23 }
 0x200   : > { %v4210_v59 = vpop.permute.xlu0 %997 }
 0x201   : > { %v1223_v11 = vrot.slane %v4210_v59, %v4278_v43 }
 0x202   : > { %v4212_v47 = vpop.permute.xlu1 %1000 }
 0x203   : > { %v1228_v59 = vrot.slane %v4212_v47, %v4281_v41  ;;  %v1224_v16 = vsel %vm1172_vm0, %v1223_v11, %v1219_v33 }
 0x204   : > { %v4214_v44 = vpop.permute.xlu0 %1003 }
 0x205   : > { %v1233_v28 = vrot.slane %v4214_v44, %v4293_v13  ;;  %v1229_v11 = vsel %vm1179_vm1, %v1228_v59, %v1224_v16  ;;  %v4347_v44 = vsub.s32 %v1209_v6, %v5623_v46  ;;  %v1206_v6 = vrot.slane %v4204_v62, %v4339_v15 }
 0x206   : > { %v4216_v42 = vpop.permute.xlu1 %1006 }
 0x207   : > { %v1234_v60 = vsel %vm1186_vm2, %v1233_v28, %v1229_v11 }
 0x208   : > { %v4218_v0 = vpop.permute.xlu0 %1009 }
 0x209   : > { %v1243_v46 = vrot.slane %v4218_v0, %v4315_v56 }
 0x20a   : > { %v4220_v40 = vpop.permute.xlu1 %1012 }
 0x20c   : > { %v4222_v39 = vpop.permute.xlu0 %1015 }
 0x20e   : > { %v4224_v37 = vpop.permute.xlu1 %1018 }
 0x20f   : > { %v1258_v52 = vrot.slane %v4224_v37, %v4286_v23 }
 0x210   : > { %v4226_v19 = vpop.permute.xlu0 %1021 }
 0x211   : > { %v1262_v57 = vrot.slane %v4226_v19, %v4278_v43 }
 0x212   : > { %v4228_v34 = vpop.permute.xlu1 %1024 }
 0x213   : > { %v1267_v47 = vrot.slane %v4228_v34, %v4281_v41  ;;  %v1263_v53 = vsel %vm1172_vm0, %v1262_v57, %v1258_v52  ;;  %v1238_v34 = vrot.slane %v4216_v42, %v4302_v31 }
 0x214   : > { %v4230_v5 = vpop.permute.xlu0 %1027 }
 0x215   : > { %v1272_v33 = vrot.slane %v4230_v5, %v4293_v13  ;;  %v1268_v21 = vsel %vm1179_vm1, %v1267_v47, %v1263_v53  ;;  %v1239_v50 = vsel %vm1193_vm3, %v1238_v34, %v1234_v60 }
 0x216   : > { %v4232_v32 = vpop.permute.xlu1 %1030 }
 0x217   : > { %v1277_v57 = vrot.slane %v4232_v32, %v4302_v31  ;;  %v1273_v0 = vsel %vm1186_vm2, %v1272_v33, %v1268_v21 }
 0x218   : > { %v4234_v1 = vpop.permute.xlu0 %1033 }
 0x219   : > { %v1278_v53 = vsel %vm1193_vm3, %v1277_v57, %v1273_v0 }
 0x21a   : > { %v4236_v30 = vpop.permute.xlu1 %1036 }
 0x21b   : > { %v1287_v60 = vrot.slane %v4236_v30, %v4339_v15  ;;  %v1213_v30 = vrot.slane %v4206_v54, %v4347_v44  ;;  %v1253_v54 = vrot.slane %v4222_v39, %v4347_v44 }
 0x21c   : > { %v4238_v49 = vpop.permute.xlu0 %1039 }
 0x21e   : > { %v4240_v27 = vpop.permute.xlu1 %1042 }
 0x21f   : > { %v1297_v59 = vrot.slane %v4240_v27, %v4286_v23 }
 0x220   : > { %v4242_v29 = vpop.permute.xlu0 %1045 }
 0x221   : > { %v1301_v37 = vrot.slane %v4242_v29, %v4278_v43 }
 0x222   : > { %v4244_v24 = vpop.permute.xlu1 %1048 }
 0x223   : > { %v1306_v42 = vrot.slane %v4244_v24, %v4281_v41  ;;  %v1302_v27 = vsel %vm1172_vm0, %v1301_v37, %v1297_v59 }
 0x224   : > { %v4246_v9 = vpop.permute.xlu0 %1051 }
 0x225   : > { %v1311_v32 = vrot.slane %v4246_v9, %v4293_v13  ;;  %v1244_v9 = vsel %vm1200_vm4, %v1243_v46, %v1239_v50 }
 0x226   : > { %v4248_v22 = vpop.permute.xlu1 %1054 }
 0x227   : > { %v1316_v34 = vrot.slane %v4248_v22, %v4302_v31 }
 0x228   : > { %v4250_v2 = vpop.permute.xlu0 %1057 }
 0x22a   : > { %v4252_v20 = vpop.permute.xlu1 %1060 }
 0x22c   : > { %v4254_v63 = vpop.permute.xlu0 %1063 }
 0x22e   : > { %v4256_v17 = vpop.permute.xlu1 %1066 }
 0x230   : > { %v4258_v61 = vpop.permute.xlu0 %1069 }
 0x231   : > { %v1340_v29 = vrot.slane %v4258_v61, %v4278_v43  ;;  %v1336_v61 = vrot.slane %v4256_v17, %v4286_v23 }
 0x232   : > { %v4260_v14 = vpop.permute.xlu1 %1072 }
 0x233   : > { %v1345_v24 = vrot.slane %v4260_v14, %v4281_v41  ;;  %v1341_v52 = vsel %vm1172_vm0, %v1340_v29, %v1336_v61  ;;  %v1307_v14 = vsel %vm1179_vm1, %v1306_v42, %v1302_v27  ;;  %v1321_v42 = vrot.slane %v4250_v2, %v4315_v56 }
 0x234   : > { %v4262_v58 = vpop.permute.xlu0 %1075 }
 0x235   : > { %v1346_v33 = vsel %vm1179_vm1, %v1345_v24, %v1341_v52 }
 0x236   : > { %v4264_v12 = vpop.permute.xlu1 %1078 }
 0x237   : > { %v1355_v46 = vrot.slane %v4264_v12, %v4302_v31 }
 0x238   : > { %v4266_v55 = vpop.permute.xlu0 %1081 }
 0x239   : > { %v1360_v61 = vrot.slane %v4266_v55, %v4315_v56 }
 0x23a   : > { %v4269_v26 = vpop.permute.xlu1 %1084 }
 0x23c   : > { %v4271_v51 = vpop.permute.xlu0 %1087 }
 0x23e   : > { %v4273_v36 = vpop.permute.xlu1 %1090 }
 0x240   : > { %v4275_v45 = vpop.permute.xlu0 %1093 }
 0x241   : > { %v1379_v5 = vrot.slane %v4275_v45, %v4278_v43  ;;  %v1375_v45 = vrot.slane %v4273_v36, %v4286_v23 }
 0x242   : > { %v4283_v10 = vpop.permute.xlu1 %1096 }
 0x243   : > { %v1384_v17 = vrot.slane %v4283_v10, %v4281_v41  ;;  %v1380_v11 = vsel %vm1172_vm0, %v1379_v5, %v1375_v45  ;;  %v1350_v10 = vrot.slane %v4262_v58, %v4293_v13  ;;  %v1312_v58 = vsel %vm1186_vm2, %v1311_v32, %v1307_v14 }
 0x244   : > { %v4288_v4 = vpop.permute.xlu0 %1099  ;;  %v1317_v57 = vsel %vm1193_vm3, %v1316_v34, %v1312_v58  ;;  %v1326_v45 = vrot.slane %v4252_v20, %v4339_v15  ;;  %v1292_v14 = vrot.slane %v4238_v49, %v4347_v44  ;;  %v1331_v20 = vrot.slane %v4254_v63, %v4347_v44 }
 0x245   : > { %v1385_v21 = vsel %vm1179_vm1, %v1384_v17, %v1380_v11  ;;  %v1322_v39 = vsel %vm1200_vm4, %v1321_v42, %v1317_v57  ;;  %v1365_v17 = vrot.slane %v4269_v26, %v4339_v15  ;;  %v1370_v63 = vrot.slane %v4271_v51, %v4347_v44 }
 0x246   : > { %v4297_v48 = vpop.permute.xlu1 %1102 }
 0x247   : > { %v1394_v5 = vrot.slane %v4297_v48, %v4302_v31 }
 0x248   : > { %v4304_v7 = vpop.permute.xlu0 %1105 }
 0x249   : > { %v1399_v0 = vrot.slane %v4304_v7, %v4315_v56 }
 0x24a   : > { %v4312_v8 = vpop.permute.xlu1 %1108 }
 0x24c   : > { %v4321_v35 = vpop.permute.xlu0 %1111 }
 0x24e   : > { %v1115_v25 = vpop.permute.xlu1 %1114 }
 0x24f   : > { %v1414_v28 = vrot.slane %v1115_v25, %v4286_v23 }
 0x250   : > { %v1118_v19 = vpop.permute.xlu0 %1117 }
 0x251   : > { %v1418_v16 = vrot.slane %v1118_v19, %v4278_v43  ;;  %v1282_v19 = vrot.slane %v4234_v1, %v4315_v56  ;;  %v1248_v1 = vrot.slane %v4220_v40, %v4339_v15  ;;  %v1208_v40 = vsel %vm1207_vm5, %v1206_v6, %v1201_v38 }
 0x252   : > { %v1121_v3 = vpop.permute.xlu1 %1120 }
 0x253   : > { %v1423_v36 = vrot.slane %v1121_v3, %v4281_v41  ;;  %v1419_v25 = vsel %vm1172_vm0, %v1418_v16, %v1414_v28  ;;  %v1389_v3 = vrot.slane %v4288_v4, %v4293_v13  ;;  %v1283_v22 = vsel %vm1200_vm4, %v1282_v19, %v1278_v53 }
 0x254   : > { %v1124_v18 = vpop.permute.xlu0 %1123  ;;  %v1249_v6 = vsel %vm1207_vm5, %v1248_v1, %v1244_v9  ;;  %v1288_v2 = vsel %vm1207_vm5, %v1287_v60, %v1283_v22  ;;  %v1215_v60 = vsel %vm1214_vm6, %v1213_v30, %v1208_v40 }
 0x255   : > { %v1428_v59 = vrot.slane %v1124_v18, %v4293_v13  ;;  %v1424_v4 = vsel %vm1179_vm1, %v1423_v36, %v1419_v25  ;;  %v1351_v18 = vsel %vm1186_vm2, %v1350_v10, %v1346_v33  ;;  %v1390_v12 = vsel %vm1186_vm2, %v1389_v3, %v1385_v21 }
 0x256   : > { %v1127_v62 = vpop.permute.xlu1 %1126  ;;  %v1356_v50 = vsel %vm1193_vm3, %v1355_v46, %v1351_v18  ;;  %v1395_v55 = vsel %vm1193_vm3, %v1394_v5, %v1390_v12  ;;  %v1254_v49 = vsel %vm1214_vm6, %v1253_v54, %v1249_v6  ;;  %v1327_v25 = vsel %vm1207_vm5, %v1326_v45, %v1322_v39  ;;  %v5625_v45 = vld [vmem:[#allocation13_spill] sm:$0xff] }
 0x257   : > { %v1433_v27 = vrot.slane %v1127_v62, %v4302_v31  ;;  %v1429_v48 = vsel %vm1186_vm2, %v1428_v59, %v1424_v4  ;;  %v1361_v11 = vsel %vm1200_vm4, %v1360_v61, %v1356_v50  ;;  %v1400_v26 = vsel %vm1200_vm4, %v1399_v0, %v1395_v55 }
 0x258   : > { %v4385_v47 = vpop.permute.xlu0 %1129  ;;  %v1366_v34 = vsel %vm1207_vm5, %v1365_v17, %v1361_v11  ;;  %v1409_v33 = vrot.slane %v4321_v35, %v4347_v44  ;;  %v1293_v58 = vsel %vm1214_vm6, %v1292_v14, %v1288_v2  ;;  %v1332_v22 = vsel %vm1214_vm6, %v1331_v20, %v1327_v25  ;;  %v5627_v17 = vld [vmem:[#allocation39_spill] sm:$0xff]  ;;  %v5629_v14 = vld [vmem:[#allocation45_spill] sm:$0xff]  ;;  %v5630_v11 = vld [vmem:[#allocation30_spill] sm:$0xff] }
 0x259   : > { %v1438_v32 = vrot.slane %v4385_v47, %v4315_v56  ;;  %v1434_v7 = vsel %vm1193_vm3, %v1433_v27, %v1429_v48  ;;  %v1404_v47 = vrot.slane %v4312_v8, %v4339_v15  ;;  %v1490_v42 = vsel %vm1489_vm7, %v1254_v49, %v1215_v60  ;;  %v5632_v25 = vld [vmem:[#allocation32_spill] sm:$0xff] }
 0x25a   : > { %v4397_v37 = vpop.permute.xlu1 %1132  ;;  %v1371_v40 = vsel %vm1214_vm6, %v1370_v63, %v1366_v34  ;;  %v1492_v18 = vsel %vm1491_vm8, %v1293_v58, %v1490_v42  ;;  %v5635_v58 = vld [vmem:[#allocation51_spill] sm:$0xff] }
 0x25b   : > { %v1443_v9 = vrot.slane %v4397_v37, %v4339_v15  ;;  %v1439_v1 = vsel %vm1200_vm4, %v1438_v32, %v1434_v7  ;;  %v1405_v21 = vsel %vm1207_vm5, %v1404_v47, %v1400_v26  ;;  %v1494_v6 = vsel %vm1493_vm9, %v1332_v22, %v1492_v18  ;;  %v5626_v32 = vld [vmem:[#allocation14_spill] sm:$0xff] }
 0x25c   : > { %v4411_v29 = vpop.permute.xlu0 %1135  ;;  %v1496_v27 = vsel %vm1495_vm10, %v1371_v40, %v1494_v6 }
 0x25d   : > { %v1448_v51 = vrot.slane %v4411_v29, %v4347_v44  ;;  %v1444_v46 = vsel %vm1207_vm5, %v1443_v9, %v1439_v1  ;;  %v1410_v29 = vsel %vm1214_vm6, %v1409_v33, %v1405_v21 }
 0x25e   : > { %v1139_v38 = vpop.permute.xlu1 %1138  ;;  %v1498_v61 = vsel %vm1497_vm11, %v1410_v29, %v1496_v27  ;;  %v5641_v27 = vld [vmem:[#allocation55_spill] sm:$0xff] }
 0x25f   : > { %v1453_v62 = vrot.slane %v1139_v38, %v4286_v23  ;;  %v1449_v57 = vsel %vm1214_vm6, %v1448_v51, %v1444_v46 }
 0x260   : > { %v1142_v16 = vpop.permute.xlu0 %1141 }
 0x261   : > { %v1457_v24 = vrot.slane %v1142_v16, %v4278_v43  ;;  %v1500_v16 = vsel %vm1499_vm12, %v1449_v57, %v1498_v61  ;;  %v5642_v61 = vld [vmem:[#allocation36_spill] sm:$0xff] }
 0x262   : > { %v1145_v52 = vpop.permute.xlu1 %1144 }
 0x263   : > { %v1458_v28 = vsel %vm1172_vm0, %v1457_v24, %v1453_v62  ;;  %v1462_v19 = vrot.slane %v1145_v52, %v4281_v41  ;;  %v5624_v24 = vld [vmem:[#allocation12_spill] sm:$0xff] }
 0x264   : > { %v1148_v36 = vpop.permute.xlu0 %1147 }
 0x265   : > { %v1463_v53 = vsel %vm1179_vm1, %v1462_v19, %v1458_v28  ;;  %v1467_v10 = vrot.slane %v1148_v36, %v4293_v13  ;;  %v5628_v28 = vld [vmem:[#allocation31_spill] sm:$0xff] }
 0x266   : > { %v1151_v8 = vpop.permute.xlu1 %1150 }
 0x267   : > { %v1468_v37 = vsel %vm1186_vm2, %v1467_v10, %v1463_v53  ;;  %v1472_v3 = vrot.slane %v1151_v8, %v4302_v31  ;;  %v5631_v53 = vld [vmem:[#allocation47_spill] sm:$0xff]  ;;  %v5633_v8 = vld [vmem:[#allocation49_spill] sm:$0xff] }
 0x268   : > { %v1154_v59 = vpop.permute.xlu0 %1153 }
 0x269   : > { %v1473_v35 = vsel %vm1193_vm3, %v1472_v3, %v1468_v37  ;;  %v1477_v4 = vrot.slane %v1154_v59, %v4315_v56  ;;  %v5634_v37 = vld [vmem:[#allocation33_spill] sm:$0xff]  ;;  %v5636_v59 = vld [vmem:[#allocation34_spill] sm:$0xff] }
 0x26a   : > { %v1157_v30 = vpop.permute.xlu1 %1156 }
 0x26b   : > { %v1478_v5 = vsel %vm1200_vm4, %v1477_v4, %v1473_v35  ;;  %v1482_v38 = vrot.slane %v1157_v30, %v4339_v15  ;;  %v5638_v4 = vld [vmem:[#allocation15_spill] sm:$0xff]  ;;  %v5639_v30 = vld [vmem:[#allocation53_spill] sm:$0xff] }
 0x26c   : > { %v1160_v12 = vpop.permute.xlu0 %1159 }
 0x26d   : > { %v1483_v54 = vsel %vm1207_vm5, %v1482_v38, %v1478_v5  ;;  %v1487_v2 = vrot.slane %v1160_v12, %v4347_v44  ;;  %v5640_v5 = vld [vmem:[#allocation35_spill] sm:$0xff] }
 0x26f   : > { %v1488_v48 = vsel %vm1214_vm6, %v1487_v2, %v1483_v54 }
 0x270   : > { %v1502_v50 = vsel %vm1501_vm13, %v1488_v48, %v1500_v16 }
 0x271   : > { %v1505_v0 = vsel %vm1504_vm14, %v1502_v50, -inf }
 0x272   : > { %1506 = vmax.xlane.f32.xlu1 %v1505_v0 }
 0x2ff   : > { %v4498_v62 = vpop.xlane.xlu1 %1506 }
 0x300   : > { %v4502_v39 = vrot.slane %v4498_v62, %v5624_v24  ;;  %v4506_v55 = vrot.slane %v4498_v62, %v5625_v45  ;;  %v4510_v52 = vrot.slane %v4498_v62, %v5626_v32  ;;  %v4539_v42 = vrot.slane %v4498_v62, %v5638_v4 }
 0x302   : > { %v1558_v7 = vsub.f32 %v5627_v17, %v4506_v55  ;;  %v1549_v19 = vsub.f32 %v5628_v28, %v4502_v39  ;;  %v1564_v20 = vsub.f32 %v5629_v14, %v4506_v55  ;;  %v1550_v47 = vsub.f32 %v5630_v11, %v4502_v39  ;;  %v5643_v17 = vld [vmem:[#allocation57_spill] sm:$0xff] }
 0x303   : > { %v1566_v10 = vsub.f32 %v5631_v53, %v4510_v52  ;;  %v1551_v63 = vsub.f32 %v5632_v25, %v4502_v39  ;;  %v1568_v34 = vsub.f32 %v5633_v8, %v4510_v52  ;;  %v1552_v3 = vsub.f32 %v5634_v37, %v4502_v39  ;;  %v5646_v53 = vld [vmem:[#allocation38_spill] sm:$0xff]  ;;  %v5647_v25 = vld [vmem:[#allocation16_spill] sm:$0xff]  ;;  %v5648_v8 = vld [vmem:[#allocation61_spill] sm:$0xff] }
 0x304   : > { %v1631_v36 = vmul.f32 1.442695, %v1558_v7  ;;  %v1613_v26 = vmul.f32 1.442695, %v1549_v19  ;;  %v1643_v9 = vmul.f32 1.442695, %v1564_v20  ;;  %v1570_v21 = vsub.f32 %v5635_v58, %v4510_v52 }
 0x305   : > { %v1615_v49 = vmul.f32 1.442695, %v1550_v47  ;;  %v1647_v1 = vmul.f32 1.442695, %v1566_v10  ;;  %v1617_v33 = vmul.f32 1.442695, %v1551_v63  ;;  %v1553_v22 = vsub.f32 %v5636_v59, %v4502_v39 }
 0x306   : > { %3117 = vpow2.f32 %v1631_v36  ;;  %v1651_v60 = vmul.f32 1.442695, %v1568_v34  ;;  %v1619_v51 = vmul.f32 1.442695, %v1552_v3  ;;  %v1655_v40 = vmul.f32 1.442695, %v1570_v21 }
 0x307   : > { %3119 = vpow2.f32 %v1613_v26  ;;  %v1572_v18 = vsub.f32 %v5639_v30, %v4510_v52  ;;  %v1621_v29 = vmul.f32 1.442695, %v1553_v22  ;;  %v1554_v38 = vsub.f32 %v5640_v5, %v4502_v39  ;;  %v5644_v19 = vld [vmem:[#allocation37_spill] sm:$0xff]  ;;  %v5645_v36 = vld [vmem:[#allocation59_spill] sm:$0xff]  ;;  %v5649_v37 = vld [vmem:[#allocation40_spill] sm:$0xff] }
 0x308   : > { %3121 = vpow2.f32 %v1643_v9  ;;  %v1574_v54 = vsub.f32 %v5641_v27, %v4539_v42  ;;  %v1555_v48 = vsub.f32 %v5642_v61, %v4502_v39  ;;  %v1576_v7 = vsub.f32 %v5643_v17, %v4539_v42  ;;  %v5657_v17 = vld [vmem:[#allocation67_spill] sm:$0xff] }
 0x309   : > { %3123 = vpow2.f32 %v1615_v49  ;;  %v1659_v12 = vmul.f32 1.442695, %v1572_v18  ;;  %v1623_v2 = vmul.f32 1.442695, %v1554_v38  ;;  %v1556_v14 = vsub.f32 %v5644_v19, %v4502_v39  ;;  %v5653_v38 = vld [vmem:[#allocation65_spill] sm:$0xff]  ;;  %v5658_v19 = vld [vmem:[#allocation43_spill] sm:$0xff] }
 0x30a   : > { %3125 = vpow2.f32 %v1647_v1  ;;  %v1663_v0 = vmul.f32 1.442695, %v1574_v54  ;;  %v1625_v28 = vmul.f32 1.442695, %v1555_v48  ;;  %v1667_v47 = vmul.f32 1.442695, %v1576_v7 }
 0x30b   : > { %3127 = vpow2.f32 %v1617_v33  ;;  %v1578_v26 = vsub.f32 %v5645_v36, %v4539_v42  ;;  %v1627_v9 = vmul.f32 1.442695, %v1556_v14  ;;  %v1557_v10 = vsub.f32 %v5646_v53, %v4506_v55  ;;  %v5654_v54 = vld [vmem:[#allocation42_spill] sm:$0xff] }
 0x30c   : > { %3129 = vpow2.f32 %v1651_v60  ;;  %v4583_v63 = vrot.slane %v4498_v62, %v5647_v25  ;;  %v1580_v34 = vsub.f32 %v5648_v8, %v4539_v42  ;;  %v1559_v3 = vsub.f32 %v5649_v37, %v4506_v55 }
 0x30d   : > { %3131 = vpow2.f32 %v1619_v51  ;;  %v1671_v1 = vmul.f32 1.442695, %v1578_v26  ;;  %v1629_v33 = vmul.f32 1.442695, %v1557_v10  ;;  %v5650_v51 = vld [vmem:[#allocation63_spill] sm:$0xff]  ;;  %v1562_v14 = vsub.f32 %v5658_v19, %v4506_v55  ;;  %v5660_v26 = vld [vmem:[#allocation17_spill] sm:$0xff] }
 0x30e   : > { %3133 = vpow2.f32 %v1655_v40  ;;  %v1675_v21 = vmul.f32 1.442695, %v1580_v34  ;;  %v1582_v59 = vsub.f32 %v5650_v51, %v4583_v63  ;;  %v1633_v22 = vmul.f32 1.442695, %v1559_v3  ;;  %v5651_v40 = vld [vmem:[#allocation41_spill] sm:$0xff]  ;;  %v5662_v34 = vld [vmem:[#allocation44_spill] sm:$0xff] }
 0x30f   : > { %3135 = vpow2.f32 %v1621_v29  ;;  %v1560_v30 = vsub.f32 %v5651_v40, %v4506_v55  ;;  %v1586_v7 = vsub.f32 %v5657_v17, %v4583_v63  ;;  %v5661_v10 = vld [vmem:[#allocation69_spill] sm:$0xff]  ;;  %v1639_v8 = vmul.f32 1.442695, %v1562_v14  ;;  %v5665_v51 = vld [vmem:[#allocation71_spill] sm:$0xff]  ;;  %v5666_v40 = vld [vmem:[#allocation46_spill] sm:$0xff] }
 0x310   : > { %v4532_v46 = vpop.eup %3117  ;;  %3137 = vpow2.f32 %v1659_v12  ;;  %v1679_v5 = vmul.f32 1.442695, %v1582_v59  ;;  %v1584_v12 = vsub.f32 %v5653_v38, %v4583_v63  ;;  %v5673_v19 = vld [vmem:[#allocation75_spill] sm:$0xff] }
 0x311   : > { %5637 = vst [vmem:[#allocation11_spill] sm:$0xff] %v4532_v46  ;;  %v4534_v35 = vpop.eup %3119  ;;  %1833 = vperm.xlu1 %3116, %v4532_v46   ;;  %3139 = vpow2.f32 %v1623_v2  ;;  %v1635_v27 = vmul.f32 1.442695, %v1560_v30  ;;  %v1561_v2 = vsub.f32 %v5654_v54, %v4506_v55  ;;  %v1687_v53 = vmul.f32 1.442695, %v1586_v7 }
 0x312   : > { %1806 = vperm.xlu0 %3115, %v4534_v35   ;;  %v4546_v6 = vpop.eup %3121  ;;  %3141 = vpow2.f32 %v1663_v0  ;;  %v1683_v0 = vmul.f32 1.442695, %v1584_v12  ;;  %v1565_v30 = vsub.f32 %v5666_v40, %v4510_v52  ;;  %v5669_v12 = vld [vmem:[#allocation73_spill] sm:$0xff] }
 0x313   : > { %v4548_v57 = vpop.eup %3123  ;;  %3143 = vpow2.f32 %v1625_v28  ;;  %v1637_v28 = vmul.f32 1.442695, %v1561_v2  ;;  %v5670_v2 = vld [vmem:[#allocation48_spill] sm:$0xff] }
 0x314   : > { %v4556_v16 = vpop.eup %3125  ;;  %3145 = vpow2.f32 %v1667_v47  ;;  %v1645_v54 = vmul.f32 1.442695, %v1565_v30  ;;  %v5679_v30 = vld [vmem:[#allocation52_spill] sm:$0xff] }
 0x315   : > { %1851 = vperm.xlu1 %3116, %v4546_v6   ;;  %v4558_v50 = vpop.eup %3127  ;;  %3147 = vpow2.f32 %v1627_v9  ;;  %v4627_v9 = vrot.slane %v4498_v62, %v5660_v26 }
 0x316   : > { %1809 = vperm.xlu0 %3115, %v4548_v57   ;;  %v4566_v20 = vpop.eup %3129  ;;  %3149 = vpow2.f32 %v1671_v1  ;;  %v1588_v1 = vsub.f32 %v5661_v10, %v4583_v63  ;;  %v5674_v10 = vld [vmem:[#allocation50_spill] sm:$0xff] }
 0x317   : > { %v4568_v11 = vpop.eup %3131  ;;  %3151 = vpow2.f32 %v1629_v33  ;;  %v1563_v33 = vsub.f32 %v5662_v34, %v4506_v55  ;;  %v1590_v59 = vsub.f32 %v5665_v51, %v4627_v9  ;;  %v1594_v14 = vsub.f32 %v5673_v19, %v4627_v9  ;;  %v5683_v19 = vld [vmem:[#allocation54_spill] sm:$0xff] }
 0x318   : > { %v4576_v49 = vpop.eup %3133  ;;  %3153 = vpow2.f32 %v1675_v21  ;;  %v1691_v21 = vmul.f32 1.442695, %v1588_v1  ;;  %v1569_v1 = vsub.f32 %v5674_v10, %v4510_v52 }
 0x319   : > { %1857 = vperm.xlu1 %3116, %v4556_v16   ;;  %v4578_v39 = vpop.eup %3135  ;;  %3155 = vpow2.f32 %v1633_v22  ;;  %v1641_v22 = vmul.f32 1.442695, %v1563_v33  ;;  %v1695_v38 = vmul.f32 1.442695, %v1590_v59  ;;  %v5677_v33 = vld [vmem:[#allocation18_spill] sm:$0xff]  ;;  %v5678_v59 = vld [vmem:[#allocation77_spill] sm:$0xff] }
 0x31a   : > { %1812 = vperm.xlu0 %3115, %v4558_v50   ;;  %v4590_v60 = vpop.eup %3137  ;;  %3157 = vpow2.f32 %v1679_v5  ;;  %v1703_v51 = vmul.f32 1.442695, %v1594_v14  ;;  %v1653_v40 = vmul.f32 1.442695, %v1569_v1  ;;  %v1573_v14 = vsub.f32 %v5683_v19, %v4539_v42  ;;  %v5686_v1 = vld [vmem:[#allocation81_spill] sm:$0xff] }
 0x31b   : > { %v4592_v58 = vpop.eup %3139  ;;  %3159 = vpow2.f32 %v1635_v27  ;;  %v1592_v27 = vsub.f32 %v5669_v12, %v4627_v9 }
 0x31c   : > { %v4600_v18 = vpop.eup %3141  ;;  %3161 = vpow2.f32 %v1683_v0  ;;  %v1567_v0 = vsub.f32 %v5670_v2, %v4510_v52  ;;  %v5682_v2 = vld [vmem:[#allocation79_spill] sm:$0xff] }
 0x31d   : > { %1863 = vperm.xlu1 %3116, %v4566_v20   ;;  %v4602_v29 = vpop.eup %3143  ;;  %3163 = vpow2.f32 %v1637_v28  ;;  %v1699_v28 = vmul.f32 1.442695, %v1592_v27 }
 0x31e   : > { %1815 = vperm.xlu0 %3115, %v4568_v11   ;;  %5652 = vst [vmem:[#allocation12_spill] sm:$0xff] %v4602_v29  ;;  %v4610_v61 = vpop.eup %3145  ;;  %3165 = vpow2.f32 %v1687_v53  ;;  %v1649_v53 = vmul.f32 1.442695, %v1567_v0 }
 0x31f   : > { %5655 = vst [vmem:[#allocation13_spill] sm:$0xff] %v4610_v61  ;;  %v4612_v48 = vpop.eup %3147  ;;  %3167 = vpow2.f32 %v1639_v8 }
 0x320   : > { %5656 = vst [vmem:[#allocation14_spill] sm:$0xff] %v4612_v48  ;;  %v4620_v47 = vpop.eup %3149  ;;  %3169 = vpow2.f32 %v1691_v21  ;;  %v4671_v21 = vrot.slane %v4498_v62, %v5677_v33 }
 0x321   : > { %1869 = vperm.xlu1 %3116, %v4576_v49   ;;  %5659 = vst [vmem:[#allocation39_spill] sm:$0xff] %v4620_v47  ;;  %v4622_v36 = vpop.eup %3151  ;;  %3171 = vpow2.f32 %v1641_v22  ;;  %v1596_v22 = vsub.f32 %v5678_v59, %v4627_v9  ;;  %v1661_v59 = vmul.f32 1.442695, %v1573_v14 }
 0x322   : > { %1818 = vperm.xlu0 %3115, %v4578_v39   ;;  %v4634_v37 = vpop.eup %3153  ;;  %3173 = vpow2.f32 %v1695_v38  ;;  %v1571_v38 = vsub.f32 %v5679_v30, %v4510_v52  ;;  %v1598_v0 = vsub.f32 %v5682_v2, %v4671_v21 }
 0x323   : > { %5663 = vst [vmem:[#allocation31_spill] sm:$0xff] %v4634_v37  ;;  %v4636_v3 = vpop.eup %3155  ;;  %3175 = vpow2.f32 %v1645_v54  ;;  %v1707_v54 = vmul.f32 1.442695, %v1596_v22  ;;  %v5687_v22 = vld [vmem:[#allocation56_spill] sm:$0xff] }
 0x324   : > { %5664 = vst [vmem:[#allocation45_spill] sm:$0xff] %v4636_v3  ;;  %v4644_v5 = vpop.eup %3157  ;;  %3177 = vpow2.f32 %v1699_v28  ;;  %v1657_v28 = vmul.f32 1.442695, %v1571_v38  ;;  %v1711_v10 = vmul.f32 1.442695, %v1598_v0 }
 0x325   : > { %1875 = vperm.xlu1 %3116, %v4590_v60   ;;  %5667 = vst [vmem:[#allocation30_spill] sm:$0xff] %v4644_v5  ;;  %v4646_v55 = vpop.eup %3159  ;;  %3179 = vpow2.f32 %v1649_v53 }
 0x326   : > { %1821 = vperm.xlu0 %3115, %v4592_v58   ;;  %5668 = vst [vmem:[#allocation47_spill] sm:$0xff] %v4646_v55  ;;  %v4654_v17 = vpop.eup %3161  ;;  %3181 = vpow2.f32 %v1703_v51  ;;  %v1600_v51 = vsub.f32 %v5686_v1, %v4671_v21 }
 0x327   : > { %5671 = vst [vmem:[#allocation32_spill] sm:$0xff] %v4654_v17  ;;  %v4656_v7 = vpop.eup %3163  ;;  %3183 = vpow2.f32 %v1653_v40  ;;  %v1575_v40 = vsub.f32 %v5687_v22, %v4539_v42 }
 0x328   : > { %5672 = vst [vmem:[#allocation49_spill] sm:$0xff] %v4656_v7  ;;  %v4664_v8 = vpop.eup %3165  ;;  %3185 = vpow2.f32 %v1707_v54  ;;  %v1715_v2 = vmul.f32 1.442695, %v1600_v51  ;;  %v5690_v54 = vld [vmem:[#allocation83_spill] sm:$0xff]  ;;  %v5695_v51 = vld [vmem:[#allocation20_spill] sm:$0xff] }
 0x329   : > { %1881 = vperm.xlu1 %3116, %v4600_v18   ;;  %5675 = vst [vmem:[#allocation33_spill] sm:$0xff] %v4664_v8  ;;  %v4666_v34 = vpop.eup %3167  ;;  %3187 = vpow2.f32 %v1657_v28  ;;  %v1602_v0 = vsub.f32 %v5690_v54, %v4671_v21  ;;  %v1665_v19 = vmul.f32 1.442695, %v1575_v40  ;;  %v5691_v28 = vld [vmem:[#allocation58_spill] sm:$0xff]  ;;  %v5696_v54 = vld [vmem:[#allocation60_spill] sm:$0xff] }
 0x32a   : > { %1824 = vperm.xlu0 %3115, %v4602_v29   ;;  %5676 = vst [vmem:[#allocation51_spill] sm:$0xff] %v4666_v34  ;;  %v4678_v12 = vpop.eup %3169  ;;  %3189 = vpow2.f32 %v1711_v10  ;;  %v1577_v14 = vsub.f32 %v5691_v28, %v4539_v42  ;;  %v1579_v28 = vsub.f32 %v5696_v54, %v4539_v42 }
 0x32b   : > { %5680 = vst [vmem:[#allocation34_spill] sm:$0xff] %v4678_v12  ;;  %v4680_v27 = vpop.eup %3171  ;;  %3191 = vpow2.f32 %v1661_v59  ;;  %v1719_v10 = vmul.f32 1.442695, %v1602_v0  ;;  %v1604_v59 = vsub.f32 %v5695_v51, %v4671_v21 }
 0x32c   : > { %5681 = vst [vmem:[#allocation15_spill] sm:$0xff] %v4680_v27  ;;  %v4688_v53 = vpop.eup %3173  ;;  %3193 = vpow2.f32 %v1715_v2  ;;  %v1669_v40 = vmul.f32 1.442695, %v1577_v14  ;;  %v5699_v2 = vld [vmem:[#allocation22_spill] sm:$0xff]  ;;  %v1673_v51 = vmul.f32 1.442695, %v1579_v28 }
 0x32d   : > { %1887 = vperm.xlu1 %3116, %v4610_v61   ;;  %5684 = vst [vmem:[#allocation53_spill] sm:$0xff] %v4688_v53  ;;  %v4690_v52 = vpop.eup %3175  ;;  %3195 = vpow2.f32 %v1665_v19  ;;  %v5700_v19 = vld [vmem:[#allocation62_spill] sm:$0xff] }
 0x32e   : > { %1827 = vperm.xlu0 %3115, %v4612_v48   ;;  %5685 = vst [vmem:[#allocation35_spill] sm:$0xff] %v4690_v52  ;;  %v4698_v30 = vpop.eup %3177  ;;  %3197 = vpow2.f32 %v1719_v10  ;;  %v1581_v14 = vsub.f32 %v5700_v19, %v4583_v63  ;;  %v5703_v10 = vld [vmem:[#allocation24_spill] sm:$0xff] }
 0x32f   : > { %5688 = vst [vmem:[#allocation55_spill] sm:$0xff] %v4698_v30  ;;  %v4700_v38 = vpop.eup %3179  ;;  %3199 = vpow2.f32 %v1669_v40  ;;  %v5704_v40 = vld [vmem:[#allocation64_spill] sm:$0xff] }
 0x330   : > { %5689 = vst [vmem:[#allocation36_spill] sm:$0xff] %v4700_v38  ;;  %v4708_v1 = vpop.eup %3181  ;;  %v1583_v28 = vsub.f32 %v5704_v40, %v4583_v63 }
 0x331   : > { %1893 = vperm.xlu1 %3116, %v4620_v47   ;;  %5692 = vst [vmem:[#allocation57_spill] sm:$0xff] %v4708_v1  ;;  %v4710_v22 = vpop.eup %3183 }
 0x332   : > { %1830 = vperm.xlu0 %3115, %v4622_v36   ;;  %5693 = vst [vmem:[#allocation37_spill] sm:$0xff] %v4710_v22 }
 0x335   : > { %1899 = vperm.xlu1 %3116, %v4634_v37  }
 0x336   : > { %1836 = vperm.xlu0 %3115, %v4636_v3  }
 0x339   : > { %1905 = vperm.xlu1 %3116, %v4644_v5  }
 0x33a   : > { %1839 = vperm.xlu0 %3115, %v4646_v55  }
 0x33d   : > { %1911 = vperm.xlu1 %3116, %v4654_v17  }
 0x33e   : > { %1842 = vperm.xlu0 %3115, %v4656_v7  }
 0x341   : > { %1917 = vperm.xlu1 %3116, %v4664_v8  }
 0x342   : > { %1845 = vperm.xlu0 %3115, %v4666_v34  }
 0x345   : > { %1923 = vperm.xlu1 %3116, %v4678_v12  }
 0x346   : > { %1848 = vperm.xlu0 %3115, %v4680_v27  }
 0x349   : > { %1929 = vperm.xlu1 %3116, %v4688_v53  }
 0x34a   : > { %1854 = vperm.xlu0 %3115, %v4690_v52   ;;  %v5694_v52 = vld [vmem:[#allocation19_spill] sm:$0xff] }
 0x34d   : > { %1935 = vperm.xlu1 %3116, %v4698_v30   ;;  %v4715_v30 = vrot.slane %v4498_v62, %v5694_v52  ;;  %v1723_v62 = vmul.f32 1.442695, %v1604_v59 }
 0x34e   : > { %1860 = vperm.xlu0 %3115, %v4700_v38   ;;  %v4722_v38 = vpop.eup %3185 }
 0x34f   : > { %5697 = vst [vmem:[#allocation59_spill] sm:$0xff] %v4722_v38  ;;  %v4724_v53 = vpop.eup %3187  ;;  %v1606_v0 = vsub.f32 %v5699_v2, %v4715_v30  ;;  %3201 = vpow2.f32 %v1723_v62  ;;  %v1608_v59 = vsub.f32 %v5703_v10, %v4715_v30  ;;  %v1677_v2 = vmul.f32 1.442695, %v1581_v14  ;;  %v5707_v62 = vld [vmem:[#allocation26_spill] sm:$0xff] }
 0x350   : > { %5698 = vst [vmem:[#allocation38_spill] sm:$0xff] %v4724_v53  ;;  %3203 = vpow2.f32 %v1673_v51  ;;  %v1681_v10 = vmul.f32 1.442695, %v1583_v28  ;;  %v5708_v51 = vld [vmem:[#allocation66_spill] sm:$0xff] }
 0x351   : > { %1941 = vperm.xlu1 %3116, %v4708_v1   ;;  %v4732_v1 = vpop.eup %3189  ;;  %v1727_v54 = vmul.f32 1.442695, %v1606_v0  ;;  %v1610_v0 = vsub.f32 %v5707_v62, %v4715_v30  ;;  %v1585_v14 = vsub.f32 %v5708_v51, %v4583_v63 }
 0x352   : > { %1866 = vperm.xlu0 %3115, %v4710_v22   ;;  %5701 = vst [vmem:[#allocation61_spill] sm:$0xff] %v4732_v1  ;;  %v4734_v42 = vpop.eup %3191 }
 0x353   : > { %5702 = vst [vmem:[#allocation40_spill] sm:$0xff] %v4734_v42  ;;  %3205 = vpow2.f32 %v1727_v54  ;;  %v5711_v54 = vld [vmem:[#allocation28_spill] sm:$0xff]  ;;  %v1685_v62 = vmul.f32 1.442695, %v1585_v14 }
 0x354   : > { %3207 = vpow2.f32 %v1677_v2  ;;  %v5712_v2 = vld [vmem:[#allocation68_spill] sm:$0xff] }
 0x355   : > { %1947 = vperm.xlu1 %3116, %v4722_v38   ;;  %v4742_v38 = vpop.eup %3193  ;;  %v1587_v28 = vsub.f32 %v5712_v2, %v4583_v63  ;;  %v5718_v2 = vld [vmem:[#allocation72_spill] sm:$0xff] }
 0x356   : > { %1872 = vperm.xlu0 %3115, %v4724_v53   ;;  %5705 = vst [vmem:[#allocation63_spill] sm:$0xff] %v4742_v38  ;;  %v4744_v19 = vpop.eup %3195 }
 0x357   : > { %5706 = vst [vmem:[#allocation41_spill] sm:$0xff] %v4744_v19  ;;  %v4752_v53 = vpop.eup %3197 }
 0x358   : > { %5709 = vst [vmem:[#allocation65_spill] sm:$0xff] %v4752_v53  ;;  %v4754_v40 = vpop.eup %3199 }
 0x359   : > { %1953 = vperm.xlu1 %3116, %v4732_v1   ;;  %5710 = vst [vmem:[#allocation42_spill] sm:$0xff] %v4754_v40 }
 0x35a   : > { %1878 = vperm.xlu0 %3115, %v4734_v42   ;;  %v1731_v42 = vmul.f32 1.442695, %v1608_v59  ;;  %v1612_v59 = vsub.f32 %v5711_v54, %v4715_v30 }
 0x35c   : > { %3209 = vpow2.f32 %v1731_v42  ;;  %v1689_v42 = vmul.f32 1.442695, %v1587_v28 }
 0x35d   : > { %1959 = vperm.xlu1 %3116, %v4742_v38   ;;  %v1735_v38 = vmul.f32 1.442695, %v1610_v0  ;;  %3211 = vpow2.f32 %v1681_v10  ;;  %v5715_v0 = vld [vmem:[#allocation70_spill] sm:$0xff] }
 0x35e   : > { %1884 = vperm.xlu0 %3115, %v4744_v19   ;;  %v4762_v19 = vpop.eup %3201  ;;  %v1589_v54 = vsub.f32 %v5715_v0, %v4627_v9  ;;  %v5721_v0 = vld [vmem:[#allocation74_spill] sm:$0xff] }
 0x35f   : > { %5713 = vst [vmem:[#allocation67_spill] sm:$0xff] %v4762_v19  ;;  %v4764_v51 = vpop.eup %3203  ;;  %3213 = vpow2.f32 %v1735_v38  ;;  %v1591_v38 = vsub.f32 %v5718_v2, %v4627_v9 }
 0x360   : > { %5714 = vst [vmem:[#allocation43_spill] sm:$0xff] %v4764_v51  ;;  %3215 = vpow2.f32 %v1685_v62  ;;  %v4770_v10 = vpop.eup %3205  ;;  %v1693_v63 = vmul.f32 1.442695, %v1589_v54  ;;  %v5724_v54 = vld [vmem:[#allocation76_spill] sm:$0xff] }
 0x361   : > { %1965 = vperm.xlu1 %3116, %v4752_v53   ;;  %v1739_v53 = vmul.f32 1.442695, %v1612_v59  ;;  %5716 = vst [vmem:[#allocation69_spill] sm:$0xff] %v4770_v10  ;;  %v4772_v14 = vpop.eup %3207  ;;  %v1697_v28 = vmul.f32 1.442695, %v1591_v38  ;;  %v1595_v2 = vsub.f32 %v5724_v54, %v4627_v9 }
 0x362   : > { %1890 = vperm.xlu0 %3115, %v4754_v40   ;;  %5717 = vst [vmem:[#allocation44_spill] sm:$0xff] %v4772_v14 }
 0x363   : > { %3217 = vpow2.f32 %v1739_v53  ;;  %v1705_v38 = vmul.f32 1.442695, %v1595_v2 }
 0x364   : > { %3219 = vpow2.f32 %v1689_v42 }
 0x365   : > { %1971 = vperm.xlu1 %3116, %v4762_v19   ;;  %3221 = vpow2.f32 %v1693_v63  ;;  %v1593_v19 = vsub.f32 %v5721_v0, %v4627_v9  ;;  %v5727_v0 = vld [vmem:[#allocation78_spill] sm:$0xff]  ;;  %v5729_v9 = vld [vmem:[#allocation80_spill] sm:$0xff] }
 0x366   : > { %1896 = vperm.xlu0 %3115, %v4764_v51   ;;  %v4778_v59 = vpop.eup %3209  ;;  %3223 = vpow2.f32 %v1697_v28  ;;  %v1599_v28 = vsub.f32 %v5729_v9, %v4671_v21 }
 0x367   : > { %5719 = vst [vmem:[#allocation71_spill] sm:$0xff] %v4778_v59  ;;  %v4780_v62 = vpop.eup %3211  ;;  %v1701_v42 = vmul.f32 1.442695, %v1593_v19 }
 0x368   : > { %5720 = vst [vmem:[#allocation46_spill] sm:$0xff] %v4780_v62 }
 0x369   : > { %1977 = vperm.xlu1 %3116, %v4770_v10   ;;  %v4786_v10 = vpop.eup %3213  ;;  %3225 = vpow2.f32 %v1701_v42  ;;  %v5731_v42 = vld [vmem:[#allocation82_spill] sm:$0xff] }
 0x36a   : > { %1902 = vperm.xlu0 %3115, %v4772_v14   ;;  %5722 = vst [vmem:[#allocation73_spill] sm:$0xff] %v4786_v10  ;;  %v4788_v53 = vpop.eup %3215  ;;  %3227 = vpow2.f32 %v1705_v38  ;;  %v1601_v2 = vsub.f32 %v5731_v42, %v4671_v21 }
 0x36b   : > { %5723 = vst [vmem:[#allocation48_spill] sm:$0xff] %v4788_v53 }
 0x36d   : > { %1983 = vperm.xlu1 %3116, %v4778_v59   ;;  %v4794_v59 = vpop.eup %3217 }
 0x36e   : > { %1908 = vperm.xlu0 %3115, %v4780_v62   ;;  %5725 = vst [vmem:[#allocation75_spill] sm:$0xff] %v4794_v59  ;;  %v4796_v63 = vpop.eup %3219 }
 0x36f   : > { %5726 = vst [vmem:[#allocation50_spill] sm:$0xff] %v4796_v63  ;;  %v4802_v62 = vpop.eup %3221 }
 0x370   : > { %5728 = vst [vmem:[#allocation77_spill] sm:$0xff] %v4802_v62  ;;  %v4807_v54 = vpop.eup %3223 }
 0x371   : > { %1989 = vperm.xlu1 %3116, %v4786_v10   ;;  %v1597_v10 = vsub.f32 %v5727_v0, %v4671_v21  ;;  %5730 = vst [vmem:[#allocation52_spill] sm:$0xff] %v4807_v54  ;;  %v1717_v0 = vmul.f32 1.442695, %v1601_v2 }
 0x372   : > { %1914 = vperm.xlu0 %3115, %v4788_v53  }
 0x373   : > { %v1709_v19 = vmul.f32 1.442695, %v1597_v10  ;;  %v5733_v10 = vld [vmem:[#allocation21_spill] sm:$0xff] }
 0x374   : > { %v1603_v38 = vsub.f32 %v5733_v10, %v4671_v21 }
 0x375   : > { %1995 = vperm.xlu1 %3116, %v4794_v59   ;;  %3229 = vpow2.f32 %v1709_v19  ;;  %v4812_v59 = vpop.eup %3225  ;;  %v5735_v19 = vld [vmem:[#allocation23_spill] sm:$0xff] }
 0x376   : > { %1920 = vperm.xlu0 %3115, %v4796_v63   ;;  %v1713_v63 = vmul.f32 1.442695, %v1599_v28  ;;  %5732 = vst [vmem:[#allocation79_spill] sm:$0xff] %v4812_v59  ;;  %v1721_v9 = vmul.f32 1.442695, %v1603_v38  ;;  %v1605_v28 = vsub.f32 %v5735_v19, %v4715_v30 }
 0x378   : > { %3231 = vpow2.f32 %v1713_v63  ;;  %v1725_v42 = vmul.f32 1.442695, %v1605_v28  ;;  %v5737_v63 = vld [vmem:[#allocation25_spill] sm:$0xff] }
 0x379   : > { %3233 = vpow2.f32 %v1717_v0  ;;  %v1607_v2 = vsub.f32 %v5737_v63, %v4715_v30  ;;  %v5739_v0 = vld [vmem:[#allocation27_spill] sm:$0xff]  ;;  %v5741_v28 = vld [vmem:[#allocation29_spill] sm:$0xff] }
 0x37a   : > { %1926 = vperm.xlu0 %3115, %v4802_v62   ;;  %v4817_v62 = vpop.eup %3227  ;;  %3235 = vpow2.f32 %v1721_v9  ;;  %v1609_v10 = vsub.f32 %v5739_v0, %v4715_v30  ;;  %v1611_v63 = vsub.f32 %v5741_v28, %v4715_v30 }
 0x37b   : > { %5734 = vst [vmem:[#allocation54_spill] sm:$0xff] %v4817_v62  ;;  %3237 = vpow2.f32 %v1725_v42  ;;  %v1729_v21 = vmul.f32 1.442695, %v1607_v2 }
 0x37c   : > { %v1733_v9 = vmul.f32 1.442695, %v1609_v10  ;;  %v1737_v0 = vmul.f32 1.442695, %v1611_v63 }
 0x37d   : > { %3239 = vpow2.f32 %v1729_v21 }
 0x37e   : > { %1932 = vperm.xlu0 %3115, %v4807_v54   ;;  %3241 = vpow2.f32 %v1733_v9 }
 0x37f   : > { %v4822_v54 = vpop.eup %3229  ;;  %3243 = vpow2.f32 %v1737_v0 }
 0x380   : > { %5736 = vst [vmem:[#allocation81_spill] sm:$0xff] %v4822_v54 }
 0x382   : > { %1938 = vperm.xlu0 %3115, %v4812_v59   ;;  %v4827_v53 = vpop.eup %3231 }
 0x383   : > { %5738 = vst [vmem:[#allocation56_spill] sm:$0xff] %v4827_v53  ;;  %v4834_v19 = vpop.eup %3233 }
 0x384   : > { %5740 = vst [vmem:[#allocation83_spill] sm:$0xff] %v4834_v19  ;;  %v4843_v42 = vpop.eup %3235 }
 0x385   : > { %5742 = vst [vmem:[#allocation58_spill] sm:$0xff] %v4843_v42 }
 0x386   : > { %1944 = vperm.xlu0 %3115, %v4817_v62   ;;  %v4848_v62 = vpop.eup %3237 }
 0x387   : > { %5743 = vst [vmem:[#allocation20_spill] sm:$0xff] %v4848_v62  ;;  %v4853_v21 = vpop.eup %3239 }
 0x388   : > { %5744 = vst [vmem:[#allocation60_spill] sm:$0xff] %v4853_v21  ;;  %v4858_v28 = vpop.eup %3241 }
 0x389   : > { %5745 = vst [vmem:[#allocation22_spill] sm:$0xff] %v4858_v28  ;;  %v4863_v9 = vpop.eup %3243 }
 0x38a   : > { %1950 = vperm.xlu0 %3115, %v4822_v54   ;;  %5746 = vst [vmem:[#allocation62_spill] sm:$0xff] %v4863_v9 }
 0x38e   : > { %1956 = vperm.xlu0 %3115, %v4827_v53  }
 0x390   : > { %v4832_v38 = vpop.permute.xlu1 %1833 }
 0x391   : > { %v4836_v14 = vpop.permute.xlu0 %1806 }
 0x392   : > { %1962 = vperm.xlu0 %3115, %v4834_v19  }
 0x394   : > { %v4841_v54 = vpop.permute.xlu1 %1851 }
 0x395   : > { %v4845_v2 = vpop.permute.xlu0 %1809 }
 0x396   : > { %1968 = vperm.xlu0 %3115, %v4843_v42  }
 0x398   : > { %v1858_v40 = vpop.permute.xlu1 %1857 }
 0x399   : > { %v4850_v51 = vpop.permute.xlu0 %1812  ;;  %v2082_v7 = vrot.slane %v1858_v40, %v4278_v43 }
 0x39a   : > { %1974 = vperm.xlu0 %3115, %v4848_v62  }
 0x39c   : > { %v1864_v10 = vpop.permute.xlu1 %1863 }
 0x39d   : > { %v4855_v30 = vpop.permute.xlu0 %1815  ;;  %v2092_v25 = vrot.slane %v1864_v10, %v4293_v13 }
 0x39e   : > { %1980 = vperm.xlu0 %3115, %v4853_v21  }
 0x3a0   : > { %v1870_v19 = vpop.permute.xlu1 %1869 }
 0x3a1   : > { %v4860_v42 = vpop.permute.xlu0 %1818  ;;  %v2102_v40 = vrot.slane %v1870_v19, %v4315_v56 }
 0x3a2   : > { %1986 = vperm.xlu0 %3115, %v4858_v28  }
 0x3a4   : > { %v4870_v59 = vpop.permute.xlu1 %1875 }
 0x3a5   : > { %v4865_v63 = vpop.permute.xlu0 %1821 }
 0x3a6   : > { %1992 = vperm.xlu0 %3115, %v4863_v9  }
 0x3a8   : > { %v1882_v22 = vpop.permute.xlu1 %1881 }
 0x3a9   : > { %v4868_v0 = vpop.permute.xlu0 %1824  ;;  %v2121_v10 = vrot.slane %v1882_v22, %v4278_v43  ;;  %v2014_v22 = vrot.slane %v4855_v30, %v4293_v13 }
 0x3ac   : > { %v4874_v1 = vpop.permute.xlu1 %1887 }
 0x3ad   : > { %v4872_v53 = vpop.permute.xlu0 %1827 }
 0x3b0   : > { %v4876_v33 = vpop.permute.xlu1 %1893 }
 0x3b1   : > { %v1831_v21 = vpop.permute.xlu0 %1830 }
 0x3b4   : > { %v4878_v12 = vpop.permute.xlu1 %1899 }
 0x3b5   : > { %v1837_v62 = vpop.permute.xlu0 %1836 }
 0x3b8   : > { %v4880_v34 = vpop.permute.xlu1 %1905 }
 0x3b9   : > { %v1840_v52 = vpop.permute.xlu0 %1839 }
 0x3bc   : > { %v4886_v3 = vpop.permute.xlu1 %1911 }
 0x3bd   : > { %v1843_v28 = vpop.permute.xlu0 %1842 }
 0x3c0   : > { %v4894_v29 = vpop.permute.xlu1 %1917 }
 0x3c1   : > { %v1846_v27 = vpop.permute.xlu0 %1845 }
 0x3c4   : > { %v4906_v19 = vpop.permute.xlu1 %1923 }
 0x3c5   : > { %v1849_v26 = vpop.permute.xlu0 %1848 }
 0x3c9   : > { %v1855_v9 = vpop.permute.xlu0 %1854 }
 0x3ca   : > { %v2078_v8 = vrot.slane %v1855_v9, %v4286_v23 }
 0x3cc   : > { %v2083_v5 = vsel %vm1172_vm0, %v2082_v7, %v2078_v8 }
 0x3cd   : > { %v1861_v17 = vpop.permute.xlu0 %1860 }
 0x3ce   : > { %v2087_v55 = vrot.slane %v1861_v17, %v4281_v41 }
 0x3d0   : > { %v2088_v37 = vsel %vm1179_vm1, %v2087_v55, %v2083_v5  ;;  %v2039_v55 = vrot.slane %v1831_v21, %v4286_v23 }
 0x3d1   : > { %v1867_v46 = vpop.permute.xlu0 %1866  ;;  %v2093_v48 = vsel %vm1186_vm2, %v2092_v25, %v2088_v37  ;;  %v2043_v25 = vrot.slane %v4832_v38, %v4278_v43  ;;  %v2058_v37 = vrot.slane %v1843_v28, %v4302_v31  ;;  %v2009_v38 = vrot.slane %v4850_v51, %v4281_v41 }
 0x3d2   : > { %v2097_v47 = vrot.slane %v1867_v46, %v4302_v31  ;;  %v2048_v46 = vrot.slane %v1837_v62, %v4281_v41  ;;  %v2063_v62 = vrot.slane %v1846_v27, %v4315_v56 }
 0x3d3   : > { %v2044_v21 = vsel %vm1172_vm0, %v2043_v25, %v2039_v55 }
 0x3d4   : > { %v2098_v9 = vsel %vm1193_vm3, %v2097_v47, %v2093_v48  ;;  %v2053_v48 = vrot.slane %v1840_v52, %v4293_v13  ;;  %v2049_v52 = vsel %vm1179_vm1, %v2048_v46, %v2044_v21 }
 0x3d5   : > { %v1873_v61 = vpop.permute.xlu0 %1872  ;;  %v2103_v7 = vsel %vm1200_vm4, %v2102_v40, %v2098_v9  ;;  %v2068_v40 = vrot.slane %v1849_v26, %v4339_v15 }
 0x3d6   : > { %v2107_v17 = vrot.slane %v1873_v61, %v4339_v15  ;;  %v2004_v61 = vrot.slane %v4845_v2, %v4278_v43  ;;  %v2054_v2 = vsel %vm1186_vm2, %v2053_v48, %v2049_v52 }
 0x3d7   : > { %v2059_v51 = vsel %vm1193_vm3, %v2058_v37, %v2054_v2 }
 0x3d8   : > { %v2108_v5 = vsel %vm1207_vm5, %v2107_v17, %v2103_v7  ;;  %v2000_v17 = vrot.slane %v4836_v14, %v4286_v23  ;;  %v2019_v7 = vrot.slane %v4860_v42, %v4302_v31  ;;  %v2131_v14 = vrot.slane %v4874_v1, %v4293_v13 }
 0x3d9   : > { %v1879_v8 = vpop.permute.xlu0 %1878  ;;  %v2064_v30 = vsel %vm1200_vm4, %v2063_v62, %v2059_v51  ;;  %v2029_v42 = vrot.slane %v4868_v0, %v4339_v15  ;;  %v2034_v1 = vrot.slane %v4872_v53, %v4347_v44  ;;  %v2112_v0 = vrot.slane %v4870_v59, %v4347_v44 }
 0x3da   : > { %v2117_v47 = vrot.slane %v1879_v8, %v4286_v23  ;;  %v2005_v26 = vsel %vm1172_vm0, %v2004_v61, %v2000_v17  ;;  %v2024_v8 = vrot.slane %v4865_v63, %v4315_v56  ;;  %v2069_v48 = vsel %vm1207_vm5, %v2068_v40, %v2064_v30 }
 0x3db   : > { %v2010_v25 = vsel %vm1179_vm1, %v2009_v38, %v2005_v26  ;;  %v2073_v61 = vrot.slane %v4841_v54, %v4347_v44  ;;  %v2141_v38 = vrot.slane %v4876_v33, %v4315_v56  ;;  %v2113_v53 = vsel %vm1214_vm6, %v2112_v0, %v2108_v5 }
 0x3dc   : > { %v2122_v27 = vsel %vm1172_vm0, %v2121_v10, %v2117_v47  ;;  %v1930_v47 = vpop.permute.xlu1 %1929  ;;  %v2015_v63 = vsel %vm1186_vm2, %v2014_v22, %v2010_v25  ;;  %v2151_v59 = vrot.slane %v4878_v12, %v4347_v44 }
 0x3dd   : > { %v1885_v9 = vpop.permute.xlu0 %1884  ;;  %v2020_v21 = vsel %vm1193_vm3, %v2019_v7, %v2015_v63  ;;  %v2074_v54 = vsel %vm1214_vm6, %v2073_v61, %v2069_v48 }
 0x3de   : > { %v2126_v28 = vrot.slane %v1885_v9, %v4281_v41  ;;  %v2025_v9 = vsel %vm1200_vm4, %v2024_v8, %v2020_v21 }
 0x3df   : > { %v2030_v40 = vsel %vm1207_vm5, %v2029_v42, %v2025_v9 }
 0x3e0   : > { %v2127_v55 = vsel %vm1179_vm1, %v2126_v28, %v2122_v27  ;;  %v2035_v17 = vsel %vm1214_vm6, %v2034_v1, %v2030_v40  ;;  %v1936_v27 = vpop.permute.xlu1 %1935  ;;  %v2160_v40 = vrot.slane %v4880_v34, %v4278_v43 }
 0x3e1   : > { %v1891_v46 = vpop.permute.xlu0 %1890  ;;  %v2132_v10 = vsel %vm1186_vm2, %v2131_v14, %v2127_v55  ;;  %v2309_v2 = vsel %vm1489_vm7, %v2074_v54, %v2035_v17  ;;  %v2199_v17 = vrot.slane %v1930_v47, %v4278_v43 }
 0x3e2   : > { %v2136_v37 = vrot.slane %v1891_v46, %v4302_v31  ;;  %v2310_v7 = vsel %vm1491_vm8, %v2113_v53, %v2309_v2 }
 0x3e4   : > { %v2137_v62 = vsel %vm1193_vm3, %v2136_v37, %v2132_v10  ;;  %v4967_v8 = vpop.permute.xlu1 %1941 }
 0x3e5   : > { %v1897_v52 = vpop.permute.xlu0 %1896  ;;  %v2142_v22 = vsel %vm1200_vm4, %v2141_v38, %v2137_v62 }
 0x3e6   : > { %v2146_v28 = vrot.slane %v1897_v52, %v4339_v15 }
 0x3e8   : > { %v2147_v33 = vsel %vm1207_vm5, %v2146_v28, %v2142_v22  ;;  %v4969_v12 = vpop.permute.xlu1 %1947 }
 0x3e9   : > { %v2152_v51 = vsel %vm1214_vm6, %v2151_v59, %v2147_v33  ;;  %v1903_v55 = vpop.permute.xlu0 %1902 }
 0x3ea   : > { %v4965_v5 = vsel %vm1493_vm9, %v2152_v51, %v2310_v7  ;;  %v2156_v9 = vrot.slane %v1903_v55, %v4286_v23 }
 0x3ec   : > { %v1954_v25 = vpop.permute.xlu1 %1953  ;;  %v2161_v2 = vsel %vm1172_vm0, %v2160_v40, %v2156_v9  ;;  %v2180_v9 = vrot.slane %v4894_v29, %v4315_v56 }
 0x3ed   : > { %v1909_v26 = vpop.permute.xlu0 %1908  ;;  %v2238_v22 = vrot.slane %v1954_v25, %v4278_v43  ;;  %v2209_v25 = vrot.slane %v1936_v27, %v4293_v13 }
 0x3ee   : > { %v2165_v38 = vrot.slane %v1909_v26, %v4281_v41  ;;  %v2170_v26 = vrot.slane %v4886_v3, %v4293_v13 }
 0x3f0   : > { %v1960_v48 = vpop.permute.xlu1 %1959  ;;  %v2166_v7 = vsel %vm1179_vm1, %v2165_v38, %v2161_v2 }
 0x3f1   : > { %v1915_v14 = vpop.permute.xlu0 %1914  ;;  %v2248_v38 = vrot.slane %v1960_v48, %v4293_v13  ;;  %v2171_v3 = vsel %vm1186_vm2, %v2170_v26, %v2166_v7 }
 0x3f2   : > { %v2175_v51 = vrot.slane %v1915_v14, %v4302_v31 }
 0x3f4   : > { %v1966_v63 = vpop.permute.xlu1 %1965 }
 0x3f5   : > { %v1921_v30 = vpop.permute.xlu0 %1920 }
 0x3f6   : > { %v2185_v40 = vrot.slane %v1921_v30, %v4339_v15 }
 0x3f8   : > { %v4971_v10 = vpop.permute.xlu1 %1971 }
 0x3f9   : > { %v1927_v46 = vpop.permute.xlu0 %1926 }
 0x3fa   : > { %v2195_v54 = vrot.slane %v1927_v46, %v4286_v23 }
 0x3fc   : > { %v1978_v62 = vpop.permute.xlu1 %1977  ;;  %v2200_v55 = vsel %vm1172_vm0, %v2199_v17, %v2195_v54  ;;  %v2219_v17 = vrot.slane %v4967_v8, %v4315_v56  ;;  %v2190_v8 = vrot.slane %v4906_v19, %v4347_v44 }
 0x3fd   : > { %v1933_v42 = vpop.permute.xlu0 %1932  ;;  %v2277_v54 = vrot.slane %v1978_v62, %v4278_v43 }
 0x3fe   : > { %v2204_v53 = vrot.slane %v1933_v42, %v4281_v41 }
 0x400   : > { %v1984_v33 = vpop.permute.xlu1 %1983  ;;  %v2205_v46 = vsel %vm1179_vm1, %v2204_v53, %v2200_v55 }
 0x401   : > { %v1939_v37 = vpop.permute.xlu0 %1938  ;;  %v2210_v27 = vsel %vm1186_vm2, %v2209_v25, %v2205_v46 }
 0x402   : > { %v2214_v47 = vrot.slane %v1939_v37, %v4302_v31  ;;  %v2176_v37 = vsel %vm1193_vm3, %v2175_v51, %v2171_v3 }
 0x405   : > { %v1945_v61 = vpop.permute.xlu0 %1944 }
 0x409   : > { %v1951_v1 = vpop.permute.xlu0 %1950 }
 0x40a   : > { %v2234_v28 = vrot.slane %v1951_v1, %v4286_v23 }
 0x40c   : > { %v2239_v42 = vsel %vm1172_vm0, %v2238_v22, %v2234_v28  ;;  %v1990_v28 = vpop.permute.xlu1 %1989  ;;  %v2181_v22 = vsel %vm1200_vm4, %v2180_v9, %v2176_v37 }
 0x40d   : > { %v1957_v21 = vpop.permute.xlu0 %1956  ;;  %v2186_v7 = vsel %vm1207_vm5, %v2185_v40, %v2181_v22  ;;  %v5752_v22 = vld [vmem:[#allocation16_spill] sm:$0xff] }
 0x40e   : > { %v2243_v59 = vrot.slane %v1957_v21, %v4281_v41 }
 0x410   : > { %v2244_v1 = vsel %vm1179_vm1, %v2243_v59, %v2239_v42  ;;  %v2258_v59 = vrot.slane %v1966_v63, %v4315_v56  ;;  %v1996_v46 = vpop.permute.xlu1 %1995  ;;  %v2297_v42 = vrot.slane %v1990_v28, %v4315_v56 }
 0x411   : > { %v1963_v0 = vpop.permute.xlu0 %1962  ;;  %v2249_v29 = vsel %vm1186_vm2, %v2248_v38, %v2244_v1 }
 0x412   : > { %v2253_v21 = vrot.slane %v1963_v0, %v4302_v31  ;;  %v2215_v0 = vsel %vm1193_vm3, %v2214_v47, %v2210_v27  ;;  %v2191_v47 = vsel %vm1214_vm6, %v2190_v8, %v2186_v7  ;;  %v5754_v7 = vld [vmem:[#allocation45_spill] sm:$0xff] }
 0x414   : > { %v2254_v43 = vsel %vm1193_vm3, %v2253_v21, %v2249_v29  ;;  %v2307_v21 = vrot.slane %v1996_v46, %v4347_v44 }
 0x415   : > { %v1969_v52 = vpop.permute.xlu0 %1968  ;;  %v2259_v55 = vsel %vm1200_vm4, %v2258_v59, %v2254_v43 }
 0x416   : > { %v2263_v62 = vrot.slane %v1969_v52, %v4339_v15 }
 0x418   : > { %v2264_v26 = vsel %vm1207_vm5, %v2263_v62, %v2259_v55  ;;  %v5749_v62 = vld [vmem:[#allocation14_spill] sm:$0xff] }
 0x419   : > { %v1975_v34 = vpop.permute.xlu0 %1974 }
 0x41a   : > { %v2273_v14 = vrot.slane %v1975_v34, %v4286_v23  ;;  %v2224_v23 = vrot.slane %v1945_v61, %v4339_v15  ;;  %v2287_v61 = vrot.slane %v1984_v33, %v4293_v13  ;;  %v2229_v34 = vrot.slane %v4969_v12, %v4347_v44 }
 0x41b   : > { %v2268_v33 = vrot.slane %v4971_v10, %v4347_v44  ;;  %v2312_v10 = vsel %vm1495_vm10, %v2191_v47, %v4965_v5  ;;  %v5760_v47 = vld [vmem:[#allocation51_spill] sm:$0xff] }
 0x41c   : > { %v2278_v30 = vsel %vm1172_vm0, %v2277_v54, %v2273_v14 }
 0x41d   : > { %v1981_v53 = vpop.permute.xlu0 %1980  ;;  %v2269_v12 = vsel %vm1214_vm6, %v2268_v33, %v2264_v26  ;;  %v5758_v26 = vld [vmem:[#allocation49_spill] sm:$0xff] }
 0x41e   : > { %v2282_v48 = vrot.slane %v1981_v53, %v4281_v41  ;;  %v2220_v41 = vsel %vm1200_vm4, %v2219_v17, %v2215_v0  ;;  %v5759_v33 = vld [vmem:[#allocation33_spill] sm:$0xff] }
 0x41f   : > { %v2225_v52 = vsel %vm1207_vm5, %v2224_v23, %v2220_v41 }
 0x420   : > { %v2283_v2 = vsel %vm1179_vm1, %v2282_v48, %v2278_v30  ;;  %v2230_v25 = vsel %vm1214_vm6, %v2229_v34, %v2225_v52  ;;  %v5756_v52 = vld [vmem:[#allocation47_spill] sm:$0xff] }
 0x421   : > { %v1987_v51 = vpop.permute.xlu0 %1986  ;;  %v2288_v13 = vsel %vm1186_vm2, %v2287_v61, %v2283_v2  ;;  %v2313_v38 = vsel %vm1497_vm11, %v2230_v25, %v2312_v10  ;;  %v5753_v2 = vld [vmem:[#allocation31_spill] sm:$0xff] }
 0x422   : > { %v2292_v63 = vrot.slane %v1987_v51, %v4302_v31  ;;  %v2314_v3 = vsel %vm1499_vm12, %v2269_v12, %v2313_v38  ;;  %v5755_v51 = vld [vmem:[#allocation30_spill] sm:$0xff]  ;;  %v5763_v12 = vld [vmem:[#allocation15_spill] sm:$0xff] }
 0x424   : > { %v2293_v19 = vsel %vm1193_vm3, %v2292_v63, %v2288_v13  ;;  %v5757_v63 = vld [vmem:[#allocation32_spill] sm:$0xff] }
 0x425   : > { %v1993_v31 = vpop.permute.xlu0 %1992  ;;  %v2298_v14 = vsel %vm1200_vm4, %v2297_v42, %v2293_v19  ;;  %v5761_v42 = vld [vmem:[#allocation17_spill] sm:$0xff] }
 0x426   : > { %v2302_v1 = vrot.slane %v1993_v31, %v4339_v15  ;;  %v5762_v31 = vld [vmem:[#allocation34_spill] sm:$0xff] }
 0x428   : > { %v2303_v9 = vsel %vm1207_vm5, %v2302_v1, %v2298_v14  ;;  %v5764_v14 = vld [vmem:[#allocation18_spill] sm:$0xff] }
 0x429   : > { %v2308_v56 = vsel %vm1214_vm6, %v2307_v21, %v2303_v9  ;;  %v5765_v9 = vld [vmem:[#allocation53_spill] sm:$0xff] }
 0x42a   : > { %v2315_v54 = vsel %vm1501_vm13, %v2308_v56, %v2314_v3  ;;  %v5766_v56 = vld [vmem:[#allocation35_spill] sm:$0xff] }
 0x42b   : > { %v2317_v15 = vsel %vm1504_vm14, %v2315_v54, 0.0  ;;  %v5767_v54 = vld [vmem:[#allocation19_spill] sm:$0xff] }
 0x42c   : > { %2318 = vadd.xlane.f32.xlu0 %v2317_v15 }
 0x4b9   : > { %v2319_v37 = vpop.xlane.xlu0 %2318 }
 0x4ba   : > { %3245 = vrcp.f32 %v2319_v37 }
 0x4c4   : > { %v3246_v44 = vpop.eup %3245 }
 0x4c5   : > { %v2321_v40 = vmul.f32 %v3246_v44, %v2319_v37  ;;  %v5768_v37 = vld [vmem:[#allocation61_spill] sm:$0xff] }
 0x4c7   : > { %v2322_v27 = vsub.f32 2.0, %v2321_v40  ;;  %v5769_v40 = vld [vmem:[#allocation36_spill] sm:$0xff] }
 0x4c9   : > { %v5046_v53 = vmul.f32 %v3246_v44, %v2322_v27 }
 0x4cb   : > { %v2328_v5 = vrot.slane %v5046_v53, %v5624_v24  ;;  %v2332_v28 = vrot.slane %v5046_v53, %v5625_v45  ;;  %v5056_v29 = vrot.slane %v5046_v53, %v5626_v32  ;;  %v5103_v25 = vrot.slane %v5046_v53, %v5761_v42 }
 0x4cc   : > { %v5110_v10 = vrot.slane %v5046_v53, %v5764_v14  ;;  %v5118_v15 = vrot.slane %v5046_v53, %v5767_v54  ;;  %v5797_v54 = vld [vmem:[#allocation57_spill] sm:$0xff] }
 0x4cd   : > { %v2373_v0 = vmul.f32 %v4622_v36, %v2332_v28  ;;  %v2365_v23 = vmul.f32 %v4534_v35, %v2328_v5  ;;  %v2380_v48 = vmul.f32 %v4546_v6, %v2332_v28  ;;  %v2366_v17 = vmul.f32 %v4548_v57, %v2328_v5 }
 0x4ce   : > { %v2382_v24 = vmul.f32 %v4556_v16, %v5056_v29  ;;  %v2367_v45 = vmul.f32 %v4558_v50, %v2328_v5  ;;  %v2384_v35 = vmul.f32 %v4566_v20, %v5056_v29  ;;  %v2368_v36 = vmul.f32 %v4568_v11, %v2328_v5  ;;  %v5747_v11 = vld [vmem:[#allocation12_spill] sm:$0xff] }
 0x4cf   : > { %2471 = vperm.xlu0 %3115, %v2373_v0   ;;  %2431 = vperm.xlu1 %3116, %v2365_v23   ;;  %v2386_v32 = vmul.f32 %v4576_v49, %v5056_v29  ;;  %v2369_v6 = vmul.f32 %v4578_v39, %v2328_v5  ;;  %v5071_v57 = vrot.slane %v5046_v53, %v5638_v4  ;;  %v5748_v39 = vld [vmem:[#allocation13_spill] sm:$0xff] }
 0x4d0   : > { %v2388_v16 = vmul.f32 %v4590_v60, %v5056_v29  ;;  %v2370_v50 = vmul.f32 %v4592_v58, %v2328_v5  ;;  %v2371_v49 = vmul.f32 %v5747_v11, %v2328_v5  ;;  %v2372_v4 = vmul.f32 %v5749_v62, %v2328_v5  ;;  %v5750_v60 = vld [vmem:[#allocation39_spill] sm:$0xff]  ;;  %v5770_v5 = vld [vmem:[#allocation20_spill] sm:$0xff]  ;;  %v5771_v0 = vld [vmem:[#allocation37_spill] sm:$0xff] }
 0x4d1   : > { %v2390_v20 = vmul.f32 %v4600_v18, %v5071_v57  ;;  %v2392_v43 = vmul.f32 %v5748_v39, %v5071_v57  ;;  %v2394_v30 = vmul.f32 %v5750_v60, %v5071_v57  ;;  %v5751_v58 = vld [vmem:[#allocation11_spill] sm:$0xff]  ;;  %v5087_v18 = vrot.slane %v5046_v53, %v5752_v22 }
 0x4d2   : > { %v2374_v59 = vmul.f32 %v5751_v58, %v2332_v28  ;;  %v2396_v61 = vmul.f32 %v5753_v2, %v5071_v57  ;;  %v2375_v41 = vmul.f32 %v5754_v7, %v2332_v28  ;;  %v2376_v55 = vmul.f32 %v5756_v52, %v2332_v28  ;;  %v5784_v2 = vld [vmem:[#allocation58_spill] sm:$0xff] }
 0x4d3   : > { %2506 = vperm.xlu0 %3115, %v2380_v48   ;;  %2436 = vperm.xlu1 %3116, %v2366_v17   ;;  %v2398_v8 = vmul.f32 %v5755_v51, %v5087_v18  ;;  %v2400_v34 = vmul.f32 %v5757_v63, %v5087_v18  ;;  %v2377_v13 = vmul.f32 %v5758_v26, %v2332_v28  ;;  %v5772_v48 = vld [vmem:[#allocation56_spill] sm:$0xff]  ;;  %v5773_v17 = vld [vmem:[#allocation38_spill] sm:$0xff] }
 0x4d4   : > { %v2402_v46 = vmul.f32 %v5759_v33, %v5087_v18  ;;  %v2378_v19 = vmul.f32 %v5760_v47, %v2332_v28  ;;  %v2404_v1 = vmul.f32 %v5762_v31, %v5087_v18  ;;  %v2379_v21 = vmul.f32 %v5763_v12, %v2332_v28  ;;  %v5785_v7 = vld [vmem:[#allocation46_spill] sm:$0xff]  ;;  %v5793_v31 = vld [vmem:[#allocation69_spill] sm:$0xff] }
 0x4d5   : > { %v2406_v38 = vmul.f32 %v5765_v9, %v5103_v25  ;;  %v2381_v3 = vmul.f32 %v5766_v56, %v5056_v29  ;;  %v2414_v44 = vmul.f32 %v5768_v37, %v5110_v10  ;;  %v2383_v27 = vmul.f32 %v5769_v40, %v5056_v29  ;;  %v5796_v9 = vld [vmem:[#allocation71_spill] sm:$0xff] }
 0x4d6   : > { %v2421_v28 = vmul.f32 %v5770_v5, %v5118_v15  ;;  %v2385_v23 = vmul.f32 %v5771_v0, %v5056_v29  ;;  %v2415_v53 = vmul.f32 %v5772_v48, %v5110_v10  ;;  %v2410_v37 = vmul.f32 %v5797_v54, %v5103_v25  ;;  %v5798_v48 = vld [vmem:[#allocation65_spill] sm:$0xff]  ;;  %v3259_v54 = vld [vmem:[%s3613_s8 + $0x60] sm:$0xff] }
 0x4d7   : > { %2516 = vperm.xlu0 %3115, %v2382_v24   ;;  %2441 = vperm.xlu1 %3116, %v2367_v45   ;;  %v2387_v24 = vmul.f32 %v5773_v17, %v5056_v29  ;;  %v5774_v45 = vld [vmem:[#allocation60_spill] sm:$0xff]  ;;  %v5778_v29 = vld [vmem:[#allocation83_spill] sm:$0xff] }
 0x4d8   : > { %v2417_v11 = vmul.f32 %v5778_v29, %v5110_v10 }
 0x4db   : > { %2526 = vperm.xlu0 %3115, %v2384_v35   ;;  %2446 = vperm.xlu1 %3116, %v2368_v36   ;;  %v2423_v35 = vmul.f32 %v5774_v45, %v5118_v15  ;;  %v5775_v36 = vld [vmem:[#allocation40_spill] sm:$0xff]  ;;  %v3249_v45 = vld [vmem:[%s3613_s8 + $0x10] sm:$0xff] }
 0x4df   : > { %2536 = vperm.xlu0 %3115, %v2386_v32   ;;  %2451 = vperm.xlu1 %3116, %v2369_v6   ;;  %v2389_v32 = vmul.f32 %v5775_v36, %v5071_v57  ;;  %v5776_v6 = vld [vmem:[#allocation79_spill] sm:$0xff] }
 0x4e3   : > { %2546 = vperm.xlu0 %3115, %v2388_v16   ;;  %2456 = vperm.xlu1 %3116, %v2370_v50   ;;  %v2409_v16 = vmul.f32 %v5776_v6, %v5103_v25  ;;  %v5777_v50 = vld [vmem:[#allocation41_spill] sm:$0xff] }
 0x4e7   : > { %2556 = vperm.xlu0 %3115, %v2390_v20   ;;  %2461 = vperm.xlu1 %3116, %v2371_v49   ;;  %v2391_v20 = vmul.f32 %v5777_v50, %v5071_v57  ;;  %v5779_v49 = vld [vmem:[#allocation42_spill] sm:$0xff] }
 0x4e8   : > { %v2393_v39 = vmul.f32 %v5779_v49, %v5071_v57  ;;  %v5800_v49 = vld [vmem:[#allocation59_spill] sm:$0xff] }
 0x4eb   : > { %2566 = vperm.xlu0 %3115, %v2392_v43   ;;  %2466 = vperm.xlu1 %3116, %v2372_v4   ;;  %v5780_v43 = vld [vmem:[#allocation22_spill] sm:$0xff]  ;;  %v5781_v4 = vld [vmem:[#allocation43_spill] sm:$0xff] }
 0x4ec   : > { %v2425_v62 = vmul.f32 %v5780_v43, %v5118_v15  ;;  %v2395_v60 = vmul.f32 %v5781_v4, %v5071_v57  ;;  %v5786_v57 = vld [vmem:[#allocation62_spill] sm:$0xff]  ;;  %v3251_v4 = vld [vmem:[%s3613_s8 + $0x20] sm:$0xff] }
 0x4ed   : > { %v2427_v51 = vmul.f32 %v5786_v57, %v5118_v15 }
 0x4ef   : > { %2576 = vperm.xlu0 %3115, %v2394_v30   ;;  %2476 = vperm.xlu1 %3116, %v2374_v59   ;;  %v5782_v30 = vld [vmem:[#allocation54_spill] sm:$0xff]  ;;  %v5783_v59 = vld [vmem:[#allocation44_spill] sm:$0xff] }
 0x4f0   : > { %v2411_v58 = vmul.f32 %v5782_v30, %v5103_v25  ;;  %v2397_v22 = vmul.f32 %v5783_v59, %v5087_v18  ;;  %v5801_v30 = vld [vmem:[#allocation67_spill] sm:$0xff] }
 0x4f3   : > { %2586 = vperm.xlu0 %3115, %v2396_v61   ;;  %2481 = vperm.xlu1 %3116, %v2375_v41   ;;  %v2419_v61 = vmul.f32 %v5784_v2, %v5110_v10  ;;  %v2399_v41 = vmul.f32 %v5785_v7, %v5087_v18  ;;  %v3252_v2 = vld [vmem:[%s3613_s8 + $0x28] sm:$0xff] }
 0x4f7   : > { %2596 = vperm.xlu0 %3115, %v2398_v8   ;;  %2486 = vperm.xlu1 %3116, %v2376_v55   ;;  %v5787_v8 = vld [vmem:[#allocation48_spill] sm:$0xff]  ;;  %v5788_v55 = vld [vmem:[#allocation75_spill] sm:$0xff] }
 0x4f8   : > { %v2401_v52 = vmul.f32 %v5787_v8, %v5087_v18  ;;  %v2428_v63 = vmul.f32 %v5788_v55, %v5118_v15  ;;  %v3254_v55 = vld [vmem:[%s3613_s8 + $0x38] sm:$0xff] }
 0x4fb   : > { %2606 = vperm.xlu0 %3115, %v2400_v34   ;;  %2491 = vperm.xlu1 %3116, %v2377_v13   ;;  %v5789_v34 = vld [vmem:[#allocation50_spill] sm:$0xff]  ;;  %v5790_v13 = vld [vmem:[#allocation77_spill] sm:$0xff] }
 0x4fc   : > { %v2403_v26 = vmul.f32 %v5789_v34, %v5087_v18  ;;  %v2405_v33 = vmul.f32 %v5790_v13, %v5103_v25  ;;  %v5794_v18 = vld [vmem:[#allocation55_spill] sm:$0xff] }
 0x4fd   : > { %v2408_v12 = vmul.f32 %v5794_v18, %v5103_v25 }
 0x4ff   : > { %2616 = vperm.xlu0 %3115, %v2402_v46   ;;  %2496 = vperm.xlu1 %3116, %v2378_v19   ;;  %v5791_v46 = vld [vmem:[#allocation81_spill] sm:$0xff]  ;;  %v5792_v19 = vld [vmem:[#allocation52_spill] sm:$0xff] }
 0x500   : > { %v2413_v47 = vmul.f32 %v5791_v46, %v5110_v10  ;;  %v2407_v42 = vmul.f32 %v5792_v19, %v5103_v25  ;;  %v3256_v46 = vld [vmem:[%s3613_s8 + $0x48] sm:$0xff] }
 0x503   : > { %2626 = vperm.xlu0 %3115, %v2404_v1   ;;  %2501 = vperm.xlu1 %3116, %v2379_v21   ;;  %v2422_v1 = vmul.f32 %v5793_v31, %v5118_v15  ;;  %v5795_v21 = vld [vmem:[#allocation63_spill] sm:$0xff]  ;;  %v3257_v31 = vld [vmem:[%s3613_s8 + $0x50] sm:$0xff] }
 0x504   : > { %v2416_v14 = vmul.f32 %v5795_v21, %v5110_v10 }
 0x507   : > { %2636 = vperm.xlu0 %3115, %v2406_v38   ;;  %2511 = vperm.xlu1 %3116, %v2381_v3   ;;  %v2424_v38 = vmul.f32 %v5796_v9, %v5118_v15 }
 0x50b   : > { %2676 = vperm.xlu0 %3115, %v2414_v44   ;;  %2521 = vperm.xlu1 %3116, %v2383_v27   ;;  %v3247_v27 = vld [vmem:[%s3613_s8] sm:$0xff] }
 0x50f   : > { %2711 = vperm.xlu0 %3115, %v2421_v28   ;;  %2531 = vperm.xlu1 %3116, %v2385_v23   ;;  %v3248_v28 = vld [vmem:[%s3613_s8 + $0x8] sm:$0xff] }
 0x513   : > { %2681 = vperm.xlu0 %3115, %v2415_v53   ;;  %2541 = vperm.xlu1 %3116, %v2387_v24   ;;  %v2418_v53 = vmul.f32 %v5798_v48, %v5110_v10 }
 0x517   : > { %2721 = vperm.xlu0 %3115, %v2423_v35   ;;  %2551 = vperm.xlu1 %3116, %v2389_v32   ;;  %v5799_v32 = vld [vmem:[#allocation73_spill] sm:$0xff] }
 0x518   : > { %v2426_v6 = vmul.f32 %v5799_v32, %v5118_v15 }
 0x51b   : > { %2651 = vperm.xlu0 %3115, %v2409_v16   ;;  %2561 = vperm.xlu1 %3116, %v2391_v20   ;;  %v3250_v20 = vld [vmem:[%s3613_s8 + $0x18] sm:$0xff] }
 0x51f   : > { %2691 = vperm.xlu0 %3115, %v2417_v11   ;;  %2571 = vperm.xlu1 %3116, %v2393_v39   ;;  %v2412_v39 = vmul.f32 %v5800_v49, %v5103_v25 }
 0x523   : > { %2731 = vperm.xlu0 %3115, %v2425_v62   ;;  %2581 = vperm.xlu1 %3116, %v2395_v60  }
 0x527   : > { %2661 = vperm.xlu0 %3115, %v2411_v58   ;;  %2591 = vperm.xlu1 %3116, %v2397_v22   ;;  %v2420_v58 = vmul.f32 %v5801_v30, %v5110_v10 }
 0x52b   : > { %2701 = vperm.xlu0 %3115, %v2419_v61   ;;  %2601 = vperm.xlu1 %3116, %v2399_v41   ;;  %v3253_v41 = vld [vmem:[%s3613_s8 + $0x30] sm:$0xff] }
 0x52f   : > { %2741 = vperm.xlu0 %3115, %v2427_v51   ;;  %2611 = vperm.xlu1 %3116, %v2401_v52  }
 0x533   : > { %2746 = vperm.xlu0 %3115, %v2428_v63   ;;  %2621 = vperm.xlu1 %3116, %v2403_v26   ;;  %v3255_v26 = vld [vmem:[%s3613_s8 + $0x40] sm:$0xff] }
 0x537   : > { %2631 = vperm.xlu1 %3116, %v2405_v33  }
 0x53b   : > { %2671 = vperm.xlu1 %3116, %v2413_v47  }
 0x53f   : > { %2641 = vperm.xlu1 %3116, %v2407_v42  }
 0x543   : > { %2716 = vperm.xlu1 %3116, %v2422_v1  }
 0x547   : > { %2646 = vperm.xlu1 %3116, %v2408_v12  }
 0x54b   : > { %2686 = vperm.xlu1 %3116, %v2416_v14   ;;  %v3258_v14 = vld [vmem:[%s3613_s8 + $0x58] sm:$0xff] }
 0x54e   : > { %v2472_v56 = vpop.permute.xlu0 %2471  ;;  %v2432_v3 = vpop.permute.xlu1 %2431 }
 0x54f   : > { %2726 = vperm.xlu1 %3116, %v2424_v38   ;;  %v2749_v5 = vmul.f32 %v3247_v27, %v2432_v3  ;;  %v2757_v13 = vmul.f32 %v3255_v26, %v2472_v56 }
 0x552   : > { %v5180_v44 = vpop.permute.xlu0 %2506  ;;  %v2437_v40 = vpop.permute.xlu1 %2436 }
 0x553   : > { %v2750_v0 = vmul.f32 %v3248_v28, %v2437_v40  ;;  %2656 = vperm.xlu1 %3116, %v2410_v37   ;;  %v3260_v28 = vld [vmem:[%s3613_s8 + $0x68] sm:$0xff] }
 0x555   : > { %v2813_v23 = vadd.f32 %v2750_v0, %v2749_v5 }
 0x556   : > { %v5186_v17 = vpop.permute.xlu0 %2516  ;;  %v2442_v24 = vpop.permute.xlu1 %2441 }
 0x557   : > { %v2751_v35 = vmul.f32 %v3249_v45, %v2442_v24  ;;  %2696 = vperm.xlu1 %3116, %v2418_v53   ;;  %v3261_v45 = vld [vmem:[%s3613_s8 + $0x70] sm:$0xff] }
 0x559   : > { %v2814_v36 = vadd.f32 %v2813_v23, %v2751_v35 }
 0x55a   : > { %v5191_v16 = vpop.permute.xlu0 %2526  ;;  %v2447_v50 = vpop.permute.xlu1 %2446 }
 0x55b   : > { %v2752_v29 = vmul.f32 %v3250_v20, %v2447_v50  ;;  %2736 = vperm.xlu1 %3116, %v2426_v6   ;;  %v3263_v20 = vld [vmem:[%s3613_s8 + $0x88] sm:$0xff] }
 0x55d   : > { %v2815_v11 = vadd.f32 %v2814_v36, %v2752_v29  ;;  %v3262_v36 = vld [vmem:[%s3613_s8 + $0x78] sm:$0xff]  ;;  %v2766_v29 = vmul.f32 %v3263_v20, %v5186_v17 }
 0x55e   : > { %v5196_v43 = vpop.permute.xlu0 %2536  ;;  %v2452_v62 = vpop.permute.xlu1 %2451  ;;  %v2764_v32 = vmul.f32 %v3262_v36, %v5180_v44  ;;  %v3265_v44 = vld [vmem:[%s3613_s8 + $0x90] sm:$0xff] }
 0x55f   : > { %v2753_v60 = vmul.f32 %v3251_v4, %v2452_v62  ;;  %2666 = vperm.xlu1 %3116, %v2412_v39   ;;  %v3264_v62 = vld [vmem:[%s3613_s8 + $0x80] sm:$0xff] }
 0x561   : > { %v2816_v15 = vadd.f32 %v2815_v11, %v2753_v60 }
 0x562   : > { %v2457_v59 = vpop.permute.xlu1 %2456  ;;  %v5201_v22 = vpop.permute.xlu0 %2546 }
 0x563   : > { %v2754_v61 = vmul.f32 %v3252_v2, %v2457_v59  ;;  %2706 = vperm.xlu1 %3116, %v2420_v58  }
 0x565   : > { %v2817_v25 = vadd.f32 %v2816_v15, %v2754_v61  ;;  %v3266_v61 = vld [vmem:[%s3613_s8 + $0x98] sm:$0xff] }
 0x566   : > { %v2462_v7 = vpop.permute.xlu1 %2461  ;;  %v5205_v51 = vpop.permute.xlu0 %2556 }
 0x567   : > { %v2755_v57 = vmul.f32 %v3253_v41, %v2462_v7 }
 0x569   : > { %v2818_v8 = vadd.f32 %v2817_v25, %v2755_v57  ;;  %v2768_v25 = vmul.f32 %v3266_v61, %v5191_v16  ;;  %v3275_v61 = vld [vmem:[%s3613_s8 + $0x108] sm:$0xff] }
 0x56a   : > { %v2467_v52 = vpop.permute.xlu1 %2466  ;;  %v5209_v33 = vpop.permute.xlu0 %2566 }
 0x56b   : > { %v2756_v10 = vmul.f32 %v3254_v55, %v2467_v52 }
 0x56d   : > { %v2819_v63 = vadd.f32 %v2818_v8, %v2756_v10  ;;  %v3267_v10 = vld [vmem:[%s3613_s8 + $0xa0] sm:$0xff] }
 0x56e   : > { %v2477_v34 = vpop.permute.xlu1 %2476  ;;  %v5213_v18 = vpop.permute.xlu0 %2576 }
 0x56f   : > { %v2758_v47 = vmul.f32 %v3256_v46, %v2477_v34  ;;  %v2820_v5 = vrot.slane %v2819_v63, 4  ;;  %v3268_v34 = vld [vmem:[%s3613_s8 + $0xa8] sm:$0xff] }
 0x570   : > { %v2770_v26 = vmul.f32 %v3268_v34, %v5196_v43  ;;  %v3277_v34 = vld [vmem:[%s3613_s8 + $0xd8] sm:$0xff] }
 0x571   : > { %v2826_v19 = vadd.f32 %v2758_v47, %v2757_v13  ;;  %v2821_v24 = vadd.f32 %v2820_v5, %v2819_v63 }
 0x572   : > { %v2482_v42 = vpop.permute.xlu1 %2481  ;;  %v5216_v3 = vpop.permute.xlu0 %2586 }
 0x573   : > { %v2759_v1 = vmul.f32 %v3257_v31, %v2482_v42  ;;  %v2822_v11 = vrot.slane %v2821_v24, 2 }
 0x575   : > { %v2827_v12 = vadd.f32 %v2826_v19, %v2759_v1  ;;  %v2823_v58 = vadd.f32 %v2822_v11, %v2821_v24  ;;  %v3269_v1 = vld [vmem:[%s3613_s8 + $0xb0] sm:$0xff] }
 0x576   : > { %v2487_v21 = vpop.permute.xlu1 %2486  ;;  %v5220_v23 = vpop.permute.xlu0 %2596 }
 0x577   : > { %v2760_v9 = vmul.f32 %v3258_v14, %v2487_v21  ;;  %v2824_v8 = vrot.slane %v2823_v58, 1  ;;  %v3270_v21 = vld [vmem:[%s3613_s8 + $0xb8] sm:$0xff] }
 0x578   : > { %v2772_v14 = vmul.f32 %v3270_v21, %v5201_v22 }
 0x579   : > { %v2828_v38 = vadd.f32 %v2827_v12, %v2760_v9  ;;  %v2825_v19 = vadd.f32 %v2824_v8, %v2823_v58  ;;  %v3273_v58 = vld [vmem:[%s3613_s8 + $0xc8] sm:$0xff] }
 0x57a   : > { %v2492_v56 = vpop.permute.xlu1 %2491  ;;  %v5227_v49 = vpop.permute.xlu0 %2606 }
 0x57b   : > { %v2761_v37 = vmul.f32 %v3259_v54, %v2492_v56 }
 0x57d   : > { %v2829_v40 = vadd.f32 %v2828_v38, %v2761_v37 }
 0x57e   : > { %v2497_v27 = vpop.permute.xlu1 %2496  ;;  %v5233_v7 = vpop.permute.xlu0 %2616 }
 0x57f   : > { %v2762_v0 = vmul.f32 %v3260_v28, %v2497_v27 }
 0x581   : > { %v2830_v48 = vadd.f32 %v2829_v40, %v2762_v0 }
 0x582   : > { %v2502_v53 = vpop.permute.xlu1 %2501  ;;  %v5238_v16 = vpop.permute.xlu0 %2626 }
 0x583   : > { %v2763_v35 = vmul.f32 %v3261_v45, %v2502_v53 }
 0x585   : > { %v2831_v6 = vadd.f32 %v2830_v48, %v2763_v35 }
 0x586   : > { %v2512_v50 = vpop.permute.xlu1 %2511  ;;  %v5244_v37 = vpop.permute.xlu0 %2636 }
 0x587   : > { %v2832_v39 = vadd.f32 %v2831_v6, %v2764_v32  ;;  %v2765_v4 = vmul.f32 %v3264_v62, %v2512_v50  ;;  %v3271_v62 = vld [vmem:[%s3613_s8 + $0xc0] sm:$0xff] }
 0x589   : > { %v2833_v60 = vrot.slane %v2832_v39, 4  ;;  %v2839_v15 = vadd.f32 %v2766_v29, %v2765_v4 }
 0x58a   : > { %v2522_v30 = vpop.permute.xlu1 %2521  ;;  %v5246_v0 = vpop.permute.xlu0 %2676 }
 0x58b   : > { %v2834_v59 = vadd.f32 %v2833_v60, %v2832_v39  ;;  %v2767_v2 = vmul.f32 %v3265_v44, %v2522_v30  ;;  %v3274_v44 = vld [vmem:[%s3613_s8 + $0xd0] sm:$0xff] }
 0x58d   : > { %v2835_v17 = vrot.slane %v2834_v59, 2  ;;  %v2840_v41 = vadd.f32 %v2839_v15, %v2767_v2  ;;  %v3272_v15 = vld [vmem:[%s3613_s8 + $0x100] sm:$0xff] }
 0x58e   : > { %v2532_v57 = vpop.permute.xlu1 %2531  ;;  %v5248_v45 = vpop.permute.xlu0 %2711 }
 0x58f   : > { %v2836_v52 = vadd.f32 %v2835_v17, %v2834_v59  ;;  %v2841_v55 = vadd.f32 %v2840_v41, %v2768_v25  ;;  %v2769_v63 = vmul.f32 %v3267_v10, %v2532_v57  ;;  %v2774_v59 = vmul.f32 %v3273_v58, %v5205_v51  ;;  %v3276_v41 = vld [vmem:[%s3613_s8 + $0x110] sm:$0xff] }
 0x590   : > { %v2782_v25 = vmul.f32 %v3275_v61, %v5220_v23  ;;  %v2776_v51 = vmul.f32 %v3277_v34, %v5209_v33 }
 0x591   : > { %v2837_v13 = vrot.slane %v2836_v52, 1  ;;  %v2842_v46 = vadd.f32 %v2841_v55, %v2769_v63 }
 0x592   : > { %v2542_v47 = vpop.permute.xlu1 %2541  ;;  %v5253_v6 = vpop.permute.xlu0 %2681 }
 0x593   : > { %v2838_v42 = vadd.f32 %v2837_v13, %v2836_v52  ;;  %v2843_v31 = vadd.f32 %v2842_v46, %v2770_v26  ;;  %v2771_v12 = vmul.f32 %v3269_v1, %v2542_v47  ;;  %v3278_v13 = vld [vmem:[%s3613_s8 + $0x118] sm:$0xff]  ;;  %v3280_v1 = vld [vmem:[%s3613_s8 + $0x120] sm:$0xff] }
 0x594   : > { %v2784_v23 = vmul.f32 %v3278_v13, %v5227_v49  ;;  %v3297_v13 = vld [vmem:[%s3613_s8 + $0x190] sm:$0xff] }
 0x595   : > { %v2925_v9 = vsel %vm1489_vm7, %v2838_v42, %v2825_v19  ;;  %v2844_v38 = vadd.f32 %v2843_v31, %v2771_v12  ;;  %v3279_v19 = vld [vmem:[%s3613_s8 + $0xe0] sm:$0xff] }
 0x596   : > { %v2552_v56 = vpop.permute.xlu1 %2551  ;;  %v5255_v20 = vpop.permute.xlu0 %2721 }
 0x597   : > { %v2845_v54 = vadd.f32 %v2844_v38, %v2772_v14  ;;  %v2773_v4 = vmul.f32 %v3271_v62, %v2552_v56  ;;  %v3281_v38 = vld [vmem:[%s3613_s8 + $0xe8] sm:$0xff] }
 0x598   : > { %v2778_v49 = vmul.f32 %v3281_v38, %v5213_v18  ;;  %v3287_v18 = vld [vmem:[%s3613_s8 + $0x148] sm:$0xff] }
 0x599   : > { %v2846_v43 = vrot.slane %v2845_v54, 4  ;;  %v2852_v8 = vadd.f32 %v2774_v59, %v2773_v4  ;;  %v2790_v4 = vmul.f32 %v3287_v18, %v5244_v37  ;;  %v3300_v38 = vld [vmem:[%s3613_s8 + $0x168] sm:$0xff] }
 0x59a   : > { %v2562_v40 = vpop.permute.xlu1 %2561  ;;  %v5257_v39 = vpop.permute.xlu0 %2651 }
 0x59b   : > { %v2847_v27 = vadd.f32 %v2846_v43, %v2845_v54  ;;  %v2775_v2 = vmul.f32 %v3274_v44, %v2562_v40  ;;  %v3282_v54 = vld [vmem:[%s3613_s8 + $0x128] sm:$0xff] }
 0x59c   : > { %v2786_v43 = vmul.f32 %v3282_v54, %v5233_v7  ;;  %v3288_v7 = vld [vmem:[%s3613_s8 + $0x1c0] sm:$0xff] }
 0x59d   : > { %v2848_v5 = vrot.slane %v2847_v27, 2  ;;  %v2853_v10 = vadd.f32 %v2852_v8, %v2775_v2  ;;  %v3301_v54 = vld [vmem:[%s3613_s8 + $0x1e0] sm:$0xff] }
 0x59e   : > { %v2572_v28 = vpop.permute.xlu1 %2571  ;;  %v5266_v17 = vpop.permute.xlu0 %2691 }
 0x59f   : > { %v2849_v48 = vadd.f32 %v2848_v5, %v2847_v27  ;;  %v2854_v47 = vadd.f32 %v2853_v10, %v2776_v51  ;;  %v2777_v42 = vmul.f32 %v3279_v19, %v2572_v28  ;;  %v3283_v27 = vld [vmem:[%s3613_s8 + $0xf0] sm:$0xff]  ;;  %v3296_v51 = vld [vmem:[%s3613_s8 + $0x1d8] sm:$0xff] }
 0x5a1   : > { %v2850_v53 = vrot.slane %v2849_v48, 1  ;;  %v2855_v14 = vadd.f32 %v2854_v47, %v2777_v42 }
 0x5a2   : > { %v2582_v24 = vpop.permute.xlu1 %2581  ;;  %v5273_v46 = vpop.permute.xlu0 %2731 }
 0x5a3   : > { %v2851_v22 = vadd.f32 %v2850_v53, %v2849_v48  ;;  %v2856_v40 = vadd.f32 %v2855_v14, %v2778_v49  ;;  %v2779_v5 = vmul.f32 %v3283_v27, %v2582_v24  ;;  %v3284_v48 = vld [vmem:[%s3613_s8 + $0x130] sm:$0xff] }
 0x5a5   : > { %v5251_v35 = vsel %vm1491_vm8, %v2851_v22, %v2925_v9  ;;  %v3285_v22 = vld [vmem:[%s3613_s8 + $0x140] sm:$0xff]  ;;  %v2857_v2 = vadd.f32 %v2856_v40, %v2779_v5 }
 0x5a6   : > { %v2592_v36 = vpop.permute.xlu1 %2591  ;;  %v5277_v33 = vpop.permute.xlu0 %2661  ;;  %v3302_v5 = vld [vmem:[%s3613_s8 + $0x1a0] sm:$0xff] }
 0x5a7   : > { %v2781_v30 = vmul.f32 %v3272_v15, %v2592_v36  ;;  %v2805_v15 = vmul.f32 %v3288_v7, %v5248_v45  ;;  %v3293_v45 = vld [vmem:[%s3613_s8 + $0xf8] sm:$0xff]  ;;  %v3306_v7 = vld [vmem:[%s3613_s8 + $0x1f0] sm:$0xff] }
 0x5a8   : > { %v2780_v8 = vmul.f32 %v3293_v45, %v5216_v3 }
 0x5a9   : > { %v2865_v55 = vadd.f32 %v2782_v25, %v2781_v30  ;;  %v3289_v30 = vld [vmem:[%s3613_s8 + $0x180] sm:$0xff] }
 0x5aa   : > { %v2602_v32 = vpop.permute.xlu1 %2601  ;;  %v5291_v24 = vpop.permute.xlu0 %2701  ;;  %v2858_v47 = vadd.f32 %v2857_v2, %v2780_v8 }
 0x5ab   : > { %v2783_v57 = vmul.f32 %v3276_v41, %v2602_v32  ;;  %v3286_v32 = vld [vmem:[%s3613_s8 + $0x1c8] sm:$0xff]  ;;  %v3292_v41 = vld [vmem:[%s3613_s8 + $0x158] sm:$0xff] }
 0x5ad   : > { %v2866_v63 = vadd.f32 %v2865_v55, %v2783_v57  ;;  %v3294_v55 = vld [vmem:[%s3613_s8 + $0x138] sm:$0xff] }
 0x5ae   : > { %v2612_v50 = vpop.permute.xlu1 %2611  ;;  %v2742_v3 = vpop.permute.xlu0 %2741 }
 0x5af   : > { %v2867_v31 = vadd.f32 %v2866_v63, %v2784_v23  ;;  %v2785_v12 = vmul.f32 %v3280_v1, %v2612_v50  ;;  %v2799_v23 = vmul.f32 %v3297_v13, %v5253_v6  ;;  %v2859_v6 = vrot.slane %v2858_v47, 4 }
 0x5b1   : > { %v2868_v9 = vadd.f32 %v2867_v31, %v2785_v12  ;;  %v3298_v31 = vld [vmem:[%s3613_s8 + $0x198] sm:$0xff]  ;;  %v2860_v18 = vadd.f32 %v2859_v6, %v2858_v47 }
 0x5b2   : > { %v2622_v29 = vpop.permute.xlu1 %2621 }
 0x5b3   : > { %v2869_v28 = vadd.f32 %v2868_v9, %v2786_v43  ;;  %v2787_v53 = vmul.f32 %v3284_v48, %v2622_v29  ;;  %v3290_v29 = vld [vmem:[%s3613_s8 + $0x150] sm:$0xff]  ;;  %v2809_v43 = vmul.f32 %v3301_v54, %v5273_v46 }
 0x5b5   : > { %v2870_v61 = vadd.f32 %v2869_v28, %v2787_v53  ;;  %v2801_v28 = vmul.f32 %v3302_v5, %v5266_v17 }
 0x5b6   : > { %v2632_v11 = vpop.permute.xlu1 %2631 }
 0x5b7   : > { %v2789_v36 = vmul.f32 %v3285_v22, %v2632_v11  ;;  %v3291_v11 = vld [vmem:[%s3613_s8 + $0x188] sm:$0xff] }
 0x5b8   : > { %v2798_v44 = vmul.f32 %v3291_v11, %v5246_v0  ;;  %v3303_v22 = vld [vmem:[%s3613_s8 + $0x1a8] sm:$0xff] }
 0x5b9   : > { %v2878_v37 = vadd.f32 %v2790_v4, %v2789_v36  ;;  %v3305_v4 = vld [vmem:[%s3613_s8 + $0x170] sm:$0xff] }
 0x5ba   : > { %v2672_v60 = vpop.permute.xlu1 %2671  ;;  %v2795_v46 = vmul.f32 %v3305_v4, %v5277_v33 }
 0x5bb   : > { %v2797_v58 = vmul.f32 %v3289_v30, %v2672_v60  ;;  %v2788_v60 = vmul.f32 %v3294_v55, %v5238_v16 }
 0x5bd   : > { %v2891_v63 = vadd.f32 %v2798_v44, %v2797_v58  ;;  %v2871_v19 = vadd.f32 %v2870_v61, %v2788_v60 }
 0x5be   : > { %v2642_v52 = vpop.permute.xlu1 %2641 }
 0x5bf   : > { %v2791_v59 = vmul.f32 %v3290_v29, %v2642_v52  ;;  %v3295_v52 = vld [vmem:[%s3613_s8 + $0x1d0] sm:$0xff]  ;;  %v2892_v14 = vadd.f32 %v2891_v63, %v2799_v23  ;;  %v2872_v40 = vrot.slane %v2871_v19, 4  ;;  %v3307_v29 = vld [vmem:[%s3613_s8 + $0x1f8] sm:$0xff] }
 0x5c0   : > { %v2807_v0 = vmul.f32 %v3295_v52, %v5255_v20  ;;  %v3310_v63 = vld [vmem:[%s3613_s8 + $0x1b8] sm:$0xff] }
 0x5c1   : > { %v2879_v34 = vadd.f32 %v2878_v37, %v2791_v59  ;;  %v2873_v30 = vadd.f32 %v2872_v40, %v2871_v19  ;;  %v3308_v37 = vld [vmem:[%s3613_s8 + $0x178] sm:$0xff] }
 0x5c2   : > { %v2717_v26 = vpop.permute.xlu1 %2716 }
 0x5c3   : > { %v2806_v50 = vmul.f32 %v3286_v32, %v2717_v26  ;;  %v2874_v8 = vrot.slane %v2873_v30, 2 }
 0x5c5   : > { %v2904_v25 = vadd.f32 %v2806_v50, %v2805_v15  ;;  %v3304_v50 = vld [vmem:[%s3613_s8 + $0x1e8] sm:$0xff]  ;;  %v2811_v15 = vmul.f32 %v3306_v7, %v2742_v3 }
 0x5c6   : > { %v2647_v21 = vpop.permute.xlu1 %2646 }
 0x5c7   : > { %v2792_v57 = vmul.f32 %v3292_v41, %v2647_v21  ;;  %v2905_v1 = vadd.f32 %v2904_v25, %v2807_v0  ;;  %v3299_v21 = vld [vmem:[%s3613_s8 + $0x160] sm:$0xff]  ;;  %v2861_v41 = vrot.slane %v2860_v18, 2 }
 0x5c8   : > { %v2793_v20 = vmul.f32 %v3299_v21, %v5257_v39  ;;  %v2747_v39 = vpop.permute.xlu0 %2746 }
 0x5c9   : > { %v2880_v42 = vadd.f32 %v2879_v34, %v2792_v57  ;;  %v2812_v59 = vmul.f32 %v3307_v29, %v2747_v39  ;;  %v3309_v57 = vld [vmem:[%s3613_s8 + $0x1b0] sm:$0xff] }
 0x5ca   : > { %v2687_v56 = vpop.permute.xlu1 %2686  ;;  %v2803_v45 = vmul.f32 %v3309_v57, %v5291_v24 }
 0x5cb   : > { %v2800_v16 = vmul.f32 %v3298_v31, %v2687_v56  ;;  %v2881_v56 = vadd.f32 %v2880_v42, %v2793_v20 }
 0x5cd   : > { %v2893_v27 = vadd.f32 %v2892_v14, %v2800_v16 }
 0x5ce   : > { %v2727_v62 = vpop.permute.xlu1 %2726 }
 0x5cf   : > { %v2808_v26 = vmul.f32 %v3296_v51, %v2727_v62  ;;  %v2894_v58 = vadd.f32 %v2893_v27, %v2801_v28  ;;  %v2862_v51 = vadd.f32 %v2861_v41, %v2860_v18 }
 0x5d1   : > { %v2906_v9 = vadd.f32 %v2905_v1, %v2808_v26  ;;  %v2875_v26 = vadd.f32 %v2874_v8, %v2873_v30  ;;  %v2863_v24 = vrot.slane %v2862_v51, 1 }
 0x5d2   : > { %v2657_v10 = vpop.permute.xlu1 %2656 }
 0x5d3   : > { %v2794_v49 = vmul.f32 %v3300_v38, %v2657_v10  ;;  %v2907_v32 = vadd.f32 %v2906_v9, %v2809_v43  ;;  %v2876_v31 = vrot.slane %v2875_v26, 1  ;;  %v2864_v14 = vadd.f32 %v2863_v24, %v2862_v51 }
 0x5d5   : > { %v2882_v53 = vadd.f32 %v2881_v56, %v2794_v49  ;;  %v2877_v9 = vadd.f32 %v2876_v31, %v2875_v26  ;;  %v2927_v43 = vsel %vm1493_vm9, %v2864_v14, %v5251_v35 }
 0x5d6   : > { %v2697_v12 = vpop.permute.xlu1 %2696 }
 0x5d7   : > { %v2802_v36 = vmul.f32 %v3303_v22, %v2697_v12  ;;  %v2883_v61 = vadd.f32 %v2882_v53, %v2795_v46  ;;  %v2928_v27 = vsel %vm1495_vm10, %v2877_v9, %v2927_v43 }
 0x5d9   : > { %v2895_v44 = vadd.f32 %v2894_v58, %v2802_v36 }
 0x5da   : > { %v2737_v48 = vpop.permute.xlu1 %2736 }
 0x5db   : > { %v2810_v62 = vmul.f32 %v3304_v50, %v2737_v48  ;;  %v2896_v0 = vadd.f32 %v2895_v44, %v2803_v45 }
 0x5dd   : > { %v2908_v17 = vadd.f32 %v2907_v32, %v2810_v62 }
 0x5de   : > { %v2667_v11 = vpop.permute.xlu1 %2666 }
 0x5df   : > { %v2909_v2 = vadd.f32 %v2908_v17, %v2811_v15  ;;  %v2796_v25 = vmul.f32 %v3308_v37, %v2667_v11 }
 0x5e1   : > { %v2910_v33 = vadd.f32 %v2909_v2, %v2812_v59  ;;  %v2884_v55 = vadd.f32 %v2883_v61, %v2796_v25 }
 0x5e2   : > { %v2707_v60 = vpop.permute.xlu1 %2706 }
 0x5e3   : > { %v2911_v10 = vrot.slane %v2910_v33, 4  ;;  %v2885_v52 = vrot.slane %v2884_v55, 4  ;;  %v2804_v34 = vmul.f32 %v3310_v63, %v2707_v60 }
 0x5e5   : > { %v2912_v13 = vadd.f32 %v2911_v10, %v2910_v33  ;;  %v2886_v23 = vadd.f32 %v2885_v52, %v2884_v55  ;;  %v2897_v47 = vadd.f32 %v2896_v0, %v2804_v34 }
 0x5e7   : > { %v2913_v3 = vrot.slane %v2912_v13, 2  ;;  %v2887_v19 = vrot.slane %v2886_v23, 2  ;;  %v2898_v42 = vrot.slane %v2897_v47, 4 }
 0x5e9   : > { %v2888_v16 = vadd.f32 %v2887_v19, %v2886_v23  ;;  %v2899_v1 = vadd.f32 %v2898_v42, %v2897_v47  ;;  %v2914_v12 = vadd.f32 %v2913_v3, %v2912_v13 }
 0x5eb   : > { %v2889_v21 = vrot.slane %v2888_v16, 1  ;;  %v2900_v20 = vrot.slane %v2899_v1, 2  ;;  %v2915_v49 = vrot.slane %v2914_v12, 1 }
 0x5ed   : > { %v2901_v38 = vadd.f32 %v2900_v20, %v2899_v1  ;;  %v2890_v6 = vadd.f32 %v2889_v21, %v2888_v16  ;;  %v2916_v56 = vadd.f32 %v2915_v49, %v2914_v12 }
 0x5ef   : > { %v2902_v54 = vrot.slane %v2901_v38, 1  ;;  %v2929_v5 = vsel %vm1497_vm11, %v2890_v6, %v2928_v27 }
 0x5f1   : > { %v2903_v40 = vadd.f32 %v2902_v54, %v2901_v38 }
 0x5f3   : > { %v2930_v28 = vsel %vm1499_vm12, %v2903_v40, %v2929_v5 }
 0x5f4   : > { %v2931_v35 = vsel %vm1501_vm13, %v2916_v56, %v2930_v28 }
 0x5f5   : > { %2933 = vst [vmem:[%s226_s28] sm:$0xff] %v2931_v35 }
 0x5f6   : > { %3384 = shalt.err (!%p3381_p3)
}
 0x5f7   : > { %s3385_s20 = scalar_lea.hbm %s5336_s26, 128  ;;  %s3389_s7 = scalar_lea.hbm %s5384_s3, 256 }
 0x5f8   : > { %p3386_p12 = scmp.ne.s32.totalorder %s5336_s26, %s3385_s20  ;;  %p3390_p2 = scmp.lt.u32.totalorder %s5336_s26, %s5384_s3 }
 0x5f9   : > { %p3391_p10 = scmp.lt.u32.totalorder %s3389_s7, %s3385_s20  ;;  %p3393_p13 = scmp.lt.u32.totalorder %s3385_s20, %s5336_s26 }
 0x5fa   : > { %p3387_p8 = pnand %p3386_p12, %p5802_p1 }
 0x5fb   : > { %p3392_p6 = por %p3391_p10, %p3390_p2 }
 0x5fc   : > { %p3388_p0 = pneg %p3387_p8 }
 0x5fd   : > { %p3394_p11 = por %p3393_p13, %p3392_p6 }
 0x5ff   : > { %p3395_p4 = pnand %p3394_p11, %p3388_p0 }
 0x601   : > { %3398 = shalt.err (!%p3395_p4)
}
 0x602   : > { %3065 = dma.vmem_to_hbm [thread:$0]  (%p5802_p1), %s5338_s29, 128, %s5336_s26, %s2935_s16  }
 0x603 PF: > { %s2960_s27 = sand.u32 1, %s3429_s12   ;;  %p5803_p5 = scmp.ne.s32.totalorder %s5524_s25, 0 }
 0x604   : > { %p5804_p7 = scmp.ge.s32.totalorder %s3441_s15, 2  ;;  %s2961_s4 = scalar_lea.sflag [#allocation4], %s2960_s27 }
 0x606   : > { %p3075_p9 = pnand %p5804_p7, %p5803_p5 }
 0x608   : > { %3424 = dma.done.wait (!%p3075_p9), %s2961_s4, 128  }
 0x609   : > { %3426 = vsyncadd (!%p3075_p9), %s2961_s4, 4294967168  ;;  %p19_p3 = scmp.ge.s32.totalorder %s3494_s18, 4   ;;  %s5805_s12 = smov %s3433_s13 }
 0x60a   : > { %s5806_s13 = smov %s3437_s14  ;;  %s5807_s14 = smov %s3506_s21 }
 0x60b   : > { %s5808_s15 = smov %s3494_s18  ;;  %21 = sbr.rel (!%p19_p3) target bundleno = 7 (0x7), region = 91 }
 0x612   :  { %2966 = vsyncpa [#allocation3], 1 }
 0x613   :  { %2968 = vsyncpa [#allocation3 + $0x1], 1 }
 0x614   :  { %2969 = vsyncpa [#allocation6], 1 }
 0x615   :  { %2971 = vsyncpa [#allocation6 + $0x1], 1 }
 0x616   :  { %2972 = vsyncpa [#allocation4], 1 }
 0x617   :  { %2974 = vsyncpa [#allocation4 + $0x1], 1 }

</bundles_post_ra>
